<compile_context>
chip_gen: v6e
topology: v6e:2x2x1
jax: 0.10.0
libtpu: 0.0.40
codegen_flags: <defaults>
</compile_context>

<pallas_src>
import functools

import jax
import jax.numpy as jnp
from jax.experimental import pallas as pl
from jax.experimental.pallas import tpu as pltpu


ENCODER_DILATIONS = (1, 4, 16)


def _ceil_div(a, b):
    return -(-a // b)


def _padded_len(T, d):
    return _ceil_div(T, d) * d


# ------------------------------ Pallas kernel ------------------------------ #

def _run_layer(in_ref, dst_ref, wih_ref, whh_ref, bgi_ref, bhn_ref,
               *, d, B, T, H):
    """One dilated-GRU layer over the flattened time-major buffer.

    in_ref : (>= n_steps*d*B, F) rows, row index = t*B + b
    dst_ref: (>= n_steps*d*B, H) output rows (same row convention)
    wih_ref: (F, 3H) bf16, columns = [W_ir^T | W_iz^T | W_in^T]
    whh_ref: (H, 3H) bf16, columns = [W_hr^T | W_hz^T | W_hn^T]
    bgi_ref: (1, 3H) f32,  [b_ir+b_hr | b_iz+b_hz | b_in]
    bhn_ref: (1, H)  f32,  b_hn
    Returns the hidden state of the last VALID timestep (B, H) as a live
    value (avoids an unaligned re-read of dst_ref).
    """
    dB = d * B
    n_steps = _ceil_div(T, d)           # static trip count
    rows = n_steps * dB

    # --- Hoisted, consolidated input projection (off the serial h-chain). ---
    # One (rows, F) x (F, 3H) bf16 matmul with f32 accumulation; r/z/n input
    # biases folded in here so they vanish from the recurrence.
    x_all = in_ref[0:rows, :].astype(jnp.bfloat16)
    gi_all = jnp.dot(x_all, wih_ref[...],
                     preferred_element_type=jnp.float32) + bgi_ref[...]

    # Hoist weight load / bias broadcast out of the loop (JAX does not CSE
    # broadcast_in_dim).
    w_hh = whh_ref[...]
    b_hn = jnp.broadcast_to(bhn_ref[...], (dB, H))

    h = jnp.zeros((dB, H), jnp.float32)
    s_last, j_last = divmod(T - 1, d)   # dilated step / phase of timestep T-1
    h_last = None
    pend = []                           # pending slabs for sublane-aligned vst

    for s in range(n_steps):
        gi = gi_all[s * dB:(s + 1) * dB, :]                    # static slice
        gh = jnp.dot(h.astype(jnp.bfloat16), w_hh,
                     preferred_element_type=jnp.float32)       # (dB, 3H)
        # Gate math in f32 (v5e-friendly); gates sliced at static lane offsets.
        r = jax.nn.sigmoid(gi[:, 0:H] + gh[:, 0:H])
        z = jax.nn.sigmoid(gi[:, H:2 * H] + gh[:, H:2 * H])
        n = jnp.tanh(gi[:, 2 * H:3 * H] + r * (gh[:, 2 * H:3 * H] + b_hn))
        h = (1.0 - z) * n + z * h

        if s == s_last:                 # capture last valid timestep (live)
            h_last = h[j_last * B:(j_last + 1) * B, :]

        # Group writebacks into >=8-row sublane-aligned slabs (layer 1 has
        # dB=2 -> 4 steps per store); layers with dB>=8 store every step.
        pend.append(h)
        if len(pend) * dB >= 8 or s == n_steps - 1:
            lo = (s + 1 - len(pend)) * dB
            blk = pend[0] if len(pend) == 1 else jnp.concatenate(pend, axis=0)
            dst_ref[lo:lo + len(pend) * dB, :] = blk
            pend = []

    return h_last


def _drnn_fused_kernel(T, B, dilations, hidden_sizes,
                       x_ref,
                       wih1, whh1, bgi1, bhn1,
                       wih2, whh2, bgi2, bhn2,
                       wih3, whh3, bgi3, bhn3,
                       out_ref, s1_ref, s2_ref, s3_ref,
                       a1_ref, a2_ref):
    """Fused 3-layer dilated-GRU (DRNN) forward.

    x_ref:   (T*B, F0) flattened time-major input (row = t*B + b)
    out_ref: (ceil(T/16)*16*B, H3) layer-3 output (padded rows included)
    s*_ref:  (B, H*) last-timestep output of each layer
    a1/a2:   VMEM scratch holding layer-1 / layer-2 activations.
    """
    d1, d2, d3 = dilations
    H1, H2, H3 = hidden_sizes

    # Zero ONLY the padded tail rows the next (more dilated) layer reads but
    # this layer never writes; all other rows are overwritten below.
    def zero_tail(ref, rows_written):
        total, width = ref.shape
        if total > rows_written:                       # static condition
            ref[rows_written:total, :] = jnp.zeros(
                (total - rows_written, width), jnp.float32)

    zero_tail(a1_ref, _padded_len(T, d1) * B)
    zero_tail(a2_ref, _padded_len(T, d2) * B)

    s1 = _run_layer(x_ref, a1_ref, wih1, whh1, bgi1, bhn1, d=d1, B=B, T=T, H=H1)
    s2 = _run_layer(a1_ref, a2_ref, wih2, whh2, bgi2, bhn2, d=d2, B=B, T=T, H=H2)
    s3 = _run_layer(a2_ref, out_ref, wih3, whh3, bgi3, bhn3, d=d3, B=B, T=T, H=H3)

    s1_ref[...] = s1
    s2_ref[...] = s2
    s3_ref[...] = s3


# ------------------------------- parameters -------------------------------- #

def init_gru_params_torch_layout(key, input_size, hidden_size):
    """PyTorch-style uniform(-1/sqrt(H), 1/sqrt(H)) init, PyTorch GRU layout."""
    k = 1.0 / jnp.sqrt(jnp.float32(hidden_size))
    ks = jax.random.split(key, 4)
    w_ih = jax.random.uniform(ks[0], (3 * hidden_size, input_size),
                              minval=-k, maxval=k, dtype=jnp.float32)
    w_hh = jax.random.uniform(ks[1], (3 * hidden_size, hidden_size),
                              minval=-k, maxval=k, dtype=jnp.float32)
    b_ih = jax.random.uniform(ks[2], (3 * hidden_size,),
                              minval=-k, maxval=k, dtype=jnp.float32)
    b_hh = jax.random.uniform(ks[3], (3 * hidden_size,),
                              minval=-k, maxval=k, dtype=jnp.float32)
    return w_ih, w_hh, b_ih, b_hh


def prepare_gru_params(w_ih, w_hh, b_ih, b_hh):
    """One-time conversion to the kernel layout (done at init, not per call).

    Gate-packed along the lane axis: W_ih -> (F, 3H), W_hh -> (H, 3H) bf16
    (columns in r, z, n order); input-side biases folded for r/z, b_in kept
    with gi, b_hn kept separate (it lives inside r * (...)).
    """
    H = w_hh.shape[1]
    wih = jnp.transpose(w_ih).astype(jnp.bfloat16)   # (F, 3H)
    whh = jnp.transpose(w_hh).astype(jnp.bfloat16)   # (H, 3H)
    bi = b_ih.astype(jnp.float32).reshape(3, H)
    bh = b_hh.astype(jnp.float32).reshape(3, H)
    bgi = jnp.concatenate([bi[0] + bh[0], bi[1] + bh[1], bi[2]]).reshape(1, 3 * H)
    bhn = bh[2].reshape(1, H)
    return {"wih": wih, "whh": whh, "bgi": bgi, "bhn": bhn}


def init_encoder_params(key, n_input, n_hidden):
    keys = jax.random.split(key, len(n_hidden))
    params = []
    in_size = n_input
    for kk, h in zip(keys, n_hidden):
        params.append(prepare_gru_params(*init_gru_params_torch_layout(kk, in_size, h)))
        in_size = h
    return tuple(params)


# ------------------------------ forward (glue) ------------------------------ #

def encoder_forward(params, inputs):
    """inputs: (B, S, n_input).  Returns (outputs_fw, states_fw) like the
    PyTorch Encoder: outputs_fw (B, S, H3), states_fw (B, H1+H2+H3)."""
    B, S, F = inputs.shape
    d1, d2, d3 = ENCODER_DILATIONS
    H1 = params[0]["whh"].shape[0]
    H2 = params[1]["whh"].shape[0]
    H3 = params[2]["whh"].shape[0]
    # Buffer row counts: enough for what layer i writes AND layer i+1 reads.
    Tp1 = max(_padded_len(S, d1), _padded_len(S, d2))
    Tp2 = max(_padded_len(S, d2), _padded_len(S, d3))
    Tp3 = _padded_len(S, d3)

    x_tm = jnp.transpose(inputs.astype(jnp.float32), (1, 0, 2)).reshape(S * B, F)

    flat = []
    for p in params:
        flat += [p["wih"], p["whh"], p["bgi"], p["bhn"]]

    kernel = functools.partial(_drnn_fused_kernel, S, B,
                               ENCODER_DILATIONS, (H1, H2, H3))
    out_pad, s1, s2, s3 = pl.pallas_call(
        kernel,
        out_shape=(
            jax.ShapeDtypeStruct((Tp3 * B, H3), jnp.float32),
            jax.ShapeDtypeStruct((B, H1), jnp.float32),
            jax.ShapeDtypeStruct((B, H2), jnp.float32),
            jax.ShapeDtypeStruct((B, H3), jnp.float32),
        ),
        in_specs=[pl.BlockSpec(memory_space=pltpu.MemorySpace.VMEM)] * (1 + len(flat)),
        out_specs=(pl.BlockSpec(memory_space=pltpu.MemorySpace.VMEM),) * 4,
        scratch_shapes=[
            pltpu.VMEM((Tp1 * B, H1), jnp.float32),
            pltpu.VMEM((Tp2 * B, H2), jnp.float32),
        ],
    )(x_tm, *flat)

    out = out_pad[:S * B].reshape(S, B, H3)
    outputs_fw = jnp.transpose(out, (1, 0, 2))                  # (B, S, H3)
    states_fw = jnp.concatenate([s1, s2, s3], axis=1)           # (B, H1+H2+H3)
    return outputs_fw, states_fw


# ------------------------------- pure-JAX ref ------------------------------- #
# Mirrors the kernel's bf16-MXU / f32-accumulate numerics (PyTorch runs the
# GRU fully in f32; divergence vs f32 grows with H and S and is characterized
# separately).

def _ref_dilated_gru(x_tbf, p, d):
    """h_t = GRUCell(x_t, h_{t-d}); gate-packed layout, bf16 matmuls."""
    T, B, _ = x_tbf.shape
    H = p["whh"].shape[0]
    w_ih, w_hh = p["wih"], p["whh"]
    b_gi, b_hn = p["bgi"][0], p["bhn"][0]
    hs = jnp.zeros((d, B, H), jnp.float32)
    outs = []
    for t in range(T):
        ph = t % d
        h_prev = hs[ph]
        gi = jnp.dot(x_tbf[t].astype(jnp.bfloat16), w_ih,
                     preferred_element_type=jnp.float32) + b_gi
        gh = jnp.dot(h_prev.astype(jnp.bfloat16), w_hh,
                     preferred_element_type=jnp.float32)
        r = jax.nn.sigmoid(gi[:, 0:H] + gh[:, 0:H])
        z = jax.nn.sigmoid(gi[:, H:2 * H] + gh[:, H:2 * H])
        n = jnp.tanh(gi[:, 2 * H:3 * H] + r * (gh[:, 2 * H:3 * H] + b_hn))
        h_new = (1.0 - z) * n + z * h_prev
        hs = hs.at[ph].set(h_new)
        outs.append(h_new)
    return jnp.stack(outs)


def _ref_encoder(params, inputs):
    x = jnp.transpose(inputs.astype(jnp.float32), (1, 0, 2))    # (S, B, F)
    states = []
    h = x
    for p, d in zip(params, ENCODER_DILATIONS):
        h = _ref_dilated_gru(h, p, d)
        states.append(h[-1])
    return jnp.transpose(h, (1, 0, 2)), jnp.concatenate(states, axis=1)


# ----------------------------------- main ----------------------------------- #

if __name__ == "__main__":
    B, S = 2, 20
    N_INPUT = 10
    N_HIDDEN = [32, 24, 16]

    key = jax.random.PRNGKey(0)
    k_params, k_data = jax.random.split(key)
    params = init_encoder_params(k_params, N_INPUT, N_HIDDEN)
    inputs = jax.random.normal(k_data, (B, S, N_INPUT), dtype=jnp.float32)

    fwd = jax.jit(encoder_forward)
    outputs_fw, states_fw = fwd(params, inputs)
    outputs_fw = jax.block_until_ready(outputs_fw)
    states_fw = jax.block_until_ready(states_fw)

    assert outputs_fw.shape == (B, S, N_HIDDEN[-1]), outputs_fw.shape
    assert states_fw.shape == (B, sum(N_HIDDEN)), states_fw.shape

    ref_out, ref_states = _ref_encoder(params, inputs)
    assert jnp.allclose(outputs_fw, ref_out, rtol=5e-3, atol=5e-3), \
        float(jnp.max(jnp.abs(outputs_fw - ref_out)))
    assert jnp.allclose(states_fw, ref_states, rtol=5e-3, atol=5e-3), \
        float(jnp.max(jnp.abs(states_fw - ref_states)))

    print("KERNEL_OK")
</pallas_src>

<mosaic_0001>
module attributes {stable_mosaic.version = 11 : i64} {
  func.func @_drnn_fused_kernel(%arg0: memref<40x10xf32, #tpu.memory_space<vmem>>, %arg1: memref<10x96xbf16, #tpu.memory_space<vmem>>, %arg2: memref<32x96xbf16, #tpu.memory_space<vmem>>, %arg3: memref<1x96xf32, #tpu.memory_space<vmem>>, %arg4: memref<1x32xf32, #tpu.memory_space<vmem>>, %arg5: memref<32x72xbf16, #tpu.memory_space<vmem>>, %arg6: memref<24x72xbf16, #tpu.memory_space<vmem>>, %arg7: memref<1x72xf32, #tpu.memory_space<vmem>>, %arg8: memref<1x24xf32, #tpu.memory_space<vmem>>, %arg9: memref<24x48xbf16, #tpu.memory_space<vmem>>, %arg10: memref<16x48xbf16, #tpu.memory_space<vmem>>, %arg11: memref<1x48xf32, #tpu.memory_space<vmem>>, %arg12: memref<1x16xf32, #tpu.memory_space<vmem>>, %arg13: memref<64x16xf32, #tpu.memory_space<vmem>>, %arg14: memref<2x32xf32, #tpu.memory_space<vmem>>, %arg15: memref<2x24xf32, #tpu.memory_space<vmem>>, %arg16: memref<2x16xf32, #tpu.memory_space<vmem>>, %arg17: memref<40x32xf32, #tpu.memory_space<vmem>>, %arg18: memref<64x24xf32, #tpu.memory_space<vmem>>) attributes {dimension_semantics = [], scalar_prefetch = 0 : i64, scratch_operands = 2 : i64, tpu.core_type = #tpu.core_type<tc>} {
    %cst = arith.constant 0.000000e+00 : f32
    %0 = vector.broadcast %cst : f32 to vector<24x24xf32>
    %c40 = arith.constant 40 : index
    %c0 = arith.constant 0 : index
    %1 = vector.load %arg18[%c40, %c0] : memref<64x24xf32, #tpu.memory_space<vmem>>, vector<24x24xf32>
    tpu.vector_store %arg18[%c40, %c0], %0 {strides = array<i32>} : memref<64x24xf32, #tpu.memory_space<vmem>>, vector<24x24xf32>,
    %c0_0 = arith.constant 0 : index
    %c0_1 = arith.constant 0 : index
    %2 = vector.load %arg0[%c0_0, %c0_1] : memref<40x10xf32, #tpu.memory_space<vmem>>, vector<40x10xf32>
    %3 = arith.truncf %2 : vector<40x10xf32> to vector<40x10xbf16>
    %c0_2 = arith.constant 0 : index
    %c0_3 = arith.constant 0 : index
    %4 = vector.load %arg1[%c0_2, %c0_3] : memref<10x96xbf16, #tpu.memory_space<vmem>>, vector<10x96xbf16>
    %cst_4 = arith.constant dense<0.000000e+00> : vector<40x96xf32>
    %5 = tpu.matmul %3, %4, %cst_4 {dimension_numbers = #tpu.dot_dimension_numbers<[1], [0], [0], [1], [0, 0, 1, 1], [], []>} : vector<40x10xbf16>, vector<10x96xbf16>, vector<40x96xf32> -> vector<40x96xf32>
    %c0_5 = arith.constant 0 : index
    %c0_6 = arith.constant 0 : index
    %6 = vector.load %arg3[%c0_5, %c0_6] : memref<1x96xf32, #tpu.memory_space<vmem>>, vector<1x96xf32>
    %7 = vector.broadcast %6 : vector<1x96xf32> to vector<40x96xf32>
    %8 = arith.addf %5, %7 : vector<40x96xf32>
    %c0_7 = arith.constant 0 : index
    %c0_8 = arith.constant 0 : index
    %9 = vector.load %arg2[%c0_7, %c0_8] : memref<32x96xbf16, #tpu.memory_space<vmem>>, vector<32x96xbf16>
    %c0_9 = arith.constant 0 : index
    %c0_10 = arith.constant 0 : index
    %10 = vector.load %arg4[%c0_9, %c0_10] : memref<1x32xf32, #tpu.memory_space<vmem>>, vector<1x32xf32>
    %11 = vector.shape_cast %10 : vector<1x32xf32> to vector<1x32xf32>
    %12 = vector.broadcast %11 : vector<1x32xf32> to vector<2x32xf32>
    %cst_11 = arith.constant 0.000000e+00 : f32
    %13 = vector.broadcast %cst_11 : f32 to vector<2x32xf32>
    %14 = vector.extract_strided_slice %8 {offsets = [0, 0], sizes = [2, 96], strides = [1, 1]} : vector<40x96xf32> to vector<2x96xf32>
    %15 = arith.truncf %13 : vector<2x32xf32> to vector<2x32xbf16>
    %cst_12 = arith.constant dense<0.000000e+00> : vector<2x96xf32>
    %16 = tpu.matmul %15, %9, %cst_12 {dimension_numbers = #tpu.dot_dimension_numbers<[1], [0], [0], [1], [0, 0, 1, 1], [], []>} : vector<2x32xbf16>, vector<32x96xbf16>, vector<2x96xf32> -> vector<2x96xf32>
    %17 = vector.extract_strided_slice %14 {offsets = [0, 0], sizes = [2, 32], strides = [1, 1]} : vector<2x96xf32> to vector<2x32xf32>
    %18 = vector.extract_strided_slice %16 {offsets = [0, 0], sizes = [2, 32], strides = [1, 1]} : vector<2x96xf32> to vector<2x32xf32>
    %19 = arith.addf %17, %18 : vector<2x32xf32>
    %20 = arith.negf %19 : vector<2x32xf32>
    %21 = math.exp %20 : vector<2x32xf32>
    %cst_13 = arith.constant 1.000000e+00 : f32
    %22 = vector.broadcast %cst_13 : f32 to vector<2x32xf32>
    %23 = arith.addf %22, %21 : vector<2x32xf32>
    %24 = arith.divf %22, %23 : vector<2x32xf32>
    %25 = vector.extract_strided_slice %14 {offsets = [0, 32], sizes = [2, 32], strides = [1, 1]} : vector<2x96xf32> to vector<2x32xf32>
    %26 = vector.extract_strided_slice %16 {offsets = [0, 32], sizes = [2, 32], strides = [1, 1]} : vector<2x96xf32> to vector<2x32xf32>
    %27 = arith.addf %25, %26 : vector<2x32xf32>
    %28 = arith.negf %27 : vector<2x32xf32>
    %29 = math.exp %28 : vector<2x32xf32>
    %cst_14 = arith.constant 1.000000e+00 : f32
    %30 = vector.broadcast %cst_14 : f32 to vector<2x32xf32>
    %31 = arith.addf %30, %29 : vector<2x32xf32>
    %32 = arith.divf %30, %31 : vector<2x32xf32>
    %33 = vector.extract_strided_slice %14 {offsets = [0, 64], sizes = [2, 32], strides = [1, 1]} : vector<2x96xf32> to vector<2x32xf32>
    %34 = vector.extract_strided_slice %16 {offsets = [0, 64], sizes = [2, 32], strides = [1, 1]} : vector<2x96xf32> to vector<2x32xf32>
    %35 = arith.addf %34, %12 : vector<2x32xf32>
    %36 = arith.mulf %24, %35 : vector<2x32xf32>
    %37 = arith.addf %33, %36 : vector<2x32xf32>
    %38 = math.tanh %37 : vector<2x32xf32>
    %cst_15 = arith.constant 1.000000e+00 : f32
    %39 = vector.broadcast %cst_15 : f32 to vector<2x32xf32>
    %40 = arith.subf %39, %32 : vector<2x32xf32>
    %41 = arith.mulf %40, %38 : vector<2x32xf32>
    %42 = arith.mulf %32, %13 : vector<2x32xf32>
    %43 = arith.addf %41, %42 : vector<2x32xf32>
    %44 = vector.extract_strided_slice %8 {offsets = [2, 0], sizes = [2, 96], strides = [1, 1]} : vector<40x96xf32> to vector<2x96xf32>
    %45 = arith.truncf %43 : vector<2x32xf32> to vector<2x32xbf16>
    %cst_16 = arith.constant dense<0.000000e+00> : vector<2x96xf32>
    %46 = tpu.matmul %45, %9, %cst_16 {dimension_numbers = #tpu.dot_dimension_numbers<[1], [0], [0], [1], [0, 0, 1, 1], [], []>} : vector<2x32xbf16>, vector<32x96xbf16>, vector<2x96xf32> -> vector<2x96xf32>
    %47 = vector.extract_strided_slice %44 {offsets = [0, 0], sizes = [2, 32], strides = [1, 1]} : vector<2x96xf32> to vector<2x32xf32>
    %48 = vector.extract_strided_slice %46 {offsets = [0, 0], sizes = [2, 32], strides = [1, 1]} : vector<2x96xf32> to vector<2x32xf32>
    %49 = arith.addf %47, %48 : vector<2x32xf32>
    %50 = arith.negf %49 : vector<2x32xf32>
    %51 = math.exp %50 : vector<2x32xf32>
    %cst_17 = arith.constant 1.000000e+00 : f32
    %52 = vector.broadcast %cst_17 : f32 to vector<2x32xf32>
    %53 = arith.addf %52, %51 : vector<2x32xf32>
    %54 = arith.divf %52, %53 : vector<2x32xf32>
    %55 = vector.extract_strided_slice %44 {offsets = [0, 32], sizes = [2, 32], strides = [1, 1]} : vector<2x96xf32> to vector<2x32xf32>
    %56 = vector.extract_strided_slice %46 {offsets = [0, 32], sizes = [2, 32], strides = [1, 1]} : vector<2x96xf32> to vector<2x32xf32>
    %57 = arith.addf %55, %56 : vector<2x32xf32>
    %58 = arith.negf %57 : vector<2x32xf32>
    %59 = math.exp %58 : vector<2x32xf32>
    %cst_18 = arith.constant 1.000000e+00 : f32
    %60 = vector.broadcast %cst_18 : f32 to vector<2x32xf32>
    %61 = arith.addf %60, %59 : vector<2x32xf32>
    %62 = arith.divf %60, %61 : vector<2x32xf32>
    %63 = vector.extract_strided_slice %44 {offsets = [0, 64], sizes = [2, 32], strides = [1, 1]} : vector<2x96xf32> to vector<2x32xf32>
    %64 = vector.extract_strided_slice %46 {offsets = [0, 64], sizes = [2, 32], strides = [1, 1]} : vector<2x96xf32> to vector<2x32xf32>
    %65 = arith.addf %64, %12 : vector<2x32xf32>
    %66 = arith.mulf %54, %65 : vector<2x32xf32>
    %67 = arith.addf %63, %66 : vector<2x32xf32>
    %68 = math.tanh %67 : vector<2x32xf32>
    %cst_19 = arith.constant 1.000000e+00 : f32
    %69 = vector.broadcast %cst_19 : f32 to vector<2x32xf32>
    %70 = arith.subf %69, %62 : vector<2x32xf32>
    %71 = arith.mulf %70, %68 : vector<2x32xf32>
    %72 = arith.mulf %62, %43 : vector<2x32xf32>
    %73 = arith.addf %71, %72 : vector<2x32xf32>
    %74 = vector.extract_strided_slice %8 {offsets = [4, 0], sizes = [2, 96], strides = [1, 1]} : vector<40x96xf32> to vector<2x96xf32>
    %75 = arith.truncf %73 : vector<2x32xf32> to vector<2x32xbf16>
    %cst_20 = arith.constant dense<0.000000e+00> : vector<2x96xf32>
    %76 = tpu.matmul %75, %9, %cst_20 {dimension_numbers = #tpu.dot_dimension_numbers<[1], [0], [0], [1], [0, 0, 1, 1], [], []>} : vector<2x32xbf16>, vector<32x96xbf16>, vector<2x96xf32> -> vector<2x96xf32>
    %77 = vector.extract_strided_slice %74 {offsets = [0, 0], sizes = [2, 32], strides = [1, 1]} : vector<2x96xf32> to vector<2x32xf32>
    %78 = vector.extract_strided_slice %76 {offsets = [0, 0], sizes = [2, 32], strides = [1, 1]} : vector<2x96xf32> to vector<2x32xf32>
    %79 = arith.addf %77, %78 : vector<2x32xf32>
    %80 = arith.negf %79 : vector<2x32xf32>
    %81 = math.exp %80 : vector<2x32xf32>
    %cst_21 = arith.constant 1.000000e+00 : f32
    %82 = vector.broadcast %cst_21 : f32 to vector<2x32xf32>
    %83 = arith.addf %82, %81 : vector<2x32xf32>
    %84 = arith.divf %82, %83 : vector<2x32xf32>
    %85 = vector.extract_strided_slice %74 {offsets = [0, 32], sizes = [2, 32], strides = [1, 1]} : vector<2x96xf32> to vector<2x32xf32>
    %86 = vector.extract_strided_slice %76 {offsets = [0, 32], sizes = [2, 32], strides = [1, 1]} : vector<2x96xf32> to vector<2x32xf32>
    %87 = arith.addf %85, %86 : vector<2x32xf32>
    %88 = arith.negf %87 : vector<2x32xf32>
    %89 = math.exp %88 : vector<2x32xf32>
    %cst_22 = arith.constant 1.000000e+00 : f32
    %90 = vector.broadcast %cst_22 : f32 to vector<2x32xf32>
    %91 = arith.addf %90, %89 : vector<2x32xf32>
    %92 = arith.divf %90, %91 : vector<2x32xf32>
    %93 = vector.extract_strided_slice %74 {offsets = [0, 64], sizes = [2, 32], strides = [1, 1]} : vector<2x96xf32> to vector<2x32xf32>
    %94 = vector.extract_strided_slice %76 {offsets = [0, 64], sizes = [2, 32], strides = [1, 1]} : vector<2x96xf32> to vector<2x32xf32>
    %95 = arith.addf %94, %12 : vector<2x32xf32>
    %96 = arith.mulf %84, %95 : vector<2x32xf32>
    %97 = arith.addf %93, %96 : vector<2x32xf32>
    %98 = math.tanh %97 : vector<2x32xf32>
    %cst_23 = arith.constant 1.000000e+00 : f32
    %99 = vector.broadcast %cst_23 : f32 to vector<2x32xf32>
    %100 = arith.subf %99, %92 : vector<2x32xf32>
    %101 = arith.mulf %100, %98 : vector<2x32xf32>
    %102 = arith.mulf %92, %73 : vector<2x32xf32>
    %103 = arith.addf %101, %102 : vector<2x32xf32>
    %104 = vector.extract_strided_slice %8 {offsets = [6, 0], sizes = [2, 96], strides = [1, 1]} : vector<40x96xf32> to vector<2x96xf32>
    %105 = arith.truncf %103 : vector<2x32xf32> to vector<2x32xbf16>
    %cst_24 = arith.constant dense<0.000000e+00> : vector<2x96xf32>
    %106 = tpu.matmul %105, %9, %cst_24 {dimension_numbers = #tpu.dot_dimension_numbers<[1], [0], [0], [1], [0, 0, 1, 1], [], []>} : vector<2x32xbf16>, vector<32x96xbf16>, vector<2x96xf32> -> vector<2x96xf32>
    %107 = vector.extract_strided_slice %104 {offsets = [0, 0], sizes = [2, 32], strides = [1, 1]} : vector<2x96xf32> to vector<2x32xf32>
    %108 = vector.extract_strided_slice %106 {offsets = [0, 0], sizes = [2, 32], strides = [1, 1]} : vector<2x96xf32> to vector<2x32xf32>
    %109 = arith.addf %107, %108 : vector<2x32xf32>
    %110 = arith.negf %109 : vector<2x32xf32>
    %111 = math.exp %110 : vector<2x32xf32>
    %cst_25 = arith.constant 1.000000e+00 : f32
    %112 = vector.broadcast %cst_25 : f32 to vector<2x32xf32>
    %113 = arith.addf %112, %111 : vector<2x32xf32>
    %114 = arith.divf %112, %113 : vector<2x32xf32>
    %115 = vector.extract_strided_slice %104 {offsets = [0, 32], sizes = [2, 32], strides = [1, 1]} : vector<2x96xf32> to vector<2x32xf32>
    %116 = vector.extract_strided_slice %106 {offsets = [0, 32], sizes = [2, 32], strides = [1, 1]} : vector<2x96xf32> to vector<2x32xf32>
    %117 = arith.addf %115, %116 : vector<2x32xf32>
    %118 = arith.negf %117 : vector<2x32xf32>
    %119 = math.exp %118 : vector<2x32xf32>
    %cst_26 = arith.constant 1.000000e+00 : f32
    %120 = vector.broadcast %cst_26 : f32 to vector<2x32xf32>
    %121 = arith.addf %120, %119 : vector<2x32xf32>
    %122 = arith.divf %120, %121 : vector<2x32xf32>
    %123 = vector.extract_strided_slice %104 {offsets = [0, 64], sizes = [2, 32], strides = [1, 1]} : vector<2x96xf32> to vector<2x32xf32>
    %124 = vector.extract_strided_slice %106 {offsets = [0, 64], sizes = [2, 32], strides = [1, 1]} : vector<2x96xf32> to vector<2x32xf32>
    %125 = arith.addf %124, %12 : vector<2x32xf32>
    %126 = arith.mulf %114, %125 : vector<2x32xf32>
    %127 = arith.addf %123, %126 : vector<2x32xf32>
    %128 = math.tanh %127 : vector<2x32xf32>
    %cst_27 = arith.constant 1.000000e+00 : f32
    %129 = vector.broadcast %cst_27 : f32 to vector<2x32xf32>
    %130 = arith.subf %129, %122 : vector<2x32xf32>
    %131 = arith.mulf %130, %128 : vector<2x32xf32>
    %132 = arith.mulf %122, %103 : vector<2x32xf32>
    %133 = arith.addf %131, %132 : vector<2x32xf32>
    %134 = tpu.concatenate %43, %73, %103, %133 in 0 : vector<2x32xf32>, vector<2x32xf32>, vector<2x32xf32>, vector<2x32xf32> -> vector<8x32xf32>
    %c0_28 = arith.constant 0 : index
    %c0_29 = arith.constant 0 : index
    %135 = vector.load %arg17[%c0_28, %c0_29] : memref<40x32xf32, #tpu.memory_space<vmem>>, vector<8x32xf32>
    tpu.vector_store %arg17[%c0_28, %c0_29], %134 {strides = array<i32>} : memref<40x32xf32, #tpu.memory_space<vmem>>, vector<8x32xf32>,
    %136 = vector.extract_strided_slice %8 {offsets = [8, 0], sizes = [2, 96], strides = [1, 1]} : vector<40x96xf32> to vector<2x96xf32>
    %137 = arith.truncf %133 : vector<2x32xf32> to vector<2x32xbf16>
    %cst_30 = arith.constant dense<0.000000e+00> : vector<2x96xf32>
    %138 = tpu.matmul %137, %9, %cst_30 {dimension_numbers = #tpu.dot_dimension_numbers<[1], [0], [0], [1], [0, 0, 1, 1], [], []>} : vector<2x32xbf16>, vector<32x96xbf16>, vector<2x96xf32> -> vector<2x96xf32>
    %139 = vector.extract_strided_slice %136 {offsets = [0, 0], sizes = [2, 32], strides = [1, 1]} : vector<2x96xf32> to vector<2x32xf32>
    %140 = vector.extract_strided_slice %138 {offsets = [0, 0], sizes = [2, 32], strides = [1, 1]} : vector<2x96xf32> to vector<2x32xf32>
    %141 = arith.addf %139, %140 : vector<2x32xf32>
    %142 = arith.negf %141 : vector<2x32xf32>
    %143 = math.exp %142 : vector<2x32xf32>
    %cst_31 = arith.constant 1.000000e+00 : f32
    %144 = vector.broadcast %cst_31 : f32 to vector<2x32xf32>
    %145 = arith.addf %144, %143 : vector<2x32xf32>
    %146 = arith.divf %144, %145 : vector<2x32xf32>
    %147 = vector.extract_strided_slice %136 {offsets = [0, 32], sizes = [2, 32], strides = [1, 1]} : vector<2x96xf32> to vector<2x32xf32>
    %148 = vector.extract_strided_slice %138 {offsets = [0, 32], sizes = [2, 32], strides = [1, 1]} : vector<2x96xf32> to vector<2x32xf32>
    %149 = arith.addf %147, %148 : vector<2x32xf32>
    %150 = arith.negf %149 : vector<2x32xf32>
    %151 = math.exp %150 : vector<2x32xf32>
    %cst_32 = arith.constant 1.000000e+00 : f32
    %152 = vector.broadcast %cst_32 : f32 to vector<2x32xf32>
    %153 = arith.addf %152, %151 : vector<2x32xf32>
    %154 = arith.divf %152, %153 : vector<2x32xf32>
    %155 = vector.extract_strided_slice %136 {offsets = [0, 64], sizes = [2, 32], strides = [1, 1]} : vector<2x96xf32> to vector<2x32xf32>
    %156 = vector.extract_strided_slice %138 {offsets = [0, 64], sizes = [2, 32], strides = [1, 1]} : vector<2x96xf32> to vector<2x32xf32>
    %157 = arith.addf %156, %12 : vector<2x32xf32>
    %158 = arith.mulf %146, %157 : vector<2x32xf32>
    %159 = arith.addf %155, %158 : vector<2x32xf32>
    %160 = math.tanh %159 : vector<2x32xf32>
    %cst_33 = arith.constant 1.000000e+00 : f32
    %161 = vector.broadcast %cst_33 : f32 to vector<2x32xf32>
    %162 = arith.subf %161, %154 : vector<2x32xf32>
    %163 = arith.mulf %162, %160 : vector<2x32xf32>
    %164 = arith.mulf %154, %133 : vector<2x32xf32>
    %165 = arith.addf %163, %164 : vector<2x32xf32>
    %166 = vector.extract_strided_slice %8 {offsets = [10, 0], sizes = [2, 96], strides = [1, 1]} : vector<40x96xf32> to vector<2x96xf32>
    %167 = arith.truncf %165 : vector<2x32xf32> to vector<2x32xbf16>
    %cst_34 = arith.constant dense<0.000000e+00> : vector<2x96xf32>
    %168 = tpu.matmul %167, %9, %cst_34 {dimension_numbers = #tpu.dot_dimension_numbers<[1], [0], [0], [1], [0, 0, 1, 1], [], []>} : vector<2x32xbf16>, vector<32x96xbf16>, vector<2x96xf32> -> vector<2x96xf32>
    %169 = vector.extract_strided_slice %166 {offsets = [0, 0], sizes = [2, 32], strides = [1, 1]} : vector<2x96xf32> to vector<2x32xf32>
    %170 = vector.extract_strided_slice %168 {offsets = [0, 0], sizes = [2, 32], strides = [1, 1]} : vector<2x96xf32> to vector<2x32xf32>
    %171 = arith.addf %169, %170 : vector<2x32xf32>
    %172 = arith.negf %171 : vector<2x32xf32>
    %173 = math.exp %172 : vector<2x32xf32>
    %cst_35 = arith.constant 1.000000e+00 : f32
    %174 = vector.broadcast %cst_35 : f32 to vector<2x32xf32>
    %175 = arith.addf %174, %173 : vector<2x32xf32>
    %176 = arith.divf %174, %175 : vector<2x32xf32>
    %177 = vector.extract_strided_slice %166 {offsets = [0, 32], sizes = [2, 32], strides = [1, 1]} : vector<2x96xf32> to vector<2x32xf32>
    %178 = vector.extract_strided_slice %168 {offsets = [0, 32], sizes = [2, 32], strides = [1, 1]} : vector<2x96xf32> to vector<2x32xf32>
    %179 = arith.addf %177, %178 : vector<2x32xf32>
    %180 = arith.negf %179 : vector<2x32xf32>
    %181 = math.exp %180 : vector<2x32xf32>
    %cst_36 = arith.constant 1.000000e+00 : f32
    %182 = vector.broadcast %cst_36 : f32 to vector<2x32xf32>
    %183 = arith.addf %182, %181 : vector<2x32xf32>
    %184 = arith.divf %182, %183 : vector<2x32xf32>
    %185 = vector.extract_strided_slice %166 {offsets = [0, 64], sizes = [2, 32], strides = [1, 1]} : vector<2x96xf32> to vector<2x32xf32>
    %186 = vector.extract_strided_slice %168 {offsets = [0, 64], sizes = [2, 32], strides = [1, 1]} : vector<2x96xf32> to vector<2x32xf32>
    %187 = arith.addf %186, %12 : vector<2x32xf32>
    %188 = arith.mulf %176, %187 : vector<2x32xf32>
    %189 = arith.addf %185, %188 : vector<2x32xf32>
    %190 = math.tanh %189 : vector<2x32xf32>
    %cst_37 = arith.constant 1.000000e+00 : f32
    %191 = vector.broadcast %cst_37 : f32 to vector<2x32xf32>
    %192 = arith.subf %191, %184 : vector<2x32xf32>
    %193 = arith.mulf %192, %190 : vector<2x32xf32>
    %194 = arith.mulf %184, %165 : vector<2x32xf32>
    %195 = arith.addf %193, %194 : vector<2x32xf32>
    %196 = vector.extract_strided_slice %8 {offsets = [12, 0], sizes = [2, 96], strides = [1, 1]} : vector<40x96xf32> to vector<2x96xf32>
    %197 = arith.truncf %195 : vector<2x32xf32> to vector<2x32xbf16>
    %cst_38 = arith.constant dense<0.000000e+00> : vector<2x96xf32>
    %198 = tpu.matmul %197, %9, %cst_38 {dimension_numbers = #tpu.dot_dimension_numbers<[1], [0], [0], [1], [0, 0, 1, 1], [], []>} : vector<2x32xbf16>, vector<32x96xbf16>, vector<2x96xf32> -> vector<2x96xf32>
    %199 = vector.extract_strided_slice %196 {offsets = [0, 0], sizes = [2, 32], strides = [1, 1]} : vector<2x96xf32> to vector<2x32xf32>
    %200 = vector.extract_strided_slice %198 {offsets = [0, 0], sizes = [2, 32], strides = [1, 1]} : vector<2x96xf32> to vector<2x32xf32>
    %201 = arith.addf %199, %200 : vector<2x32xf32>
    %202 = arith.negf %201 : vector<2x32xf32>
    %203 = math.exp %202 : vector<2x32xf32>
    %cst_39 = arith.constant 1.000000e+00 : f32
    %204 = vector.broadcast %cst_39 : f32 to vector<2x32xf32>
    %205 = arith.addf %204, %203 : vector<2x32xf32>
    %206 = arith.divf %204, %205 : vector<2x32xf32>
    %207 = vector.extract_strided_slice %196 {offsets = [0, 32], sizes = [2, 32], strides = [1, 1]} : vector<2x96xf32> to vector<2x32xf32>
    %208 = vector.extract_strided_slice %198 {offsets = [0, 32], sizes = [2, 32], strides = [1, 1]} : vector<2x96xf32> to vector<2x32xf32>
    %209 = arith.addf %207, %208 : vector<2x32xf32>
    %210 = arith.negf %209 : vector<2x32xf32>
    %211 = math.exp %210 : vector<2x32xf32>
    %cst_40 = arith.constant 1.000000e+00 : f32
    %212 = vector.broadcast %cst_40 : f32 to vector<2x32xf32>
    %213 = arith.addf %212, %211 : vector<2x32xf32>
    %214 = arith.divf %212, %213 : vector<2x32xf32>
    %215 = vector.extract_strided_slice %196 {offsets = [0, 64], sizes = [2, 32], strides = [1, 1]} : vector<2x96xf32> to vector<2x32xf32>
    %216 = vector.extract_strided_slice %198 {offsets = [0, 64], sizes = [2, 32], strides = [1, 1]} : vector<2x96xf32> to vector<2x32xf32>
    %217 = arith.addf %216, %12 : vector<2x32xf32>
    %218 = arith.mulf %206, %217 : vector<2x32xf32>
    %219 = arith.addf %215, %218 : vector<2x32xf32>
    %220 = math.tanh %219 : vector<2x32xf32>
    %cst_41 = arith.constant 1.000000e+00 : f32
    %221 = vector.broadcast %cst_41 : f32 to vector<2x32xf32>
    %222 = arith.subf %221, %214 : vector<2x32xf32>
    %223 = arith.mulf %222, %220 : vector<2x32xf32>
    %224 = arith.mulf %214, %195 : vector<2x32xf32>
    %225 = arith.addf %223, %224 : vector<2x32xf32>
    %226 = vector.extract_strided_slice %8 {offsets = [14, 0], sizes = [2, 96], strides = [1, 1]} : vector<40x96xf32> to vector<2x96xf32>
    %227 = arith.truncf %225 : vector<2x32xf32> to vector<2x32xbf16>
    %cst_42 = arith.constant dense<0.000000e+00> : vector<2x96xf32>
    %228 = tpu.matmul %227, %9, %cst_42 {dimension_numbers = #tpu.dot_dimension_numbers<[1], [0], [0], [1], [0, 0, 1, 1], [], []>} : vector<2x32xbf16>, vector<32x96xbf16>, vector<2x96xf32> -> vector<2x96xf32>
    %229 = vector.extract_strided_slice %226 {offsets = [0, 0], sizes = [2, 32], strides = [1, 1]} : vector<2x96xf32> to vector<2x32xf32>
    %230 = vector.extract_strided_slice %228 {offsets = [0, 0], sizes = [2, 32], strides = [1, 1]} : vector<2x96xf32> to vector<2x32xf32>
    %231 = arith.addf %229, %230 : vector<2x32xf32>
    %232 = arith.negf %231 : vector<2x32xf32>
    %233 = math.exp %232 : vector<2x32xf32>
    %cst_43 = arith.constant 1.000000e+00 : f32
    %234 = vector.broadcast %cst_43 : f32 to vector<2x32xf32>
    %235 = arith.addf %234, %233 : vector<2x32xf32>
    %236 = arith.divf %234, %235 : vector<2x32xf32>
    %237 = vector.extract_strided_slice %226 {offsets = [0, 32], sizes = [2, 32], strides = [1, 1]} : vector<2x96xf32> to vector<2x32xf32>
    %238 = vector.extract_strided_slice %228 {offsets = [0, 32], sizes = [2, 32], strides = [1, 1]} : vector<2x96xf32> to vector<2x32xf32>
    %239 = arith.addf %237, %238 : vector<2x32xf32>
    %240 = arith.negf %239 : vector<2x32xf32>
    %241 = math.exp %240 : vector<2x32xf32>
    %cst_44 = arith.constant 1.000000e+00 : f32
    %242 = vector.broadcast %cst_44 : f32 to vector<2x32xf32>
    %243 = arith.addf %242, %241 : vector<2x32xf32>
    %244 = arith.divf %242, %243 : vector<2x32xf32>
    %245 = vector.extract_strided_slice %226 {offsets = [0, 64], sizes = [2, 32], strides = [1, 1]} : vector<2x96xf32> to vector<2x32xf32>
    %246 = vector.extract_strided_slice %228 {offsets = [0, 64], sizes = [2, 32], strides = [1, 1]} : vector<2x96xf32> to vector<2x32xf32>
    %247 = arith.addf %246, %12 : vector<2x32xf32>
    %248 = arith.mulf %236, %247 : vector<2x32xf32>
    %249 = arith.addf %245, %248 : vector<2x32xf32>
    %250 = math.tanh %249 : vector<2x32xf32>
    %cst_45 = arith.constant 1.000000e+00 : f32
    %251 = vector.broadcast %cst_45 : f32 to vector<2x32xf32>
    %252 = arith.subf %251, %244 : vector<2x32xf32>
    %253 = arith.mulf %252, %250 : vector<2x32xf32>
    %254 = arith.mulf %244, %225 : vector<2x32xf32>
    %255 = arith.addf %253, %254 : vector<2x32xf32>
    %256 = tpu.concatenate %165, %195, %225, %255 in 0 : vector<2x32xf32>, vector<2x32xf32>, vector<2x32xf32>, vector<2x32xf32> -> vector<8x32xf32>
    %c8 = arith.constant 8 : index
    %c0_46 = arith.constant 0 : index
    %257 = vector.load %arg17[%c8, %c0_46] : memref<40x32xf32, #tpu.memory_space<vmem>>, vector<8x32xf32>
    tpu.vector_store %arg17[%c8, %c0_46], %256 {strides = array<i32>} : memref<40x32xf32, #tpu.memory_space<vmem>>, vector<8x32xf32>,
    %258 = vector.extract_strided_slice %8 {offsets = [16, 0], sizes = [2, 96], strides = [1, 1]} : vector<40x96xf32> to vector<2x96xf32>
    %259 = arith.truncf %255 : vector<2x32xf32> to vector<2x32xbf16>
    %cst_47 = arith.constant dense<0.000000e+00> : vector<2x96xf32>
    %260 = tpu.matmul %259, %9, %cst_47 {dimension_numbers = #tpu.dot_dimension_numbers<[1], [0], [0], [1], [0, 0, 1, 1], [], []>} : vector<2x32xbf16>, vector<32x96xbf16>, vector<2x96xf32> -> vector<2x96xf32>
    %261 = vector.extract_strided_slice %258 {offsets = [0, 0], sizes = [2, 32], strides = [1, 1]} : vector<2x96xf32> to vector<2x32xf32>
    %262 = vector.extract_strided_slice %260 {offsets = [0, 0], sizes = [2, 32], strides = [1, 1]} : vector<2x96xf32> to vector<2x32xf32>
    %263 = arith.addf %261, %262 : vector<2x32xf32>
    %264 = arith.negf %263 : vector<2x32xf32>
    %265 = math.exp %264 : vector<2x32xf32>
    %cst_48 = arith.constant 1.000000e+00 : f32
    %266 = vector.broadcast %cst_48 : f32 to vector<2x32xf32>
    %267 = arith.addf %266, %265 : vector<2x32xf32>
    %268 = arith.divf %266, %267 : vector<2x32xf32>
    %269 = vector.extract_strided_slice %258 {offsets = [0, 32], sizes = [2, 32], strides = [1, 1]} : vector<2x96xf32> to vector<2x32xf32>
    %270 = vector.extract_strided_slice %260 {offsets = [0, 32], sizes = [2, 32], strides = [1, 1]} : vector<2x96xf32> to vector<2x32xf32>
    %271 = arith.addf %269, %270 : vector<2x32xf32>
    %272 = arith.negf %271 : vector<2x32xf32>
    %273 = math.exp %272 : vector<2x32xf32>
    %cst_49 = arith.constant 1.000000e+00 : f32
    %274 = vector.broadcast %cst_49 : f32 to vector<2x32xf32>
    %275 = arith.addf %274, %273 : vector<2x32xf32>
    %276 = arith.divf %274, %275 : vector<2x32xf32>
    %277 = vector.extract_strided_slice %258 {offsets = [0, 64], sizes = [2, 32], strides = [1, 1]} : vector<2x96xf32> to vector<2x32xf32>
    %278 = vector.extract_strided_slice %260 {offsets = [0, 64], sizes = [2, 32], strides = [1, 1]} : vector<2x96xf32> to vector<2x32xf32>
    %279 = arith.addf %278, %12 : vector<2x32xf32>
    %280 = arith.mulf %268, %279 : vector<2x32xf32>
    %281 = arith.addf %277, %280 : vector<2x32xf32>
    %282 = math.tanh %281 : vector<2x32xf32>
    %cst_50 = arith.constant 1.000000e+00 : f32
    %283 = vector.broadcast %cst_50 : f32 to vector<2x32xf32>
    %284 = arith.subf %283, %276 : vector<2x32xf32>
    %285 = arith.mulf %284, %282 : vector<2x32xf32>
    %286 = arith.mulf %276, %255 : vector<2x32xf32>
    %287 = arith.addf %285, %286 : vector<2x32xf32>
    %288 = vector.extract_strided_slice %8 {offsets = [18, 0], sizes = [2, 96], strides = [1, 1]} : vector<40x96xf32> to vector<2x96xf32>
    %289 = arith.truncf %287 : vector<2x32xf32> to vector<2x32xbf16>
    %cst_51 = arith.constant dense<0.000000e+00> : vector<2x96xf32>
    %290 = tpu.matmul %289, %9, %cst_51 {dimension_numbers = #tpu.dot_dimension_numbers<[1], [0], [0], [1], [0, 0, 1, 1], [], []>} : vector<2x32xbf16>, vector<32x96xbf16>, vector<2x96xf32> -> vector<2x96xf32>
    %291 = vector.extract_strided_slice %288 {offsets = [0, 0], sizes = [2, 32], strides = [1, 1]} : vector<2x96xf32> to vector<2x32xf32>
    %292 = vector.extract_strided_slice %290 {offsets = [0, 0], sizes = [2, 32], strides = [1, 1]} : vector<2x96xf32> to vector<2x32xf32>
    %293 = arith.addf %291, %292 : vector<2x32xf32>
    %294 = arith.negf %293 : vector<2x32xf32>
    %295 = math.exp %294 : vector<2x32xf32>
    %cst_52 = arith.constant 1.000000e+00 : f32
    %296 = vector.broadcast %cst_52 : f32 to vector<2x32xf32>
    %297 = arith.addf %296, %295 : vector<2x32xf32>
    %298 = arith.divf %296, %297 : vector<2x32xf32>
    %299 = vector.extract_strided_slice %288 {offsets = [0, 32], sizes = [2, 32], strides = [1, 1]} : vector<2x96xf32> to vector<2x32xf32>
    %300 = vector.extract_strided_slice %290 {offsets = [0, 32], sizes = [2, 32], strides = [1, 1]} : vector<2x96xf32> to vector<2x32xf32>
    %301 = arith.addf %299, %300 : vector<2x32xf32>
    %302 = arith.negf %301 : vector<2x32xf32>
    %303 = math.exp %302 : vector<2x32xf32>
    %cst_53 = arith.constant 1.000000e+00 : f32
    %304 = vector.broadcast %cst_53 : f32 to vector<2x32xf32>
    %305 = arith.addf %304, %303 : vector<2x32xf32>
    %306 = arith.divf %304, %305 : vector<2x32xf32>
    %307 = vector.extract_strided_slice %288 {offsets = [0, 64], sizes = [2, 32], strides = [1, 1]} : vector<2x96xf32> to vector<2x32xf32>
    %308 = vector.extract_strided_slice %290 {offsets = [0, 64], sizes = [2, 32], strides = [1, 1]} : vector<2x96xf32> to vector<2x32xf32>
    %309 = arith.addf %308, %12 : vector<2x32xf32>
    %310 = arith.mulf %298, %309 : vector<2x32xf32>
    %311 = arith.addf %307, %310 : vector<2x32xf32>
    %312 = math.tanh %311 : vector<2x32xf32>
    %cst_54 = arith.constant 1.000000e+00 : f32
    %313 = vector.broadcast %cst_54 : f32 to vector<2x32xf32>
    %314 = arith.subf %313, %306 : vector<2x32xf32>
    %315 = arith.mulf %314, %312 : vector<2x32xf32>
    %316 = arith.mulf %306, %287 : vector<2x32xf32>
    %317 = arith.addf %315, %316 : vector<2x32xf32>
    %318 = vector.extract_strided_slice %8 {offsets = [20, 0], sizes = [2, 96], strides = [1, 1]} : vector<40x96xf32> to vector<2x96xf32>
    %319 = arith.truncf %317 : vector<2x32xf32> to vector<2x32xbf16>
    %cst_55 = arith.constant dense<0.000000e+00> : vector<2x96xf32>
    %320 = tpu.matmul %319, %9, %cst_55 {dimension_numbers = #tpu.dot_dimension_numbers<[1], [0], [0], [1], [0, 0, 1, 1], [], []>} : vector<2x32xbf16>, vector<32x96xbf16>, vector<2x96xf32> -> vector<2x96xf32>
    %321 = vector.extract_strided_slice %318 {offsets = [0, 0], sizes = [2, 32], strides = [1, 1]} : vector<2x96xf32> to vector<2x32xf32>
    %322 = vector.extract_strided_slice %320 {offsets = [0, 0], sizes = [2, 32], strides = [1, 1]} : vector<2x96xf32> to vector<2x32xf32>
    %323 = arith.addf %321, %322 : vector<2x32xf32>
    %324 = arith.negf %323 : vector<2x32xf32>
    %325 = math.exp %324 : vector<2x32xf32>
    %cst_56 = arith.constant 1.000000e+00 : f32
    %326 = vector.broadcast %cst_56 : f32 to vector<2x32xf32>
    %327 = arith.addf %326, %325 : vector<2x32xf32>
    %328 = arith.divf %326, %327 : vector<2x32xf32>
    %329 = vector.extract_strided_slice %318 {offsets = [0, 32], sizes = [2, 32], strides = [1, 1]} : vector<2x96xf32> to vector<2x32xf32>
    %330 = vector.extract_strided_slice %320 {offsets = [0, 32], sizes = [2, 32], strides = [1, 1]} : vector<2x96xf32> to vector<2x32xf32>
    %331 = arith.addf %329, %330 : vector<2x32xf32>
    %332 = arith.negf %331 : vector<2x32xf32>
    %333 = math.exp %332 : vector<2x32xf32>
    %cst_57 = arith.constant 1.000000e+00 : f32
    %334 = vector.broadcast %cst_57 : f32 to vector<2x32xf32>
    %335 = arith.addf %334, %333 : vector<2x32xf32>
    %336 = arith.divf %334, %335 : vector<2x32xf32>
    %337 = vector.extract_strided_slice %318 {offsets = [0, 64], sizes = [2, 32], strides = [1, 1]} : vector<2x96xf32> to vector<2x32xf32>
    %338 = vector.extract_strided_slice %320 {offsets = [0, 64], sizes = [2, 32], strides = [1, 1]} : vector<2x96xf32> to vector<2x32xf32>
    %339 = arith.addf %338, %12 : vector<2x32xf32>
    %340 = arith.mulf %328, %339 : vector<2x32xf32>
    %341 = arith.addf %337, %340 : vector<2x32xf32>
    %342 = math.tanh %341 : vector<2x32xf32>
    %cst_58 = arith.constant 1.000000e+00 : f32
    %343 = vector.broadcast %cst_58 : f32 to vector<2x32xf32>
    %344 = arith.subf %343, %336 : vector<2x32xf32>
    %345 = arith.mulf %344, %342 : vector<2x32xf32>
    %346 = arith.mulf %336, %317 : vector<2x32xf32>
    %347 = arith.addf %345, %346 : vector<2x32xf32>
    %348 = vector.extract_strided_slice %8 {offsets = [22, 0], sizes = [2, 96], strides = [1, 1]} : vector<40x96xf32> to vector<2x96xf32>
    %349 = arith.truncf %347 : vector<2x32xf32> to vector<2x32xbf16>
    %cst_59 = arith.constant dense<0.000000e+00> : vector<2x96xf32>
    %350 = tpu.matmul %349, %9, %cst_59 {dimension_numbers = #tpu.dot_dimension_numbers<[1], [0], [0], [1], [0, 0, 1, 1], [], []>} : vector<2x32xbf16>, vector<32x96xbf16>, vector<2x96xf32> -> vector<2x96xf32>
    %351 = vector.extract_strided_slice %348 {offsets = [0, 0], sizes = [2, 32], strides = [1, 1]} : vector<2x96xf32> to vector<2x32xf32>
    %352 = vector.extract_strided_slice %350 {offsets = [0, 0], sizes = [2, 32], strides = [1, 1]} : vector<2x96xf32> to vector<2x32xf32>
    %353 = arith.addf %351, %352 : vector<2x32xf32>
    %354 = arith.negf %353 : vector<2x32xf32>
    %355 = math.exp %354 : vector<2x32xf32>
    %cst_60 = arith.constant 1.000000e+00 : f32
    %356 = vector.broadcast %cst_60 : f32 to vector<2x32xf32>
    %357 = arith.addf %356, %355 : vector<2x32xf32>
    %358 = arith.divf %356, %357 : vector<2x32xf32>
    %359 = vector.extract_strided_slice %348 {offsets = [0, 32], sizes = [2, 32], strides = [1, 1]} : vector<2x96xf32> to vector<2x32xf32>
    %360 = vector.extract_strided_slice %350 {offsets = [0, 32], sizes = [2, 32], strides = [1, 1]} : vector<2x96xf32> to vector<2x32xf32>
    %361 = arith.addf %359, %360 : vector<2x32xf32>
    %362 = arith.negf %361 : vector<2x32xf32>
    %363 = math.exp %362 : vector<2x32xf32>
    %cst_61 = arith.constant 1.000000e+00 : f32
    %364 = vector.broadcast %cst_61 : f32 to vector<2x32xf32>
    %365 = arith.addf %364, %363 : vector<2x32xf32>
    %366 = arith.divf %364, %365 : vector<2x32xf32>
    %367 = vector.extract_strided_slice %348 {offsets = [0, 64], sizes = [2, 32], strides = [1, 1]} : vector<2x96xf32> to vector<2x32xf32>
    %368 = vector.extract_strided_slice %350 {offsets = [0, 64], sizes = [2, 32], strides = [1, 1]} : vector<2x96xf32> to vector<2x32xf32>
    %369 = arith.addf %368, %12 : vector<2x32xf32>
    %370 = arith.mulf %358, %369 : vector<2x32xf32>
    %371 = arith.addf %367, %370 : vector<2x32xf32>
    %372 = math.tanh %371 : vector<2x32xf32>
    %cst_62 = arith.constant 1.000000e+00 : f32
    %373 = vector.broadcast %cst_62 : f32 to vector<2x32xf32>
    %374 = arith.subf %373, %366 : vector<2x32xf32>
    %375 = arith.mulf %374, %372 : vector<2x32xf32>
    %376 = arith.mulf %366, %347 : vector<2x32xf32>
    %377 = arith.addf %375, %376 : vector<2x32xf32>
    %378 = tpu.concatenate %287, %317, %347, %377 in 0 : vector<2x32xf32>, vector<2x32xf32>, vector<2x32xf32>, vector<2x32xf32> -> vector<8x32xf32>
    %c16 = arith.constant 16 : index
    %c0_63 = arith.constant 0 : index
    %379 = vector.load %arg17[%c16, %c0_63] : memref<40x32xf32, #tpu.memory_space<vmem>>, vector<8x32xf32>
    tpu.vector_store %arg17[%c16, %c0_63], %378 {strides = array<i32>} : memref<40x32xf32, #tpu.memory_space<vmem>>, vector<8x32xf32>,
    %380 = vector.extract_strided_slice %8 {offsets = [24, 0], sizes = [2, 96], strides = [1, 1]} : vector<40x96xf32> to vector<2x96xf32>
    %381 = arith.truncf %377 : vector<2x32xf32> to vector<2x32xbf16>
    %cst_64 = arith.constant dense<0.000000e+00> : vector<2x96xf32>
    %382 = tpu.matmul %381, %9, %cst_64 {dimension_numbers = #tpu.dot_dimension_numbers<[1], [0], [0], [1], [0, 0, 1, 1], [], []>} : vector<2x32xbf16>, vector<32x96xbf16>, vector<2x96xf32> -> vector<2x96xf32>
    %383 = vector.extract_strided_slice %380 {offsets = [0, 0], sizes = [2, 32], strides = [1, 1]} : vector<2x96xf32> to vector<2x32xf32>
    %384 = vector.extract_strided_slice %382 {offsets = [0, 0], sizes = [2, 32], strides = [1, 1]} : vector<2x96xf32> to vector<2x32xf32>
    %385 = arith.addf %383, %384 : vector<2x32xf32>
    %386 = arith.negf %385 : vector<2x32xf32>
    %387 = math.exp %386 : vector<2x32xf32>
    %cst_65 = arith.constant 1.000000e+00 : f32
    %388 = vector.broadcast %cst_65 : f32 to vector<2x32xf32>
    %389 = arith.addf %388, %387 : vector<2x32xf32>
    %390 = arith.divf %388, %389 : vector<2x32xf32>
    %391 = vector.extract_strided_slice %380 {offsets = [0, 32], sizes = [2, 32], strides = [1, 1]} : vector<2x96xf32> to vector<2x32xf32>
    %392 = vector.extract_strided_slice %382 {offsets = [0, 32], sizes = [2, 32], strides = [1, 1]} : vector<2x96xf32> to vector<2x32xf32>
    %393 = arith.addf %391, %392 : vector<2x32xf32>
    %394 = arith.negf %393 : vector<2x32xf32>
    %395 = math.exp %394 : vector<2x32xf32>
    %cst_66 = arith.constant 1.000000e+00 : f32
    %396 = vector.broadcast %cst_66 : f32 to vector<2x32xf32>
    %397 = arith.addf %396, %395 : vector<2x32xf32>
    %398 = arith.divf %396, %397 : vector<2x32xf32>
    %399 = vector.extract_strided_slice %380 {offsets = [0, 64], sizes = [2, 32], strides = [1, 1]} : vector<2x96xf32> to vector<2x32xf32>
    %400 = vector.extract_strided_slice %382 {offsets = [0, 64], sizes = [2, 32], strides = [1, 1]} : vector<2x96xf32> to vector<2x32xf32>
    %401 = arith.addf %400, %12 : vector<2x32xf32>
    %402 = arith.mulf %390, %401 : vector<2x32xf32>
    %403 = arith.addf %399, %402 : vector<2x32xf32>
    %404 = math.tanh %403 : vector<2x32xf32>
    %cst_67 = arith.constant 1.000000e+00 : f32
    %405 = vector.broadcast %cst_67 : f32 to vector<2x32xf32>
    %406 = arith.subf %405, %398 : vector<2x32xf32>
    %407 = arith.mulf %406, %404 : vector<2x32xf32>
    %408 = arith.mulf %398, %377 : vector<2x32xf32>
    %409 = arith.addf %407, %408 : vector<2x32xf32>
    %410 = vector.extract_strided_slice %8 {offsets = [26, 0], sizes = [2, 96], strides = [1, 1]} : vector<40x96xf32> to vector<2x96xf32>
    %411 = arith.truncf %409 : vector<2x32xf32> to vector<2x32xbf16>
    %cst_68 = arith.constant dense<0.000000e+00> : vector<2x96xf32>
    %412 = tpu.matmul %411, %9, %cst_68 {dimension_numbers = #tpu.dot_dimension_numbers<[1], [0], [0], [1], [0, 0, 1, 1], [], []>} : vector<2x32xbf16>, vector<32x96xbf16>, vector<2x96xf32> -> vector<2x96xf32>
    %413 = vector.extract_strided_slice %410 {offsets = [0, 0], sizes = [2, 32], strides = [1, 1]} : vector<2x96xf32> to vector<2x32xf32>
    %414 = vector.extract_strided_slice %412 {offsets = [0, 0], sizes = [2, 32], strides = [1, 1]} : vector<2x96xf32> to vector<2x32xf32>
    %415 = arith.addf %413, %414 : vector<2x32xf32>
    %416 = arith.negf %415 : vector<2x32xf32>
    %417 = math.exp %416 : vector<2x32xf32>
    %cst_69 = arith.constant 1.000000e+00 : f32
    %418 = vector.broadcast %cst_69 : f32 to vector<2x32xf32>
    %419 = arith.addf %418, %417 : vector<2x32xf32>
    %420 = arith.divf %418, %419 : vector<2x32xf32>
    %421 = vector.extract_strided_slice %410 {offsets = [0, 32], sizes = [2, 32], strides = [1, 1]} : vector<2x96xf32> to vector<2x32xf32>
    %422 = vector.extract_strided_slice %412 {offsets = [0, 32], sizes = [2, 32], strides = [1, 1]} : vector<2x96xf32> to vector<2x32xf32>
    %423 = arith.addf %421, %422 : vector<2x32xf32>
    %424 = arith.negf %423 : vector<2x32xf32>
    %425 = math.exp %424 : vector<2x32xf32>
    %cst_70 = arith.constant 1.000000e+00 : f32
    %426 = vector.broadcast %cst_70 : f32 to vector<2x32xf32>
    %427 = arith.addf %426, %425 : vector<2x32xf32>
    %428 = arith.divf %426, %427 : vector<2x32xf32>
    %429 = vector.extract_strided_slice %410 {offsets = [0, 64], sizes = [2, 32], strides = [1, 1]} : vector<2x96xf32> to vector<2x32xf32>
    %430 = vector.extract_strided_slice %412 {offsets = [0, 64], sizes = [2, 32], strides = [1, 1]} : vector<2x96xf32> to vector<2x32xf32>
    %431 = arith.addf %430, %12 : vector<2x32xf32>
    %432 = arith.mulf %420, %431 : vector<2x32xf32>
    %433 = arith.addf %429, %432 : vector<2x32xf32>
    %434 = math.tanh %433 : vector<2x32xf32>
    %cst_71 = arith.constant 1.000000e+00 : f32
    %435 = vector.broadcast %cst_71 : f32 to vector<2x32xf32>
    %436 = arith.subf %435, %428 : vector<2x32xf32>
    %437 = arith.mulf %436, %434 : vector<2x32xf32>
    %438 = arith.mulf %428, %409 : vector<2x32xf32>
    %439 = arith.addf %437, %438 : vector<2x32xf32>
    %440 = vector.extract_strided_slice %8 {offsets = [28, 0], sizes = [2, 96], strides = [1, 1]} : vector<40x96xf32> to vector<2x96xf32>
    %441 = arith.truncf %439 : vector<2x32xf32> to vector<2x32xbf16>
    %cst_72 = arith.constant dense<0.000000e+00> : vector<2x96xf32>
    %442 = tpu.matmul %441, %9, %cst_72 {dimension_numbers = #tpu.dot_dimension_numbers<[1], [0], [0], [1], [0, 0, 1, 1], [], []>} : vector<2x32xbf16>, vector<32x96xbf16>, vector<2x96xf32> -> vector<2x96xf32>
    %443 = vector.extract_strided_slice %440 {offsets = [0, 0], sizes = [2, 32], strides = [1, 1]} : vector<2x96xf32> to vector<2x32xf32>
    %444 = vector.extract_strided_slice %442 {offsets = [0, 0], sizes = [2, 32], strides = [1, 1]} : vector<2x96xf32> to vector<2x32xf32>
    %445 = arith.addf %443, %444 : vector<2x32xf32>
    %446 = arith.negf %445 : vector<2x32xf32>
    %447 = math.exp %446 : vector<2x32xf32>
    %cst_73 = arith.constant 1.000000e+00 : f32
    %448 = vector.broadcast %cst_73 : f32 to vector<2x32xf32>
    %449 = arith.addf %448, %447 : vector<2x32xf32>
    %450 = arith.divf %448, %449 : vector<2x32xf32>
    %451 = vector.extract_strided_slice %440 {offsets = [0, 32], sizes = [2, 32], strides = [1, 1]} : vector<2x96xf32> to vector<2x32xf32>
    %452 = vector.extract_strided_slice %442 {offsets = [0, 32], sizes = [2, 32], strides = [1, 1]} : vector<2x96xf32> to vector<2x32xf32>
    %453 = arith.addf %451, %452 : vector<2x32xf32>
    %454 = arith.negf %453 : vector<2x32xf32>
    %455 = math.exp %454 : vector<2x32xf32>
    %cst_74 = arith.constant 1.000000e+00 : f32
    %456 = vector.broadcast %cst_74 : f32 to vector<2x32xf32>
    %457 = arith.addf %456, %455 : vector<2x32xf32>
    %458 = arith.divf %456, %457 : vector<2x32xf32>
    %459 = vector.extract_strided_slice %440 {offsets = [0, 64], sizes = [2, 32], strides = [1, 1]} : vector<2x96xf32> to vector<2x32xf32>
    %460 = vector.extract_strided_slice %442 {offsets = [0, 64], sizes = [2, 32], strides = [1, 1]} : vector<2x96xf32> to vector<2x32xf32>
    %461 = arith.addf %460, %12 : vector<2x32xf32>
    %462 = arith.mulf %450, %461 : vector<2x32xf32>
    %463 = arith.addf %459, %462 : vector<2x32xf32>
    %464 = math.tanh %463 : vector<2x32xf32>
    %cst_75 = arith.constant 1.000000e+00 : f32
    %465 = vector.broadcast %cst_75 : f32 to vector<2x32xf32>
    %466 = arith.subf %465, %458 : vector<2x32xf32>
    %467 = arith.mulf %466, %464 : vector<2x32xf32>
    %468 = arith.mulf %458, %439 : vector<2x32xf32>
    %469 = arith.addf %467, %468 : vector<2x32xf32>
    %470 = vector.extract_strided_slice %8 {offsets = [30, 0], sizes = [2, 96], strides = [1, 1]} : vector<40x96xf32> to vector<2x96xf32>
    %471 = arith.truncf %469 : vector<2x32xf32> to vector<2x32xbf16>
    %cst_76 = arith.constant dense<0.000000e+00> : vector<2x96xf32>
    %472 = tpu.matmul %471, %9, %cst_76 {dimension_numbers = #tpu.dot_dimension_numbers<[1], [0], [0], [1], [0, 0, 1, 1], [], []>} : vector<2x32xbf16>, vector<32x96xbf16>, vector<2x96xf32> -> vector<2x96xf32>
    %473 = vector.extract_strided_slice %470 {offsets = [0, 0], sizes = [2, 32], strides = [1, 1]} : vector<2x96xf32> to vector<2x32xf32>
    %474 = vector.extract_strided_slice %472 {offsets = [0, 0], sizes = [2, 32], strides = [1, 1]} : vector<2x96xf32> to vector<2x32xf32>
    %475 = arith.addf %473, %474 : vector<2x32xf32>
    %476 = arith.negf %475 : vector<2x32xf32>
    %477 = math.exp %476 : vector<2x32xf32>
    %cst_77 = arith.constant 1.000000e+00 : f32
    %478 = vector.broadcast %cst_77 : f32 to vector<2x32xf32>
    %479 = arith.addf %478, %477 : vector<2x32xf32>
    %480 = arith.divf %478, %479 : vector<2x32xf32>
    %481 = vector.extract_strided_slice %470 {offsets = [0, 32], sizes = [2, 32], strides = [1, 1]} : vector<2x96xf32> to vector<2x32xf32>
    %482 = vector.extract_strided_slice %472 {offsets = [0, 32], sizes = [2, 32], strides = [1, 1]} : vector<2x96xf32> to vector<2x32xf32>
    %483 = arith.addf %481, %482 : vector<2x32xf32>
    %484 = arith.negf %483 : vector<2x32xf32>
    %485 = math.exp %484 : vector<2x32xf32>
    %cst_78 = arith.constant 1.000000e+00 : f32
    %486 = vector.broadcast %cst_78 : f32 to vector<2x32xf32>
    %487 = arith.addf %486, %485 : vector<2x32xf32>
    %488 = arith.divf %486, %487 : vector<2x32xf32>
    %489 = vector.extract_strided_slice %470 {offsets = [0, 64], sizes = [2, 32], strides = [1, 1]} : vector<2x96xf32> to vector<2x32xf32>
    %490 = vector.extract_strided_slice %472 {offsets = [0, 64], sizes = [2, 32], strides = [1, 1]} : vector<2x96xf32> to vector<2x32xf32>
    %491 = arith.addf %490, %12 : vector<2x32xf32>
    %492 = arith.mulf %480, %491 : vector<2x32xf32>
    %493 = arith.addf %489, %492 : vector<2x32xf32>
    %494 = math.tanh %493 : vector<2x32xf32>
    %cst_79 = arith.constant 1.000000e+00 : f32
    %495 = vector.broadcast %cst_79 : f32 to vector<2x32xf32>
    %496 = arith.subf %495, %488 : vector<2x32xf32>
    %497 = arith.mulf %496, %494 : vector<2x32xf32>
    %498 = arith.mulf %488, %469 : vector<2x32xf32>
    %499 = arith.addf %497, %498 : vector<2x32xf32>
    %500 = tpu.concatenate %409, %439, %469, %499 in 0 : vector<2x32xf32>, vector<2x32xf32>, vector<2x32xf32>, vector<2x32xf32> -> vector<8x32xf32>
    %c24 = arith.constant 24 : index
    %c0_80 = arith.constant 0 : index
    %501 = vector.load %arg17[%c24, %c0_80] : memref<40x32xf32, #tpu.memory_space<vmem>>, vector<8x32xf32>
    tpu.vector_store %arg17[%c24, %c0_80], %500 {strides = array<i32>} : memref<40x32xf32, #tpu.memory_space<vmem>>, vector<8x32xf32>,
    %502 = vector.extract_strided_slice %8 {offsets = [32, 0], sizes = [2, 96], strides = [1, 1]} : vector<40x96xf32> to vector<2x96xf32>
    %503 = arith.truncf %499 : vector<2x32xf32> to vector<2x32xbf16>
    %cst_81 = arith.constant dense<0.000000e+00> : vector<2x96xf32>
    %504 = tpu.matmul %503, %9, %cst_81 {dimension_numbers = #tpu.dot_dimension_numbers<[1], [0], [0], [1], [0, 0, 1, 1], [], []>} : vector<2x32xbf16>, vector<32x96xbf16>, vector<2x96xf32> -> vector<2x96xf32>
    %505 = vector.extract_strided_slice %502 {offsets = [0, 0], sizes = [2, 32], strides = [1, 1]} : vector<2x96xf32> to vector<2x32xf32>
    %506 = vector.extract_strided_slice %504 {offsets = [0, 0], sizes = [2, 32], strides = [1, 1]} : vector<2x96xf32> to vector<2x32xf32>
    %507 = arith.addf %505, %506 : vector<2x32xf32>
    %508 = arith.negf %507 : vector<2x32xf32>
    %509 = math.exp %508 : vector<2x32xf32>
    %cst_82 = arith.constant 1.000000e+00 : f32
    %510 = vector.broadcast %cst_82 : f32 to vector<2x32xf32>
    %511 = arith.addf %510, %509 : vector<2x32xf32>
    %512 = arith.divf %510, %511 : vector<2x32xf32>
    %513 = vector.extract_strided_slice %502 {offsets = [0, 32], sizes = [2, 32], strides = [1, 1]} : vector<2x96xf32> to vector<2x32xf32>
    %514 = vector.extract_strided_slice %504 {offsets = [0, 32], sizes = [2, 32], strides = [1, 1]} : vector<2x96xf32> to vector<2x32xf32>
    %515 = arith.addf %513, %514 : vector<2x32xf32>
    %516 = arith.negf %515 : vector<2x32xf32>
    %517 = math.exp %516 : vector<2x32xf32>
    %cst_83 = arith.constant 1.000000e+00 : f32
    %518 = vector.broadcast %cst_83 : f32 to vector<2x32xf32>
    %519 = arith.addf %518, %517 : vector<2x32xf32>
    %520 = arith.divf %518, %519 : vector<2x32xf32>
    %521 = vector.extract_strided_slice %502 {offsets = [0, 64], sizes = [2, 32], strides = [1, 1]} : vector<2x96xf32> to vector<2x32xf32>
    %522 = vector.extract_strided_slice %504 {offsets = [0, 64], sizes = [2, 32], strides = [1, 1]} : vector<2x96xf32> to vector<2x32xf32>
    %523 = arith.addf %522, %12 : vector<2x32xf32>
    %524 = arith.mulf %512, %523 : vector<2x32xf32>
    %525 = arith.addf %521, %524 : vector<2x32xf32>
    %526 = math.tanh %525 : vector<2x32xf32>
    %cst_84 = arith.constant 1.000000e+00 : f32
    %527 = vector.broadcast %cst_84 : f32 to vector<2x32xf32>
    %528 = arith.subf %527, %520 : vector<2x32xf32>
    %529 = arith.mulf %528, %526 : vector<2x32xf32>
    %530 = arith.mulf %520, %499 : vector<2x32xf32>
    %531 = arith.addf %529, %530 : vector<2x32xf32>
    %532 = vector.extract_strided_slice %8 {offsets = [34, 0], sizes = [2, 96], strides = [1, 1]} : vector<40x96xf32> to vector<2x96xf32>
    %533 = arith.truncf %531 : vector<2x32xf32> to vector<2x32xbf16>
    %cst_85 = arith.constant dense<0.000000e+00> : vector<2x96xf32>
    %534 = tpu.matmul %533, %9, %cst_85 {dimension_numbers = #tpu.dot_dimension_numbers<[1], [0], [0], [1], [0, 0, 1, 1], [], []>} : vector<2x32xbf16>, vector<32x96xbf16>, vector<2x96xf32> -> vector<2x96xf32>
    %535 = vector.extract_strided_slice %532 {offsets = [0, 0], sizes = [2, 32], strides = [1, 1]} : vector<2x96xf32> to vector<2x32xf32>
    %536 = vector.extract_strided_slice %534 {offsets = [0, 0], sizes = [2, 32], strides = [1, 1]} : vector<2x96xf32> to vector<2x32xf32>
    %537 = arith.addf %535, %536 : vector<2x32xf32>
    %538 = arith.negf %537 : vector<2x32xf32>
    %539 = math.exp %538 : vector<2x32xf32>
    %cst_86 = arith.constant 1.000000e+00 : f32
    %540 = vector.broadcast %cst_86 : f32 to vector<2x32xf32>
    %541 = arith.addf %540, %539 : vector<2x32xf32>
    %542 = arith.divf %540, %541 : vector<2x32xf32>
    %543 = vector.extract_strided_slice %532 {offsets = [0, 32], sizes = [2, 32], strides = [1, 1]} : vector<2x96xf32> to vector<2x32xf32>
    %544 = vector.extract_strided_slice %534 {offsets = [0, 32], sizes = [2, 32], strides = [1, 1]} : vector<2x96xf32> to vector<2x32xf32>
    %545 = arith.addf %543, %544 : vector<2x32xf32>
    %546 = arith.negf %545 : vector<2x32xf32>
    %547 = math.exp %546 : vector<2x32xf32>
    %cst_87 = arith.constant 1.000000e+00 : f32
    %548 = vector.broadcast %cst_87 : f32 to vector<2x32xf32>
    %549 = arith.addf %548, %547 : vector<2x32xf32>
    %550 = arith.divf %548, %549 : vector<2x32xf32>
    %551 = vector.extract_strided_slice %532 {offsets = [0, 64], sizes = [2, 32], strides = [1, 1]} : vector<2x96xf32> to vector<2x32xf32>
    %552 = vector.extract_strided_slice %534 {offsets = [0, 64], sizes = [2, 32], strides = [1, 1]} : vector<2x96xf32> to vector<2x32xf32>
    %553 = arith.addf %552, %12 : vector<2x32xf32>
    %554 = arith.mulf %542, %553 : vector<2x32xf32>
    %555 = arith.addf %551, %554 : vector<2x32xf32>
    %556 = math.tanh %555 : vector<2x32xf32>
    %cst_88 = arith.constant 1.000000e+00 : f32
    %557 = vector.broadcast %cst_88 : f32 to vector<2x32xf32>
    %558 = arith.subf %557, %550 : vector<2x32xf32>
    %559 = arith.mulf %558, %556 : vector<2x32xf32>
    %560 = arith.mulf %550, %531 : vector<2x32xf32>
    %561 = arith.addf %559, %560 : vector<2x32xf32>
    %562 = vector.extract_strided_slice %8 {offsets = [36, 0], sizes = [2, 96], strides = [1, 1]} : vector<40x96xf32> to vector<2x96xf32>
    %563 = arith.truncf %561 : vector<2x32xf32> to vector<2x32xbf16>
    %cst_89 = arith.constant dense<0.000000e+00> : vector<2x96xf32>
    %564 = tpu.matmul %563, %9, %cst_89 {dimension_numbers = #tpu.dot_dimension_numbers<[1], [0], [0], [1], [0, 0, 1, 1], [], []>} : vector<2x32xbf16>, vector<32x96xbf16>, vector<2x96xf32> -> vector<2x96xf32>
    %565 = vector.extract_strided_slice %562 {offsets = [0, 0], sizes = [2, 32], strides = [1, 1]} : vector<2x96xf32> to vector<2x32xf32>
    %566 = vector.extract_strided_slice %564 {offsets = [0, 0], sizes = [2, 32], strides = [1, 1]} : vector<2x96xf32> to vector<2x32xf32>
    %567 = arith.addf %565, %566 : vector<2x32xf32>
    %568 = arith.negf %567 : vector<2x32xf32>
    %569 = math.exp %568 : vector<2x32xf32>
    %cst_90 = arith.constant 1.000000e+00 : f32
    %570 = vector.broadcast %cst_90 : f32 to vector<2x32xf32>
    %571 = arith.addf %570, %569 : vector<2x32xf32>
    %572 = arith.divf %570, %571 : vector<2x32xf32>
    %573 = vector.extract_strided_slice %562 {offsets = [0, 32], sizes = [2, 32], strides = [1, 1]} : vector<2x96xf32> to vector<2x32xf32>
    %574 = vector.extract_strided_slice %564 {offsets = [0, 32], sizes = [2, 32], strides = [1, 1]} : vector<2x96xf32> to vector<2x32xf32>
    %575 = arith.addf %573, %574 : vector<2x32xf32>
    %576 = arith.negf %575 : vector<2x32xf32>
    %577 = math.exp %576 : vector<2x32xf32>
    %cst_91 = arith.constant 1.000000e+00 : f32
    %578 = vector.broadcast %cst_91 : f32 to vector<2x32xf32>
    %579 = arith.addf %578, %577 : vector<2x32xf32>
    %580 = arith.divf %578, %579 : vector<2x32xf32>
    %581 = vector.extract_strided_slice %562 {offsets = [0, 64], sizes = [2, 32], strides = [1, 1]} : vector<2x96xf32> to vector<2x32xf32>
    %582 = vector.extract_strided_slice %564 {offsets = [0, 64], sizes = [2, 32], strides = [1, 1]} : vector<2x96xf32> to vector<2x32xf32>
    %583 = arith.addf %582, %12 : vector<2x32xf32>
    %584 = arith.mulf %572, %583 : vector<2x32xf32>
    %585 = arith.addf %581, %584 : vector<2x32xf32>
    %586 = math.tanh %585 : vector<2x32xf32>
    %cst_92 = arith.constant 1.000000e+00 : f32
    %587 = vector.broadcast %cst_92 : f32 to vector<2x32xf32>
    %588 = arith.subf %587, %580 : vector<2x32xf32>
    %589 = arith.mulf %588, %586 : vector<2x32xf32>
    %590 = arith.mulf %580, %561 : vector<2x32xf32>
    %591 = arith.addf %589, %590 : vector<2x32xf32>
    %592 = vector.extract_strided_slice %8 {offsets = [38, 0], sizes = [2, 96], strides = [1, 1]} : vector<40x96xf32> to vector<2x96xf32>
    %593 = arith.truncf %591 : vector<2x32xf32> to vector<2x32xbf16>
    %cst_93 = arith.constant dense<0.000000e+00> : vector<2x96xf32>
    %594 = tpu.matmul %593, %9, %cst_93 {dimension_numbers = #tpu.dot_dimension_numbers<[1], [0], [0], [1], [0, 0, 1, 1], [], []>} : vector<2x32xbf16>, vector<32x96xbf16>, vector<2x96xf32> -> vector<2x96xf32>
    %595 = vector.extract_strided_slice %592 {offsets = [0, 0], sizes = [2, 32], strides = [1, 1]} : vector<2x96xf32> to vector<2x32xf32>
    %596 = vector.extract_strided_slice %594 {offsets = [0, 0], sizes = [2, 32], strides = [1, 1]} : vector<2x96xf32> to vector<2x32xf32>
    %597 = arith.addf %595, %596 : vector<2x32xf32>
    %598 = arith.negf %597 : vector<2x32xf32>
    %599 = math.exp %598 : vector<2x32xf32>
    %cst_94 = arith.constant 1.000000e+00 : f32
    %600 = vector.broadcast %cst_94 : f32 to vector<2x32xf32>
    %601 = arith.addf %600, %599 : vector<2x32xf32>
    %602 = arith.divf %600, %601 : vector<2x32xf32>
    %603 = vector.extract_strided_slice %592 {offsets = [0, 32], sizes = [2, 32], strides = [1, 1]} : vector<2x96xf32> to vector<2x32xf32>
    %604 = vector.extract_strided_slice %594 {offsets = [0, 32], sizes = [2, 32], strides = [1, 1]} : vector<2x96xf32> to vector<2x32xf32>
    %605 = arith.addf %603, %604 : vector<2x32xf32>
    %606 = arith.negf %605 : vector<2x32xf32>
    %607 = math.exp %606 : vector<2x32xf32>
    %cst_95 = arith.constant 1.000000e+00 : f32
    %608 = vector.broadcast %cst_95 : f32 to vector<2x32xf32>
    %609 = arith.addf %608, %607 : vector<2x32xf32>
    %610 = arith.divf %608, %609 : vector<2x32xf32>
    %611 = vector.extract_strided_slice %592 {offsets = [0, 64], sizes = [2, 32], strides = [1, 1]} : vector<2x96xf32> to vector<2x32xf32>
    %612 = vector.extract_strided_slice %594 {offsets = [0, 64], sizes = [2, 32], strides = [1, 1]} : vector<2x96xf32> to vector<2x32xf32>
    %613 = arith.addf %612, %12 : vector<2x32xf32>
    %614 = arith.mulf %602, %613 : vector<2x32xf32>
    %615 = arith.addf %611, %614 : vector<2x32xf32>
    %616 = math.tanh %615 : vector<2x32xf32>
    %cst_96 = arith.constant 1.000000e+00 : f32
    %617 = vector.broadcast %cst_96 : f32 to vector<2x32xf32>
    %618 = arith.subf %617, %610 : vector<2x32xf32>
    %619 = arith.mulf %618, %616 : vector<2x32xf32>
    %620 = arith.mulf %610, %591 : vector<2x32xf32>
    %621 = arith.addf %619, %620 : vector<2x32xf32>
    %622 = tpu.concatenate %531, %561, %591, %621 in 0 : vector<2x32xf32>, vector<2x32xf32>, vector<2x32xf32>, vector<2x32xf32> -> vector<8x32xf32>
    %c32 = arith.constant 32 : index
    %c0_97 = arith.constant 0 : index
    %623 = vector.load %arg17[%c32, %c0_97] : memref<40x32xf32, #tpu.memory_space<vmem>>, vector<8x32xf32>
    tpu.vector_store %arg17[%c32, %c0_97], %622 {strides = array<i32>} : memref<40x32xf32, #tpu.memory_space<vmem>>, vector<8x32xf32>,
    %c0_98 = arith.constant 0 : index
    %c0_99 = arith.constant 0 : index
    %624 = vector.load %arg17[%c0_98, %c0_99] : memref<40x32xf32, #tpu.memory_space<vmem>>, vector<40x32xf32>
    %625 = arith.truncf %624 : vector<40x32xf32> to vector<40x32xbf16>
    %c0_100 = arith.constant 0 : index
    %c0_101 = arith.constant 0 : index
    %626 = vector.load %arg5[%c0_100, %c0_101] : memref<32x72xbf16, #tpu.memory_space<vmem>>, vector<32x72xbf16>
    %cst_102 = arith.constant dense<0.000000e+00> : vector<40x72xf32>
    %627 = tpu.matmul %625, %626, %cst_102 {dimension_numbers = #tpu.dot_dimension_numbers<[1], [0], [0], [1], [0, 0, 1, 1], [], []>} : vector<40x32xbf16>, vector<32x72xbf16>, vector<40x72xf32> -> vector<40x72xf32>
    %c0_103 = arith.constant 0 : index
    %c0_104 = arith.constant 0 : index
    %628 = vector.load %arg7[%c0_103, %c0_104] : memref<1x72xf32, #tpu.memory_space<vmem>>, vector<1x72xf32>
    %629 = vector.broadcast %628 : vector<1x72xf32> to vector<40x72xf32>
    %630 = arith.addf %627, %629 : vector<40x72xf32>
    %c0_105 = arith.constant 0 : index
    %c0_106 = arith.constant 0 : index
    %631 = vector.load %arg6[%c0_105, %c0_106] : memref<24x72xbf16, #tpu.memory_space<vmem>>, vector<24x72xbf16>
    %c0_107 = arith.constant 0 : index
    %c0_108 = arith.constant 0 : index
    %632 = vector.load %arg8[%c0_107, %c0_108] : memref<1x24xf32, #tpu.memory_space<vmem>>, vector<1x24xf32>
    %633 = vector.shape_cast %632 : vector<1x24xf32> to vector<1x24xf32>
    %634 = vector.broadcast %633 : vector<1x24xf32> to vector<8x24xf32>
    %cst_109 = arith.constant 0.000000e+00 : f32
    %635 = vector.broadcast %cst_109 : f32 to vector<8x24xf32>
    %636 = vector.extract_strided_slice %630 {offsets = [0, 0], sizes = [8, 72], strides = [1, 1]} : vector<40x72xf32> to vector<8x72xf32>
    %637 = arith.truncf %635 : vector<8x24xf32> to vector<8x24xbf16>
    %cst_110 = arith.constant dense<0.000000e+00> : vector<8x72xf32>
    %638 = tpu.matmul %637, %631, %cst_110 {dimension_numbers = #tpu.dot_dimension_numbers<[1], [0], [0], [1], [0, 0, 1, 1], [], []>} : vector<8x24xbf16>, vector<24x72xbf16>, vector<8x72xf32> -> vector<8x72xf32>
    %639 = vector.extract_strided_slice %636 {offsets = [0, 0], sizes = [8, 24], strides = [1, 1]} : vector<8x72xf32> to vector<8x24xf32>
    %640 = vector.extract_strided_slice %638 {offsets = [0, 0], sizes = [8, 24], strides = [1, 1]} : vector<8x72xf32> to vector<8x24xf32>
    %641 = arith.addf %639, %640 : vector<8x24xf32>
    %642 = arith.negf %641 : vector<8x24xf32>
    %643 = math.exp %642 : vector<8x24xf32>
    %cst_111 = arith.constant 1.000000e+00 : f32
    %644 = vector.broadcast %cst_111 : f32 to vector<8x24xf32>
    %645 = arith.addf %644, %643 : vector<8x24xf32>
    %646 = arith.divf %644, %645 : vector<8x24xf32>
    %647 = vector.extract_strided_slice %636 {offsets = [0, 24], sizes = [8, 24], strides = [1, 1]} : vector<8x72xf32> to vector<8x24xf32>
    %648 = vector.extract_strided_slice %638 {offsets = [0, 24], sizes = [8, 24], strides = [1, 1]} : vector<8x72xf32> to vector<8x24xf32>
    %649 = arith.addf %647, %648 : vector<8x24xf32>
    %650 = arith.negf %649 : vector<8x24xf32>
    %651 = math.exp %650 : vector<8x24xf32>
    %cst_112 = arith.constant 1.000000e+00 : f32
    %652 = vector.broadcast %cst_112 : f32 to vector<8x24xf32>
    %653 = arith.addf %652, %651 : vector<8x24xf32>
    %654 = arith.divf %652, %653 : vector<8x24xf32>
    %655 = vector.extract_strided_slice %636 {offsets = [0, 48], sizes = [8, 24], strides = [1, 1]} : vector<8x72xf32> to vector<8x24xf32>
    %656 = vector.extract_strided_slice %638 {offsets = [0, 48], sizes = [8, 24], strides = [1, 1]} : vector<8x72xf32> to vector<8x24xf32>
    %657 = arith.addf %656, %634 : vector<8x24xf32>
    %658 = arith.mulf %646, %657 : vector<8x24xf32>
    %659 = arith.addf %655, %658 : vector<8x24xf32>
    %660 = math.tanh %659 : vector<8x24xf32>
    %cst_113 = arith.constant 1.000000e+00 : f32
    %661 = vector.broadcast %cst_113 : f32 to vector<8x24xf32>
    %662 = arith.subf %661, %654 : vector<8x24xf32>
    %663 = arith.mulf %662, %660 : vector<8x24xf32>
    %664 = arith.mulf %654, %635 : vector<8x24xf32>
    %665 = arith.addf %663, %664 : vector<8x24xf32>
    %c0_114 = arith.constant 0 : index
    %c0_115 = arith.constant 0 : index
    %666 = vector.load %arg18[%c0_114, %c0_115] : memref<64x24xf32, #tpu.memory_space<vmem>>, vector<8x24xf32>
    tpu.vector_store %arg18[%c0_114, %c0_115], %665 {strides = array<i32>} : memref<64x24xf32, #tpu.memory_space<vmem>>, vector<8x24xf32>,
    %667 = vector.extract_strided_slice %630 {offsets = [8, 0], sizes = [8, 72], strides = [1, 1]} : vector<40x72xf32> to vector<8x72xf32>
    %668 = arith.truncf %665 : vector<8x24xf32> to vector<8x24xbf16>
    %cst_116 = arith.constant dense<0.000000e+00> : vector<8x72xf32>
    %669 = tpu.matmul %668, %631, %cst_116 {dimension_numbers = #tpu.dot_dimension_numbers<[1], [0], [0], [1], [0, 0, 1, 1], [], []>} : vector<8x24xbf16>, vector<24x72xbf16>, vector<8x72xf32> -> vector<8x72xf32>
    %670 = vector.extract_strided_slice %667 {offsets = [0, 0], sizes = [8, 24], strides = [1, 1]} : vector<8x72xf32> to vector<8x24xf32>
    %671 = vector.extract_strided_slice %669 {offsets = [0, 0], sizes = [8, 24], strides = [1, 1]} : vector<8x72xf32> to vector<8x24xf32>
    %672 = arith.addf %670, %671 : vector<8x24xf32>
    %673 = arith.negf %672 : vector<8x24xf32>
    %674 = math.exp %673 : vector<8x24xf32>
    %cst_117 = arith.constant 1.000000e+00 : f32
    %675 = vector.broadcast %cst_117 : f32 to vector<8x24xf32>
    %676 = arith.addf %675, %674 : vector<8x24xf32>
    %677 = arith.divf %675, %676 : vector<8x24xf32>
    %678 = vector.extract_strided_slice %667 {offsets = [0, 24], sizes = [8, 24], strides = [1, 1]} : vector<8x72xf32> to vector<8x24xf32>
    %679 = vector.extract_strided_slice %669 {offsets = [0, 24], sizes = [8, 24], strides = [1, 1]} : vector<8x72xf32> to vector<8x24xf32>
    %680 = arith.addf %678, %679 : vector<8x24xf32>
    %681 = arith.negf %680 : vector<8x24xf32>
    %682 = math.exp %681 : vector<8x24xf32>
    %cst_118 = arith.constant 1.000000e+00 : f32
    %683 = vector.broadcast %cst_118 : f32 to vector<8x24xf32>
    %684 = arith.addf %683, %682 : vector<8x24xf32>
    %685 = arith.divf %683, %684 : vector<8x24xf32>
    %686 = vector.extract_strided_slice %667 {offsets = [0, 48], sizes = [8, 24], strides = [1, 1]} : vector<8x72xf32> to vector<8x24xf32>
    %687 = vector.extract_strided_slice %669 {offsets = [0, 48], sizes = [8, 24], strides = [1, 1]} : vector<8x72xf32> to vector<8x24xf32>
    %688 = arith.addf %687, %634 : vector<8x24xf32>
    %689 = arith.mulf %677, %688 : vector<8x24xf32>
    %690 = arith.addf %686, %689 : vector<8x24xf32>
    %691 = math.tanh %690 : vector<8x24xf32>
    %cst_119 = arith.constant 1.000000e+00 : f32
    %692 = vector.broadcast %cst_119 : f32 to vector<8x24xf32>
    %693 = arith.subf %692, %685 : vector<8x24xf32>
    %694 = arith.mulf %693, %691 : vector<8x24xf32>
    %695 = arith.mulf %685, %665 : vector<8x24xf32>
    %696 = arith.addf %694, %695 : vector<8x24xf32>
    %c8_120 = arith.constant 8 : index
    %c0_121 = arith.constant 0 : index
    %697 = vector.load %arg18[%c8_120, %c0_121] : memref<64x24xf32, #tpu.memory_space<vmem>>, vector<8x24xf32>
    tpu.vector_store %arg18[%c8_120, %c0_121], %696 {strides = array<i32>} : memref<64x24xf32, #tpu.memory_space<vmem>>, vector<8x24xf32>,
    %698 = vector.extract_strided_slice %630 {offsets = [16, 0], sizes = [8, 72], strides = [1, 1]} : vector<40x72xf32> to vector<8x72xf32>
    %699 = arith.truncf %696 : vector<8x24xf32> to vector<8x24xbf16>
    %cst_122 = arith.constant dense<0.000000e+00> : vector<8x72xf32>
    %700 = tpu.matmul %699, %631, %cst_122 {dimension_numbers = #tpu.dot_dimension_numbers<[1], [0], [0], [1], [0, 0, 1, 1], [], []>} : vector<8x24xbf16>, vector<24x72xbf16>, vector<8x72xf32> -> vector<8x72xf32>
    %701 = vector.extract_strided_slice %698 {offsets = [0, 0], sizes = [8, 24], strides = [1, 1]} : vector<8x72xf32> to vector<8x24xf32>
    %702 = vector.extract_strided_slice %700 {offsets = [0, 0], sizes = [8, 24], strides = [1, 1]} : vector<8x72xf32> to vector<8x24xf32>
    %703 = arith.addf %701, %702 : vector<8x24xf32>
    %704 = arith.negf %703 : vector<8x24xf32>
    %705 = math.exp %704 : vector<8x24xf32>
    %cst_123 = arith.constant 1.000000e+00 : f32
    %706 = vector.broadcast %cst_123 : f32 to vector<8x24xf32>
    %707 = arith.addf %706, %705 : vector<8x24xf32>
    %708 = arith.divf %706, %707 : vector<8x24xf32>
    %709 = vector.extract_strided_slice %698 {offsets = [0, 24], sizes = [8, 24], strides = [1, 1]} : vector<8x72xf32> to vector<8x24xf32>
    %710 = vector.extract_strided_slice %700 {offsets = [0, 24], sizes = [8, 24], strides = [1, 1]} : vector<8x72xf32> to vector<8x24xf32>
    %711 = arith.addf %709, %710 : vector<8x24xf32>
    %712 = arith.negf %711 : vector<8x24xf32>
    %713 = math.exp %712 : vector<8x24xf32>
    %cst_124 = arith.constant 1.000000e+00 : f32
    %714 = vector.broadcast %cst_124 : f32 to vector<8x24xf32>
    %715 = arith.addf %714, %713 : vector<8x24xf32>
    %716 = arith.divf %714, %715 : vector<8x24xf32>
    %717 = vector.extract_strided_slice %698 {offsets = [0, 48], sizes = [8, 24], strides = [1, 1]} : vector<8x72xf32> to vector<8x24xf32>
    %718 = vector.extract_strided_slice %700 {offsets = [0, 48], sizes = [8, 24], strides = [1, 1]} : vector<8x72xf32> to vector<8x24xf32>
    %719 = arith.addf %718, %634 : vector<8x24xf32>
    %720 = arith.mulf %708, %719 : vector<8x24xf32>
    %721 = arith.addf %717, %720 : vector<8x24xf32>
    %722 = math.tanh %721 : vector<8x24xf32>
    %cst_125 = arith.constant 1.000000e+00 : f32
    %723 = vector.broadcast %cst_125 : f32 to vector<8x24xf32>
    %724 = arith.subf %723, %716 : vector<8x24xf32>
    %725 = arith.mulf %724, %722 : vector<8x24xf32>
    %726 = arith.mulf %716, %696 : vector<8x24xf32>
    %727 = arith.addf %725, %726 : vector<8x24xf32>
    %c16_126 = arith.constant 16 : index
    %c0_127 = arith.constant 0 : index
    %728 = vector.load %arg18[%c16_126, %c0_127] : memref<64x24xf32, #tpu.memory_space<vmem>>, vector<8x24xf32>
    tpu.vector_store %arg18[%c16_126, %c0_127], %727 {strides = array<i32>} : memref<64x24xf32, #tpu.memory_space<vmem>>, vector<8x24xf32>,
    %729 = vector.extract_strided_slice %630 {offsets = [24, 0], sizes = [8, 72], strides = [1, 1]} : vector<40x72xf32> to vector<8x72xf32>
    %730 = arith.truncf %727 : vector<8x24xf32> to vector<8x24xbf16>
    %cst_128 = arith.constant dense<0.000000e+00> : vector<8x72xf32>
    %731 = tpu.matmul %730, %631, %cst_128 {dimension_numbers = #tpu.dot_dimension_numbers<[1], [0], [0], [1], [0, 0, 1, 1], [], []>} : vector<8x24xbf16>, vector<24x72xbf16>, vector<8x72xf32> -> vector<8x72xf32>
    %732 = vector.extract_strided_slice %729 {offsets = [0, 0], sizes = [8, 24], strides = [1, 1]} : vector<8x72xf32> to vector<8x24xf32>
    %733 = vector.extract_strided_slice %731 {offsets = [0, 0], sizes = [8, 24], strides = [1, 1]} : vector<8x72xf32> to vector<8x24xf32>
    %734 = arith.addf %732, %733 : vector<8x24xf32>
    %735 = arith.negf %734 : vector<8x24xf32>
    %736 = math.exp %735 : vector<8x24xf32>
    %cst_129 = arith.constant 1.000000e+00 : f32
    %737 = vector.broadcast %cst_129 : f32 to vector<8x24xf32>
    %738 = arith.addf %737, %736 : vector<8x24xf32>
    %739 = arith.divf %737, %738 : vector<8x24xf32>
    %740 = vector.extract_strided_slice %729 {offsets = [0, 24], sizes = [8, 24], strides = [1, 1]} : vector<8x72xf32> to vector<8x24xf32>
    %741 = vector.extract_strided_slice %731 {offsets = [0, 24], sizes = [8, 24], strides = [1, 1]} : vector<8x72xf32> to vector<8x24xf32>
    %742 = arith.addf %740, %741 : vector<8x24xf32>
    %743 = arith.negf %742 : vector<8x24xf32>
    %744 = math.exp %743 : vector<8x24xf32>
    %cst_130 = arith.constant 1.000000e+00 : f32
    %745 = vector.broadcast %cst_130 : f32 to vector<8x24xf32>
    %746 = arith.addf %745, %744 : vector<8x24xf32>
    %747 = arith.divf %745, %746 : vector<8x24xf32>
    %748 = vector.extract_strided_slice %729 {offsets = [0, 48], sizes = [8, 24], strides = [1, 1]} : vector<8x72xf32> to vector<8x24xf32>
    %749 = vector.extract_strided_slice %731 {offsets = [0, 48], sizes = [8, 24], strides = [1, 1]} : vector<8x72xf32> to vector<8x24xf32>
    %750 = arith.addf %749, %634 : vector<8x24xf32>
    %751 = arith.mulf %739, %750 : vector<8x24xf32>
    %752 = arith.addf %748, %751 : vector<8x24xf32>
    %753 = math.tanh %752 : vector<8x24xf32>
    %cst_131 = arith.constant 1.000000e+00 : f32
    %754 = vector.broadcast %cst_131 : f32 to vector<8x24xf32>
    %755 = arith.subf %754, %747 : vector<8x24xf32>
    %756 = arith.mulf %755, %753 : vector<8x24xf32>
    %757 = arith.mulf %747, %727 : vector<8x24xf32>
    %758 = arith.addf %756, %757 : vector<8x24xf32>
    %c24_132 = arith.constant 24 : index
    %c0_133 = arith.constant 0 : index
    %759 = vector.load %arg18[%c24_132, %c0_133] : memref<64x24xf32, #tpu.memory_space<vmem>>, vector<8x24xf32>
    tpu.vector_store %arg18[%c24_132, %c0_133], %758 {strides = array<i32>} : memref<64x24xf32, #tpu.memory_space<vmem>>, vector<8x24xf32>,
    %760 = vector.extract_strided_slice %630 {offsets = [32, 0], sizes = [8, 72], strides = [1, 1]} : vector<40x72xf32> to vector<8x72xf32>
    %761 = arith.truncf %758 : vector<8x24xf32> to vector<8x24xbf16>
    %cst_134 = arith.constant dense<0.000000e+00> : vector<8x72xf32>
    %762 = tpu.matmul %761, %631, %cst_134 {dimension_numbers = #tpu.dot_dimension_numbers<[1], [0], [0], [1], [0, 0, 1, 1], [], []>} : vector<8x24xbf16>, vector<24x72xbf16>, vector<8x72xf32> -> vector<8x72xf32>
    %763 = vector.extract_strided_slice %760 {offsets = [0, 0], sizes = [8, 24], strides = [1, 1]} : vector<8x72xf32> to vector<8x24xf32>
    %764 = vector.extract_strided_slice %762 {offsets = [0, 0], sizes = [8, 24], strides = [1, 1]} : vector<8x72xf32> to vector<8x24xf32>
    %765 = arith.addf %763, %764 : vector<8x24xf32>
    %766 = arith.negf %765 : vector<8x24xf32>
    %767 = math.exp %766 : vector<8x24xf32>
    %cst_135 = arith.constant 1.000000e+00 : f32
    %768 = vector.broadcast %cst_135 : f32 to vector<8x24xf32>
    %769 = arith.addf %768, %767 : vector<8x24xf32>
    %770 = arith.divf %768, %769 : vector<8x24xf32>
    %771 = vector.extract_strided_slice %760 {offsets = [0, 24], sizes = [8, 24], strides = [1, 1]} : vector<8x72xf32> to vector<8x24xf32>
    %772 = vector.extract_strided_slice %762 {offsets = [0, 24], sizes = [8, 24], strides = [1, 1]} : vector<8x72xf32> to vector<8x24xf32>
    %773 = arith.addf %771, %772 : vector<8x24xf32>
    %774 = arith.negf %773 : vector<8x24xf32>
    %775 = math.exp %774 : vector<8x24xf32>
    %cst_136 = arith.constant 1.000000e+00 : f32
    %776 = vector.broadcast %cst_136 : f32 to vector<8x24xf32>
    %777 = arith.addf %776, %775 : vector<8x24xf32>
    %778 = arith.divf %776, %777 : vector<8x24xf32>
    %779 = vector.extract_strided_slice %760 {offsets = [0, 48], sizes = [8, 24], strides = [1, 1]} : vector<8x72xf32> to vector<8x24xf32>
    %780 = vector.extract_strided_slice %762 {offsets = [0, 48], sizes = [8, 24], strides = [1, 1]} : vector<8x72xf32> to vector<8x24xf32>
    %781 = arith.addf %780, %634 : vector<8x24xf32>
    %782 = arith.mulf %770, %781 : vector<8x24xf32>
    %783 = arith.addf %779, %782 : vector<8x24xf32>
    %784 = math.tanh %783 : vector<8x24xf32>
    %cst_137 = arith.constant 1.000000e+00 : f32
    %785 = vector.broadcast %cst_137 : f32 to vector<8x24xf32>
    %786 = arith.subf %785, %778 : vector<8x24xf32>
    %787 = arith.mulf %786, %784 : vector<8x24xf32>
    %788 = arith.mulf %778, %758 : vector<8x24xf32>
    %789 = arith.addf %787, %788 : vector<8x24xf32>
    %790 = vector.extract_strided_slice %789 {offsets = [6, 0], sizes = [2, 24], strides = [1, 1]} : vector<8x24xf32> to vector<2x24xf32>
    %c32_138 = arith.constant 32 : index
    %c0_139 = arith.constant 0 : index
    %791 = vector.load %arg18[%c32_138, %c0_139] : memref<64x24xf32, #tpu.memory_space<vmem>>, vector<8x24xf32>
    tpu.vector_store %arg18[%c32_138, %c0_139], %789 {strides = array<i32>} : memref<64x24xf32, #tpu.memory_space<vmem>>, vector<8x24xf32>,
    %c0_140 = arith.constant 0 : index
    %c0_141 = arith.constant 0 : index
    %792 = vector.load %arg18[%c0_140, %c0_141] : memref<64x24xf32, #tpu.memory_space<vmem>>, vector<64x24xf32>
    %793 = arith.truncf %792 : vector<64x24xf32> to vector<64x24xbf16>
    %c0_142 = arith.constant 0 : index
    %c0_143 = arith.constant 0 : index
    %794 = vector.load %arg9[%c0_142, %c0_143] : memref<24x48xbf16, #tpu.memory_space<vmem>>, vector<24x48xbf16>
    %cst_144 = arith.constant dense<0.000000e+00> : vector<64x48xf32>
    %795 = tpu.matmul %793, %794, %cst_144 {dimension_numbers = #tpu.dot_dimension_numbers<[1], [0], [0], [1], [0, 0, 1, 1], [], []>} : vector<64x24xbf16>, vector<24x48xbf16>, vector<64x48xf32> -> vector<64x48xf32>
    %c0_145 = arith.constant 0 : index
    %c0_146 = arith.constant 0 : index
    %796 = vector.load %arg11[%c0_145, %c0_146] : memref<1x48xf32, #tpu.memory_space<vmem>>, vector<1x48xf32>
    %797 = vector.broadcast %796 : vector<1x48xf32> to vector<64x48xf32>
    %798 = arith.addf %795, %797 : vector<64x48xf32>
    %c0_147 = arith.constant 0 : index
    %c0_148 = arith.constant 0 : index
    %799 = vector.load %arg10[%c0_147, %c0_148] : memref<16x48xbf16, #tpu.memory_space<vmem>>, vector<16x48xbf16>
    %c0_149 = arith.constant 0 : index
    %c0_150 = arith.constant 0 : index
    %800 = vector.load %arg12[%c0_149, %c0_150] : memref<1x16xf32, #tpu.memory_space<vmem>>, vector<1x16xf32>
    %801 = vector.shape_cast %800 : vector<1x16xf32> to vector<1x16xf32>
    %802 = vector.broadcast %801 : vector<1x16xf32> to vector<32x16xf32>
    %cst_151 = arith.constant 0.000000e+00 : f32
    %803 = vector.broadcast %cst_151 : f32 to vector<32x16xf32>
    %804 = vector.extract_strided_slice %798 {offsets = [0, 0], sizes = [32, 48], strides = [1, 1]} : vector<64x48xf32> to vector<32x48xf32>
    %805 = arith.truncf %803 : vector<32x16xf32> to vector<32x16xbf16>
    %cst_152 = arith.constant dense<0.000000e+00> : vector<32x48xf32>
    %806 = tpu.matmul %805, %799, %cst_152 {dimension_numbers = #tpu.dot_dimension_numbers<[1], [0], [0], [1], [0, 0, 1, 1], [], []>} : vector<32x16xbf16>, vector<16x48xbf16>, vector<32x48xf32> -> vector<32x48xf32>
    %807 = vector.extract_strided_slice %804 {offsets = [0, 0], sizes = [32, 16], strides = [1, 1]} : vector<32x48xf32> to vector<32x16xf32>
    %808 = vector.extract_strided_slice %806 {offsets = [0, 0], sizes = [32, 16], strides = [1, 1]} : vector<32x48xf32> to vector<32x16xf32>
    %809 = arith.addf %807, %808 : vector<32x16xf32>
    %810 = arith.negf %809 : vector<32x16xf32>
    %811 = math.exp %810 : vector<32x16xf32>
    %cst_153 = arith.constant 1.000000e+00 : f32
    %812 = vector.broadcast %cst_153 : f32 to vector<32x16xf32>
    %813 = arith.addf %812, %811 : vector<32x16xf32>
    %814 = arith.divf %812, %813 : vector<32x16xf32>
    %815 = vector.extract_strided_slice %804 {offsets = [0, 16], sizes = [32, 16], strides = [1, 1]} : vector<32x48xf32> to vector<32x16xf32>
    %816 = vector.extract_strided_slice %806 {offsets = [0, 16], sizes = [32, 16], strides = [1, 1]} : vector<32x48xf32> to vector<32x16xf32>
    %817 = arith.addf %815, %816 : vector<32x16xf32>
    %818 = arith.negf %817 : vector<32x16xf32>
    %819 = math.exp %818 : vector<32x16xf32>
    %cst_154 = arith.constant 1.000000e+00 : f32
    %820 = vector.broadcast %cst_154 : f32 to vector<32x16xf32>
    %821 = arith.addf %820, %819 : vector<32x16xf32>
    %822 = arith.divf %820, %821 : vector<32x16xf32>
    %823 = vector.extract_strided_slice %804 {offsets = [0, 32], sizes = [32, 16], strides = [1, 1]} : vector<32x48xf32> to vector<32x16xf32>
    %824 = vector.extract_strided_slice %806 {offsets = [0, 32], sizes = [32, 16], strides = [1, 1]} : vector<32x48xf32> to vector<32x16xf32>
    %825 = arith.addf %824, %802 : vector<32x16xf32>
    %826 = arith.mulf %814, %825 : vector<32x16xf32>
    %827 = arith.addf %823, %826 : vector<32x16xf32>
    %828 = math.tanh %827 : vector<32x16xf32>
    %cst_155 = arith.constant 1.000000e+00 : f32
    %829 = vector.broadcast %cst_155 : f32 to vector<32x16xf32>
    %830 = arith.subf %829, %822 : vector<32x16xf32>
    %831 = arith.mulf %830, %828 : vector<32x16xf32>
    %832 = arith.mulf %822, %803 : vector<32x16xf32>
    %833 = arith.addf %831, %832 : vector<32x16xf32>
    %c0_156 = arith.constant 0 : index
    %c0_157 = arith.constant 0 : index
    %834 = vector.load %arg13[%c0_156, %c0_157] : memref<64x16xf32, #tpu.memory_space<vmem>>, vector<32x16xf32>
    tpu.vector_store %arg13[%c0_156, %c0_157], %833 {strides = array<i32>} : memref<64x16xf32, #tpu.memory_space<vmem>>, vector<32x16xf32>,
    %835 = vector.extract_strided_slice %798 {offsets = [32, 0], sizes = [32, 48], strides = [1, 1]} : vector<64x48xf32> to vector<32x48xf32>
    %836 = arith.truncf %833 : vector<32x16xf32> to vector<32x16xbf16>
    %cst_158 = arith.constant dense<0.000000e+00> : vector<32x48xf32>
    %837 = tpu.matmul %836, %799, %cst_158 {dimension_numbers = #tpu.dot_dimension_numbers<[1], [0], [0], [1], [0, 0, 1, 1], [], []>} : vector<32x16xbf16>, vector<16x48xbf16>, vector<32x48xf32> -> vector<32x48xf32>
    %838 = vector.extract_strided_slice %835 {offsets = [0, 0], sizes = [32, 16], strides = [1, 1]} : vector<32x48xf32> to vector<32x16xf32>
    %839 = vector.extract_strided_slice %837 {offsets = [0, 0], sizes = [32, 16], strides = [1, 1]} : vector<32x48xf32> to vector<32x16xf32>
    %840 = arith.addf %838, %839 : vector<32x16xf32>
    %841 = arith.negf %840 : vector<32x16xf32>
    %842 = math.exp %841 : vector<32x16xf32>
    %cst_159 = arith.constant 1.000000e+00 : f32
    %843 = vector.broadcast %cst_159 : f32 to vector<32x16xf32>
    %844 = arith.addf %843, %842 : vector<32x16xf32>
    %845 = arith.divf %843, %844 : vector<32x16xf32>
    %846 = vector.extract_strided_slice %835 {offsets = [0, 16], sizes = [32, 16], strides = [1, 1]} : vector<32x48xf32> to vector<32x16xf32>
    %847 = vector.extract_strided_slice %837 {offsets = [0, 16], sizes = [32, 16], strides = [1, 1]} : vector<32x48xf32> to vector<32x16xf32>
    %848 = arith.addf %846, %847 : vector<32x16xf32>
    %849 = arith.negf %848 : vector<32x16xf32>
    %850 = math.exp %849 : vector<32x16xf32>
    %cst_160 = arith.constant 1.000000e+00 : f32
    %851 = vector.broadcast %cst_160 : f32 to vector<32x16xf32>
    %852 = arith.addf %851, %850 : vector<32x16xf32>
    %853 = arith.divf %851, %852 : vector<32x16xf32>
    %854 = vector.extract_strided_slice %835 {offsets = [0, 32], sizes = [32, 16], strides = [1, 1]} : vector<32x48xf32> to vector<32x16xf32>
    %855 = vector.extract_strided_slice %837 {offsets = [0, 32], sizes = [32, 16], strides = [1, 1]} : vector<32x48xf32> to vector<32x16xf32>
    %856 = arith.addf %855, %802 : vector<32x16xf32>
    %857 = arith.mulf %845, %856 : vector<32x16xf32>
    %858 = arith.addf %854, %857 : vector<32x16xf32>
    %859 = math.tanh %858 : vector<32x16xf32>
    %cst_161 = arith.constant 1.000000e+00 : f32
    %860 = vector.broadcast %cst_161 : f32 to vector<32x16xf32>
    %861 = arith.subf %860, %853 : vector<32x16xf32>
    %862 = arith.mulf %861, %859 : vector<32x16xf32>
    %863 = arith.mulf %853, %833 : vector<32x16xf32>
    %864 = arith.addf %862, %863 : vector<32x16xf32>
    %865 = vector.extract_strided_slice %864 {offsets = [6, 0], sizes = [2, 16], strides = [1, 1]} : vector<32x16xf32> to vector<2x16xf32>
    %c32_162 = arith.constant 32 : index
    %c0_163 = arith.constant 0 : index
    %866 = vector.load %arg13[%c32_162, %c0_163] : memref<64x16xf32, #tpu.memory_space<vmem>>, vector<32x16xf32>
    tpu.vector_store %arg13[%c32_162, %c0_163], %864 {strides = array<i32>} : memref<64x16xf32, #tpu.memory_space<vmem>>, vector<32x16xf32>,
    %c0_164 = arith.constant 0 : index
    %c0_165 = arith.constant 0 : index
    %867 = vector.load %arg14[%c0_164, %c0_165] : memref<2x32xf32, #tpu.memory_space<vmem>>, vector<2x32xf32>
    tpu.vector_store %arg14[%c0_164, %c0_165], %621 {strides = array<i32>} : memref<2x32xf32, #tpu.memory_space<vmem>>, vector<2x32xf32>,
    %c0_166 = arith.constant 0 : index
    %c0_167 = arith.constant 0 : index
    %868 = vector.load %arg15[%c0_166, %c0_167] : memref<2x24xf32, #tpu.memory_space<vmem>>, vector<2x24xf32>
    tpu.vector_store %arg15[%c0_166, %c0_167], %790 {strides = array<i32>} : memref<2x24xf32, #tpu.memory_space<vmem>>, vector<2x24xf32>,
    %c0_168 = arith.constant 0 : index
    %c0_169 = arith.constant 0 : index
    %869 = vector.load %arg16[%c0_168, %c0_169] : memref<2x16xf32, #tpu.memory_space<vmem>>, vector<2x16xf32>
    tpu.vector_store %arg16[%c0_168, %c0_169], %865 {strides = array<i32>} : memref<2x16xf32, #tpu.memory_space<vmem>>, vector<2x16xf32>,
    return
  }
}

</mosaic_0001>

<bundles_post_ra>
// kernel: encoder_forward.1
= control target key start
LH: loop header
LB: loop body
LE: loop exit
PB: predicated region body
PF: predicated region fallthrough
CT: control target
= control target key end

     0   :  { %s4560_s0 = inlined_call_operand.vmem [shape: f32[40,10], index: 0, kind: input, shape index: {}]   ;;  %s4561_s1 = inlined_call_operand.vmem [shape: bf16[10,96], index: 1, kind: input, shape index: {}]   ;;  %s4562_s2 = inlined_call_operand.vmem [shape: bf16[32,96], index: 2, kind: input, shape index: {}]   ;;  %s4563_s3 = inlined_call_operand.vmem [shape: f32[1,96], index: 3, kind: input, shape index: {}]   ;;  %s4564_s4 = inlined_call_operand.hbm [shape: f32[1,32], index: 4, kind: input, shape index: {}]   ;;  %s4565_s5 = inlined_call_operand.vmem [shape: bf16[32,72], index: 5, kind: input, shape index: {}]   ;;  %s4566_s6 = inlined_call_operand.vmem [shape: bf16[24,72], index: 6, kind: input, shape index: {}]   ;;  %s4567_s7 = inlined_call_operand.hbm [shape: f32[1,72], index: 7, kind: input, shape index: {}]   ;;  %s4568_s8 = inlined_call_operand.hbm [shape: f32[1,24], index: 8, kind: input, shape index: {}]   ;;  %s4569_s9 = inlined_call_operand.vmem [shape: bf16[24,48], index: 9, kind: input, shape index: {}]   ;;  %s4570_s10 = inlined_call_operand.hbm [shape: bf16[16,48], index: 10, kind: input, shape index: {}]   ;;  %s4571_s11 = inlined_call_operand.hbm [shape: f32[1,48], index: 11, kind: input, shape index: {}]   ;;  %s4572_s12 = inlined_call_operand.hbm [shape: f32[1,16], index: 12, kind: input, shape index: {}]   ;;  %s4573_s13 = inlined_call_operand.vmem [shape: f32[64,16], index: 13, kind: output, shape index: {0}]   ;;  %s4574_s14 = inlined_call_operand.vmem [shape: f32[2,32], index: 14, kind: output, shape index: {1}]   ;;  %s4575_s15 = inlined_call_operand.vmem [shape: f32[2,24], index: 15, kind: output, shape index: {2}]   ;;  %s4576_s16 = inlined_call_operand.vmem [shape: f32[2,16], index: 16, kind: output, shape index: {3}]  }
   0x1   :  { %4578 = sst [smem:[#allocation18_spill]] %s4560_s0 }
   0x2   :  { %22 = vsyncpa [#allocation5], 0 }
   0x3   :  { %23 = vsyncpa [#allocation7], 0 }
   0x4   :  { %24 = vsyncpa [#allocation10], 0 }
   0x5   :  { %25 = vsyncpa [#allocation13], 0  ;;  %s3723_s21 = smov [#allocation6]   ;;  %s3724_s23 = smov [#allocation9]  }
   0x6   :  { %s54_s22 = sshll.u32 %s3723_s21, 4  ;;  %s75_s24 = sshll.u32 %s3724_s23, 4  ;;  %s55_s22 = int_to_ptr.vmem [resolvable:$true] %s54_s22  ;;  %s76_s24 = int_to_ptr.vmem [resolvable:$true] %s75_s24 }
   0x7   :  { %s3603_s25 = scalar_lea.vmem %s55_s22, 16  ;;  %s3607_s26 = scalar_lea.vmem %s55_s22, 32 }
   0x8   :  { %p3604_p0 = scmp.ne.s32.totalorder %s55_s22, %s3603_s25  ;;  %p3608_p1 = scmp.lt.s32.totalorder %s55_s22, %s55_s22 }
   0x9   :  { %p3609_p2 = scmp.lt.s32.totalorder %s3607_s26, %s3603_s25 }
   0xb   :  { %p3610_p3 = por %p3609_p2, %p3608_p1 }
   0xd   :  { %p3611_p4 = pnand %p3610_p3, %p3604_p0 }
   0xf   :  { %3614 = shalt.err (!%p3611_p4)
}
  0x10   :  { %57 = dma.hbm_to_vmem [thread:$0]  %s4567_s7, 16, %s55_s22, [#allocation7]  }
  0x11   :  { %s3623_s29 = scalar_lea.vmem %s76_s24, 128  ;;  %p3628_p6 = scmp.lt.s32.totalorder %s76_s24, %s76_s24 }
  0x12   :  { %p3624_p5 = scmp.ne.s32.totalorder %s76_s24, %s3623_s29  ;;  %p3629_p7 = scmp.lt.s32.totalorder %s3623_s29, %s3623_s29 }
  0x14   :  { %p3630_p8 = por %p3629_p7, %p3628_p6 }
  0x16   :  { %p3631_p9 = pnand %p3630_p8, %p3624_p5 }
  0x18   :  { %3634 = shalt.err (!%p3631_p9)
}
  0x19   :  { %s3725_s30 = smov 64   ;;  %s3726_s0 = smov 4  }
  0x1a   :  { %81 = dma.hbm_to_vmem [thread:$0]  %s4570_s10, 128, %s76_s24, [#allocation10], %s3725_s30, %s3725_s30, %s3726_s0  }
  0x1b   :  { %s3727_s19 = smov [#allocation4]   ;;  %s3728_s21 = smov [#allocation8]  }
  0x1c   :  { %s40_s20 = sshll.u32 %s3727_s19, 4  ;;  %s64_s23 = sshll.u32 %s3728_s21, 4  ;;  %s41_s20 = int_to_ptr.vmem [resolvable:$true] %s40_s20  ;;  %s65_s23 = int_to_ptr.vmem [resolvable:$true] %s64_s23 }
  0x1d   :  { %s3643_s7 = scalar_lea.vmem %s41_s20, 16  ;;  %s3647_s22 = scalar_lea.vmem %s41_s20, 32 }
  0x1e   :  { %p3644_p10 = scmp.ne.s32.totalorder %s41_s20, %s3643_s7  ;;  %p3648_p11 = scmp.lt.s32.totalorder %s41_s20, %s41_s20 }
  0x1f   :  { %p3649_p12 = scmp.lt.s32.totalorder %s3647_s22, %s3643_s7 }
  0x21   :  { %p3650_p13 = por %p3649_p12, %p3648_p11 }
  0x23   :  { %p3651_p0 = pnand %p3650_p13, %p3644_p10 }
  0x25   :  { %3654 = shalt.err (!%p3651_p0)
}
  0x26   :  { %43 = dma.hbm_to_vmem [thread:$0]  %s4564_s4, 16, %s41_s20, [#allocation5]  }
  0x27   :  { %s3663_s27 = scalar_lea.vmem %s65_s23, 16  ;;  %s3667_s10 = scalar_lea.vmem %s65_s23, 32 }
  0x28   :  { %p3664_p1 = scmp.ne.s32.totalorder %s65_s23, %s3663_s27  ;;  %p3668_p2 = scmp.lt.s32.totalorder %s65_s23, %s65_s23 }
  0x29   :  { %p3669_p3 = scmp.lt.s32.totalorder %s3667_s10, %s3663_s27 }
  0x2b   :  { %p3670_p4 = por %p3669_p3, %p3668_p2 }
  0x2d   :  { %p3671_p5 = pnand %p3670_p4, %p3664_p1 }
  0x2f   :  { %3674 = shalt.err (!%p3671_p5)
}
  0x30   :  { %67 = dma.hbm_to_vmem [thread:$0]  %s4568_s8, 16, %s65_s23, [#allocation7]  }
  0x31   :  { %s3729_s29 = smov [#allocation11]   ;;  %s3730_s17 = smov [#allocation12]  }
  0x32   :  { %s88_s0 = sshll.u32 %s3729_s29, 4  ;;  %s98_s18 = sshll.u32 %s3730_s17, 4  ;;  %s89_s0 = int_to_ptr.vmem [resolvable:$true] %s88_s0  ;;  %s99_s18 = int_to_ptr.vmem [resolvable:$true] %s98_s18 }
  0x33   :  { %s3683_s19 = scalar_lea.vmem %s89_s0, 16  ;;  %s3687_s4 = scalar_lea.vmem %s89_s0, 32 }
  0x34   :  { %p3684_p6 = scmp.ne.s32.totalorder %s89_s0, %s3683_s19  ;;  %p3688_p7 = scmp.lt.s32.totalorder %s89_s0, %s89_s0 }
  0x35   :  { %p3689_p8 = scmp.lt.s32.totalorder %s3687_s4, %s3683_s19 }
  0x37   :  { %p3690_p9 = por %p3689_p8, %p3688_p7 }
  0x39   :  { %p3691_p10 = pnand %p3690_p9, %p3684_p6 }
  0x3b   :  { %3694 = shalt.err (!%p3691_p10)
}
  0x3c   :  { %91 = dma.hbm_to_vmem [thread:$0]  %s4571_s11, 16, %s89_s0, [#allocation10]  }
  0x3d   :  { %s3703_s7 = scalar_lea.vmem %s99_s18, 16  ;;  %s3707_s8 = scalar_lea.vmem %s99_s18, 32 }
  0x3e   :  { %p3704_p11 = scmp.ne.s32.totalorder %s99_s18, %s3703_s7  ;;  %p3708_p12 = scmp.lt.s32.totalorder %s99_s18, %s99_s18 }
  0x3f   :  { %p3709_p13 = scmp.lt.s32.totalorder %s3707_s8, %s3703_s7 }
  0x41   :  { %p3710_p0 = por %p3709_p13, %p3708_p12 }
  0x43   :  { %p3711_p1 = pnand %p3710_p0, %p3704_p11 }
  0x45   :  { %3714 = shalt.err (!%p3711_p1)
}
  0x46   :  { %101 = dma.hbm_to_vmem [thread:$0]  %s4572_s12, 16, %s99_s18, [#allocation13]  }
  0x47   :  { %3715 = dma.done.wait [#allocation5], 16  }
  0x48   :  { %3716 = vsyncadd [#allocation5], 4294967280 }
  0x49   :  { %3717 = dma.done.wait [#allocation7], 32  }
  0x4a   :  { %3718 = vsyncadd [#allocation7], 4294967264 }
  0x4b   :  { %3719 = dma.done.wait [#allocation10], 144  }
  0x4c   :  { %3720 = vsyncadd [#allocation10], 4294967152 }
  0x4d   :  { %3721 = dma.done.wait [#allocation13], 16  }
  0x4e   :  { %3722 = vsyncadd [#allocation13], 4294967280  ;;  %v3731_v0 = vmov 0.0   ;;  %vm3732_vm0 = vmmov 0   ;;  %v3854_v1 = vld [vmem:[%s4562_s2 + $0x8] sm:$0xff]   ;;  %vm157_vm1 = vcmask 1044480  }
  0x4f   :  { %3126 = vmatprep.subr.bf16.mxu1 %v3731_v0  ;;  %3112 = vmatprep.subr.bf16.mxu0 %v3731_v0  ;;  %v3385_v2 = vld [vmem:[%s4561_s1] sm:$0x1f]   ;;  %s4579_s29 = sld [smem:[#allocation18_spill]]  ;;  %v2937_v7 = vld [vmem:[#allocation4] ss:$0 sm:$0xff]  ;;  %vm147_vm2 = vcmask 80896  }
  0x50   :  { %3114 = vmatprep.mubr.msk.bf16.mxu0 %vm3732_vm0, %v3731_v0  ;;  %3130 = vmatprep.mubr.msk.bf16.mxu1 %vm3732_vm0, %v3731_v0  ;;  %v3863_v3 = vld [vmem:[%s4562_s2] sm:$0xff]   ;;  %v159_v4 = vsel %vm157_vm1, %v3385_v2, 0  ;;  %v3733_v9 = vmov 0   ;;  %s3734_s19 = smov 96   ;;  %vm239_vm3 = vcmask 261120   ;;  %vm558_vm4 = vcmask 1041408  }
  0x51   :  { %3127 = vmatpush3.bf16.msra.mxu1 %v3854_v1  ;;  %3113 = vmatpush3.bf16.msra.mxu0 %v159_v4  ;;  %v3899_v20 = vld [vmem:[%s4563_s3] ss:$0 sm:$0xff]  ;;  %vm560_vm5 = vcmask 1043456   ;;  %vm562_vm6 = vcmask 1045504   ;;  %s3737_s1 = smov 104   ;;  %vm121_vm7 = vcmask 195584  }
  0x52   :  { %3128 = vmatprep.subr.bf16.mxu1 %v3731_v0  ;;  %290 = vrot.lane.b32.xlu0 %v2937_v7, %s3725_s30  ;;  %122 = vst.msk [vmem:[#allocation3 + $0x28] sm:$0xff] %vm121_vm7, %v3731_v0  ;;  %123 = vst.msk [vmem:[#allocation3 + $0x30] sm:$0xff] %vm121_vm7, %v3731_v0  ;;  %s3739_s21 = smov 112   ;;  %vm2528_vm8 = vcmask 130048   ;;  %vm2908_vm9 = vcmask 195590   ;;  %vm2910_vm10 = vcmask 130054  }
  0x53   :  { %3150 = vmatprep.subr.bf16.mxu0 %v3731_v0  ;;  %124 = vst.msk [vmem:[#allocation3 + $0x38] sm:$0xff] %vm121_vm7, %v3731_v0  ;;  %vm2906_vm11 = vcmask 261126  }
  0x55   :  { %v125_v5 = vld [vmem:[%s4579_s29] sm:$0xff]  ;;  %v126_v6 = vld [vmem:[%s4579_s29 + $0x8] sm:$0xff]  ;;  %3129 = vmatpush3.bf16.msra.mxu1 %v3863_v3 }
  0x56   :  { %v130_v8 = vpack.c.bf16 %v126_v6, %v125_v5  ;;  %3134 = vmatprep.subr.bf16.mxu1 %v3731_v0 }
  0x58   :  { %3115 = vmatmul.mubr.msk.bf16.vlgmr.msra.gmra.mxu0 %vm147_vm2, %v130_v8  ;;  %3131 = vmatmul.mubr.bf16.vlgmr.msra.gmra.mxu1 %v3733_v9 }
  0x59   :  { %3151 = vmatpush3.bf16.msra.mxu0 %v3854_v1  ;;  %3118 = vmatprep.mubr.msk.bf16.mxu0 %vm3732_vm0, %v3731_v0 }
  0x5a   :  { %3152 = vmatprep.subr.bf16.mxu0 %v3731_v0  ;;  %3135 = vmatpush3.bf16.msra.mxu1 %v3854_v1 }
  0x5b   :  { %3138 = vmatprep.mubr.msk.bf16.mxu1 %vm3732_vm0, %v3731_v0  ;;  %3136 = vmatprep.subr.bf16.mxu1 %v3731_v0 }
  0x5d   :  { %3153 = vmatpush3.bf16.msra.mxu0 %v3863_v3 }
  0x5e   :  { %3166 = vmatprep.subr.bf16.mxu0 %v3731_v0  ;;  %3137 = vmatpush3.bf16.msra.mxu1 %v3863_v3 }
  0x5f   :  { %3142 = vmatprep.subr.bf16.mxu1 %v3731_v0 }
  0xc4   :  { %v3890_v11 = vpop.permute.xlu0 %290 }
 0x118   :  { %v195_v10 = vpop.f32.mrf.mxu0  ;;  %v277_v12 = vpop.f32.mrf.mxu1 }
 0x119   :  { %v293_v14 = vadd.f32 %v3890_v11, %v277_v12  ;;  %v3902_v21 = vadd.f32 %v3899_v20, %v195_v10 }
 0x11a   :  { %v3116_v13 = vpop.f32.mrf.mxu0  ;;  %v3132_v15 = vpop.f32.mrf.mxu1 }
 0x11b   :  { %295 = vrot.lane.b32.xlu0 %v293_v14, %s3725_s30  ;;  %v283_v22 = vadd.f32 %v277_v12, %v3902_v21 }
 0x11c   :  { %v3893_v16 = vpop.f32.mrf.mxu0  ;;  %v280_v17 = vpop.f32.mrf.mxu1 }
 0x11d   :  { %v2940_v23 = vmul.f32 -1.442695, %v283_v22 }
 0x11e   :  { %v3117_v18 = vpop.f32.mrf.mxu0  ;;  %v3133_v19 = vpop.f32.mrf.mxu1 }
 0x11f   :  { %3394 = vpow2.f32 %v2940_v23 }
 0x12c   :  { %v3395_v24 = vpop.eup %3394 }
 0x12d   :  { %v287_v25 = vadd.f32 1.0, %v3395_v24 }
 0x12f   :  { %3396 = vrcp.f32 %v287_v25  ;;  %v127_v25 = vld [vmem:[%s4579_s29 + $0x10] sm:$0xff] }
 0x13c   :  { %v3397_v26 = vpop.eup %3396 }
 0x13d   :  { %v305_v32 = vsub.f32 1.0, %v3397_v26  ;;  %v311_v34 = vmul.f32 0.0, %v3397_v26 }
 0x18d   :  { %v296_v27 = vpop.permute.xlu0 %295 }
 0x18e   :  { %v298_v28 = vmul.f32 %v3397_v26, %v296_v27  ;;  %v128_v26 = vld [vmem:[%s4579_s29 + $0x18] sm:$0xff] }
 0x18f   :  { %v131_v27 = vpack.c.bf16 %v128_v26, %v127_v25  ;;  %v3994_v25 = vadd.f32 %v3899_v20, %v3893_v16 }
 0x190   :  { %300 = vrot.lane.b32.xlu1 %v298_v28, %s3725_s30 }
 0x191   :  { %3119 = vmatmul.mubr.msk.bf16.gmra.mxu0 %vm147_vm2, %v131_v27 }
 0x192   :  { %3122 = vmatprep.mubr.msk.bf16.mxu0 %vm3732_vm0, %v3731_v0 }
 0x202   :  { %v301_v29 = vpop.permute.xlu1 %300 }
 0x203   :  { %v303_v30 = vadd.f32 %v301_v29, %v3902_v21  ;;  %v129_v29 = vld [vmem:[%s4579_s29 + $0x20] sm:$0xff] }
 0x205   :  { %3398 = vtanh.f32 %v303_v30  ;;  %v132_v30 = vpack.c.bf16 %v129_v29, %v129_v29 }
 0x207   :  { %3123 = vmatmul.mubr.msk.bf16.gmra.mxu0 %vm147_vm2, %v132_v30 }
 0x208   :  { %3154 = vmatprep.mubr.msk.bf16.mxu0 %vm3732_vm0, %v3731_v0 }
 0x212   :  { %v3399_v31 = vpop.eup %3398 }
 0x213   :  { %307 = vrot.lane.b32.xlu1 %v3399_v31, %s3734_s19 }
 0x285   :  { %v308_v33 = vpop.permute.xlu1 %307 }
 0x286   :  { %v310_v35 = vmul.f32 %v308_v33, %v305_v32 }
 0x288   :  { %v3908_v36 = vadd.f32 %v311_v34, %v310_v35 }
 0x28a   :  { %v313_v37 = vpack.c.bf16 %v3908_v36, %v3908_v36  ;;  %v390_v57 = vrot.slane %v3908_v36, 6 }
 0x28c   :  { %315 = vrot.lane.b32.xlu0 %v313_v37, %s3734_s19 }
 0x2fe   :  { %v316_v38 = vpop.permute.xlu0 %315 }
 0x2ff   :  { %3139 = vmatmul.mubr.msk.bf16.vlgmr.msra.gmra.mxu1 %vm239_vm3, %v316_v38 }
 0x300   :  { %3143 = vmatpush3.bf16.msra.mxu1 %v3854_v1  ;;  %3146 = vmatprep.mubr.msk.bf16.mxu1 %vm3732_vm0, %v3731_v0 }
 0x301   :  { %3144 = vmatprep.subr.bf16.mxu1 %v3731_v0 }
 0x304   :  { %3145 = vmatpush3.bf16.msra.mxu1 %v3863_v3 }
 0x305   :  { %3158 = vmatprep.subr.bf16.mxu1 %v3731_v0 }
 0x3bf   :  { %v354_v39 = vpop.f32.mrf.mxu1 }
 0x3c0   :  { %v370_v40 = vadd.f32 %v354_v39, %v3890_v11  ;;  %v361_v45 = vrot.slane %v354_v39, 6 }
 0x3c1   :  { %v3140_v41 = vpop.f32.mrf.mxu1 }
 0x3c2   :  { %v372_v42 = vrot.slane %v370_v40, 6  ;;  %v363_v46 = vadd.f32 %v361_v45, %v3902_v21 }
 0x3c3   :  { %v357_v43 = vpop.f32.mrf.mxu1 }
 0x3c4   :  { %373 = vrot.lane.b32.xlu1 %v372_v42, %s3725_s30  ;;  %v2942_v47 = vmul.f32 -1.442695, %v363_v46  ;;  %v3960_v42 = vpop.f32.mrf.mxu0 }
 0x3c5   :  { %v3141_v44 = vpop.f32.mrf.mxu1 }
 0x3c6   :  { %3400 = vpow2.f32 %v2942_v47  ;;  %v3120_v43 = vpop.f32.mrf.mxu0 }
 0x3c8   :  { %v3962_v44 = vpop.f32.mrf.mxu0 }
 0x3ca   :  { %v3121_v45 = vpop.f32.mrf.mxu0 }
 0x3cc   :  { %v3964_v46 = vpop.f32.mrf.mxu0 }
 0x3ce   :  { %v3124_v47 = vpop.f32.mrf.mxu0 }
 0x3d3   :  { %v3401_v48 = vpop.eup %3400 }
 0x3d4   :  { %v367_v49 = vadd.f32 1.0, %v3401_v48  ;;  %v214_v48 = vpop.f32.mrf.mxu0 }
 0x3d6   :  { %3402 = vrcp.f32 %v367_v49  ;;  %v3125_v49 = vpop.f32.mrf.mxu0 }
 0x3e3   :  { %v3403_v50 = vpop.eup %3402 }
 0x3e4   :  { %v383_v56 = vsub.f32 1.0, %v3403_v50  ;;  %v392_v59 = vmul.f32 %v3403_v50, %v390_v57 }
 0x436   :  { %v374_v51 = vpop.permute.xlu1 %373 }
 0x437   :  { %v376_v52 = vmul.f32 %v3403_v50, %v374_v51 }
 0x439   :  { %378 = vrot.lane.b32.xlu0 %v376_v52, %s3725_s30 }
 0x4ab   :  { %v379_v53 = vpop.permute.xlu0 %378 }
 0x4ac   :  { %v381_v54 = vadd.f32 %v379_v53, %v3902_v21 }
 0x4ae   :  { %3404 = vtanh.f32 %v381_v54 }
 0x4bb   :  { %v3405_v55 = vpop.eup %3404 }
 0x4bc   :  { %385 = vrot.lane.b32.xlu1 %v3405_v55, %s3734_s19 }
 0x52e   :  { %v386_v58 = vpop.permute.xlu1 %385 }
 0x52f   :  { %v388_v60 = vmul.f32 %v386_v58, %v383_v56 }
 0x531   :  { %v393_v61 = vadd.f32 %v392_v59, %v388_v60 }
 0x533   :  { %v394_v62 = vpack.c.bf16 %v393_v61, %v393_v61  ;;  %v472_v32 = vrot.slane %v393_v61, 6  ;;  %v559_v38 = vsel %vm558_vm4, %v3908_v36, %v393_v61 }
 0x535   :  { %v396_v63 = vrot.slane %v394_v62, 1 }
 0x537   :  { %397 = vrot.lane.b32.xlu0 %v396_v63, %s3734_s19 }
 0x5a9   :  { %v398_v2 = vpop.permute.xlu0 %397 }
 0x5aa   :  { %3147 = vmatmul.mubr.msk.bf16.vlgmr.msra.gmra.mxu1 %vm239_vm3, %v398_v2 }
 0x5ab   :  { %3159 = vmatpush3.bf16.msra.mxu1 %v3854_v1  ;;  %3162 = vmatprep.mubr.msk.bf16.mxu1 %vm3732_vm0, %v3731_v0 }
 0x5ac   :  { %3160 = vmatprep.subr.bf16.mxu1 %v3731_v0 }
 0x5af   :  { %3161 = vmatpush3.bf16.msra.mxu1 %v3863_v3 }
 0x5b0   :  { %3174 = vmatprep.subr.bf16.mxu1 %v3731_v0 }
 0x66a   :  { %v436_v4 = vpop.f32.mrf.mxu1 }
 0x66b   :  { %v452_v5 = vadd.f32 %v436_v4, %v3890_v11  ;;  %v443_v12 = vrot.slane %v436_v4, 4 }
 0x66c   :  { %v3148_v6 = vpop.f32.mrf.mxu1 }
 0x66d   :  { %v454_v7 = vrot.slane %v452_v5, 4  ;;  %v445_v13 = vadd.f32 %v443_v12, %v3902_v21 }
 0x66e   :  { %v439_v8 = vpop.f32.mrf.mxu1 }
 0x66f   :  { %455 = vrot.lane.b32.xlu1 %v454_v7, %s3725_s30  ;;  %v2944_v14 = vmul.f32 -1.442695, %v445_v13 }
 0x670   :  { %v3149_v10 = vpop.f32.mrf.mxu1 }
 0x671   :  { %3406 = vpow2.f32 %v2944_v14 }
 0x67e   :  { %v3407_v15 = vpop.eup %3406 }
 0x67f   :  { %v449_v17 = vadd.f32 1.0, %v3407_v15 }
 0x681   :  { %3408 = vrcp.f32 %v449_v17 }
 0x68e   :  { %v3409_v18 = vpop.eup %3408 }
 0x68f   :  { %v465_v31 = vsub.f32 1.0, %v3409_v18  ;;  %v474_v34 = vmul.f32 %v3409_v18, %v472_v32 }
 0x6e1   :  { %v456_v19 = vpop.permute.xlu1 %455 }
 0x6e2   :  { %v458_v22 = vmul.f32 %v3409_v18, %v456_v19 }
 0x6e4   :  { %460 = vrot.lane.b32.xlu0 %v458_v22, %s3725_s30 }
 0x756   :  { %v461_v23 = vpop.permute.xlu0 %460 }
 0x757   :  { %v463_v24 = vadd.f32 %v461_v23, %v3902_v21 }
 0x759   :  { %3410 = vtanh.f32 %v463_v24 }
 0x766   :  { %v3411_v28 = vpop.eup %3410 }
 0x767   :  { %467 = vrot.lane.b32.xlu1 %v3411_v28, %s3734_s19 }
 0x7d9   :  { %v468_v33 = vpop.permute.xlu1 %467 }
 0x7da   :  { %v470_v35 = vmul.f32 %v468_v33, %v465_v31 }
 0x7dc   :  { %v475_v37 = vadd.f32 %v474_v34, %v470_v35 }
 0x7de   :  { %v476_v39 = vpack.c.bf16 %v475_v37, %v475_v37  ;;  %v561_v40 = vsel %vm560_vm5, %v559_v38, %v475_v37  ;;  %v554_v7 = vrot.slane %v475_v37, 6 }
 0x7e0   :  { %v478_v41 = vrot.slane %v476_v39, 2 }
 0x7e2   :  { %479 = vrot.lane.b32.xlu0 %v478_v41, %s3734_s19 }
 0x854   :  { %v480_v50 = vpop.permute.xlu0 %479 }
 0x855   :  { %3155 = vmatmul.mubr.msk.bf16.vlgmr.msra.gmra.mxu0 %vm239_vm3, %v480_v50 }
 0x856   :  { %3167 = vmatpush3.bf16.msra.mxu0 %v3854_v1  ;;  %3170 = vmatprep.mubr.msk.bf16.mxu0 %vm3732_vm0, %v3731_v0 }
 0x857   :  { %3168 = vmatprep.subr.bf16.mxu0 %v3731_v0 }
 0x85a   :  { %3169 = vmatpush3.bf16.msra.mxu0 %v3863_v3 }
 0x85b   :  { %3182 = vmatprep.subr.bf16.mxu0 %v3731_v0 }
 0x915   :  { %v518_v36 = vpop.f32.mrf.mxu0 }
 0x916   :  { %v534_v51 = vadd.f32 %v518_v36, %v3890_v11  ;;  %v525_v56 = vrot.slane %v518_v36, 2 }
 0x917   :  { %v3156_v52 = vpop.f32.mrf.mxu0 }
 0x918   :  { %v536_v53 = vrot.slane %v534_v51, 2  ;;  %v527_v57 = vadd.f32 %v525_v56, %v3902_v21 }
 0x919   :  { %v521_v54 = vpop.f32.mrf.mxu0 }
 0x91a   :  { %537 = vrot.lane.b32.xlu1 %v536_v53, %s3725_s30  ;;  %v2946_v58 = vmul.f32 -1.442695, %v527_v57 }
 0x91b   :  { %v3157_v55 = vpop.f32.mrf.mxu0 }
 0x91c   :  { %3412 = vpow2.f32 %v2946_v58 }
 0x929   :  { %v3413_v59 = vpop.eup %3412 }
 0x92a   :  { %v531_v60 = vadd.f32 1.0, %v3413_v59 }
 0x92c   :  { %3414 = vrcp.f32 %v531_v60 }
 0x939   :  { %v3415_v61 = vpop.eup %3414 }
 0x93a   :  { %v547_v6 = vsub.f32 1.0, %v3415_v61  ;;  %v556_v10 = vmul.f32 %v3415_v61, %v554_v7 }
 0x98c   :  { %v538_v62 = vpop.permute.xlu1 %537 }
 0x98d   :  { %v540_v63 = vmul.f32 %v3415_v61, %v538_v62 }
 0x98f   :  { %542 = vrot.lane.b32.xlu0 %v540_v63, %s3725_s30 }
 0xa01   :  { %v543_v2 = vpop.permute.xlu0 %542 }
 0xa02   :  { %v545_v4 = vadd.f32 %v543_v2, %v3902_v21 }
 0xa04   :  { %3416 = vtanh.f32 %v545_v4 }
 0xa11   :  { %v3417_v5 = vpop.eup %3416 }
 0xa12   :  { %549 = vrot.lane.b32.xlu1 %v3417_v5, %s3734_s19 }
 0xa84   :  { %v550_v8 = vpop.permute.xlu1 %549 }
 0xa85   :  { %v552_v12 = vmul.f32 %v550_v8, %v547_v6 }
 0xa87   :  { %v557_v13 = vadd.f32 %v556_v10, %v552_v12 }
 0xa89   :  { %v569_v14 = vpack.c.bf16 %v557_v13, %v557_v13  ;;  %v3980_v15 = vsel %vm562_vm6, %v561_v40, %v557_v13  ;;  %v643_v37 = vrot.slane %v557_v13, 6 }
 0xa8b   :  { %v571_v17 = vrot.slane %v569_v14, 3 }
 0xa8d   :  { %572 = vrot.lane.b32.xlu0 %v571_v17, %s3734_s19 }
 0xaff   :  { %v573_v18 = vpop.permute.xlu0 %572 }
 0xb00   :  { %3163 = vmatmul.mubr.msk.bf16.vlgmr.msra.gmra.mxu1 %vm239_vm3, %v573_v18 }
 0xb01   :  { %3175 = vmatpush3.bf16.msra.mxu1 %v3854_v1  ;;  %3178 = vmatprep.mubr.msk.bf16.mxu1 %vm3732_vm0, %v3731_v0 }
 0xb02   :  { %3176 = vmatprep.subr.bf16.mxu1 %v3731_v0 }
 0xb05   :  { %3177 = vmatpush3.bf16.msra.mxu1 %v3863_v3 }
 0xb06   :  { %3190 = vmatprep.subr.bf16.mxu1 %v3731_v0 }
 0xbc0   :  { %v611_v21 = vpop.f32.mrf.mxu1 }
 0xbc1   :  { %v624_v19 = vadd.f32 %v611_v21, %v3890_v11  ;;  %v617_v26 = vadd.f32 %v611_v21, %v3994_v25 }
 0xbc2   :  { %v3164_v22 = vpop.f32.mrf.mxu1 }
 0xbc3   :  { %626 = vrot.lane.b32.xlu1 %v624_v19, %s3725_s30  ;;  %v2948_v27 = vmul.f32 -1.442695, %v617_v26 }
 0xbc4   :  { %v614_v23 = vpop.f32.mrf.mxu1 }
 0xbc5   :  { %3418 = vpow2.f32 %v2948_v27 }
 0xbc6   :  { %v3165_v24 = vpop.f32.mrf.mxu1 }
 0xbd2   :  { %v3419_v28 = vpop.eup %3418 }
 0xbd3   :  { %v621_v29 = vadd.f32 1.0, %v3419_v28 }
 0xbd5   :  { %3420 = vrcp.f32 %v621_v29 }
 0xbe2   :  { %v3421_v30 = vpop.eup %3420 }
 0xbe3   :  { %v636_v16 = vsub.f32 1.0, %v3421_v30  ;;  %v645_v39 = vmul.f32 %v3421_v30, %v643_v37 }
 0xc35   :  { %v627_v31 = vpop.permute.xlu1 %626 }
 0xc36   :  { %v629_v32 = vmul.f32 %v3421_v30, %v627_v31 }
 0xc38   :  { %631 = vrot.lane.b32.xlu0 %v629_v32, %s3725_s30 }
 0xcaa   :  { %v632_v33 = vpop.permute.xlu0 %631 }
 0xcab   :  { %v634_v34 = vadd.f32 %v632_v33, %v3994_v25 }
 0xcad   :  { %3422 = vtanh.f32 %v634_v34 }
 0xcba   :  { %v3423_v35 = vpop.eup %3422 }
 0xcbb   :  { %638 = vrot.lane.b32.xlu1 %v3423_v35, %s3734_s19 }
 0xd2d   :  { %v639_v38 = vpop.permute.xlu1 %638 }
 0xd2e   :  { %v641_v40 = vmul.f32 %v639_v38, %v636_v16 }
 0xd30   :  { %v4000_v41 = vadd.f32 %v645_v39, %v641_v40 }
 0xd32   :  { %v647_v43 = vpack.c.bf16 %v4000_v41, %v4000_v41  ;;  %v724_v2 = vrot.slane %v4000_v41, 6 }
 0xd34   :  { %649 = vrot.lane.b32.xlu0 %v647_v43, %s3734_s19 }
 0xda6   :  { %v650_v45 = vpop.permute.xlu0 %649 }
 0xda7   :  { %3171 = vmatmul.mubr.msk.bf16.vlgmr.msra.gmra.mxu0 %vm239_vm3, %v650_v45 }
 0xda8   :  { %3183 = vmatpush3.bf16.msra.mxu0 %v3854_v1  ;;  %3186 = vmatprep.mubr.msk.bf16.mxu0 %vm3732_vm0, %v3731_v0 }
 0xda9   :  { %3184 = vmatprep.subr.bf16.mxu0 %v3731_v0 }
 0xdac   :  { %3185 = vmatpush3.bf16.msra.mxu0 %v3863_v3 }
 0xdad   :  { %3198 = vmatprep.subr.bf16.mxu0 %v3731_v0 }
 0xe67   :  { %v688_v47 = vpop.f32.mrf.mxu0 }
 0xe68   :  { %v704_v48 = vadd.f32 %v688_v47, %v3890_v11  ;;  %v695_v52 = vrot.slane %v688_v47, 6 }
 0xe69   :  { %v3172_v49 = vpop.f32.mrf.mxu0 }
 0xe6a   :  { %v706_v50 = vrot.slane %v704_v48, 6  ;;  %v697_v53 = vadd.f32 %v695_v52, %v3994_v25 }
 0xe6b   :  { %v691_v36 = vpop.f32.mrf.mxu0 }
 0xe6c   :  { %707 = vrot.lane.b32.xlu1 %v706_v50, %s3725_s30  ;;  %v2950_v54 = vmul.f32 -1.442695, %v697_v53 }
 0xe6d   :  { %v3173_v51 = vpop.f32.mrf.mxu0 }
 0xe6e   :  { %3424 = vpow2.f32 %v2950_v54 }
 0xe7b   :  { %v3425_v55 = vpop.eup %3424 }
 0xe7c   :  { %v701_v56 = vadd.f32 1.0, %v3425_v55 }
 0xe7e   :  { %3426 = vrcp.f32 %v701_v56 }
 0xe8b   :  { %v3427_v57 = vpop.eup %3426 }
 0xe8c   :  { %v717_v63 = vsub.f32 1.0, %v3427_v57  ;;  %v726_v5 = vmul.f32 %v3427_v57, %v724_v2 }
 0xede   :  { %v708_v58 = vpop.permute.xlu1 %707 }
 0xedf   :  { %v710_v59 = vmul.f32 %v3427_v57, %v708_v58 }
 0xee1   :  { %712 = vrot.lane.b32.xlu0 %v710_v59, %s3725_s30 }
 0xf53   :  { %v713_v60 = vpop.permute.xlu0 %712 }
 0xf54   :  { %v715_v61 = vadd.f32 %v713_v60, %v3994_v25 }
 0xf56   :  { %3428 = vtanh.f32 %v715_v61 }
 0xf63   :  { %v3429_v62 = vpop.eup %3428 }
 0xf64   :  { %719 = vrot.lane.b32.xlu1 %v3429_v62, %s3734_s19 }
 0xfd6   :  { %v720_v4 = vpop.permute.xlu1 %719 }
 0xfd7   :  { %v722_v6 = vmul.f32 %v720_v4, %v717_v63 }
 0xfd9   :  { %v727_v7 = vadd.f32 %v726_v5, %v722_v6 }
 0xfdb   :  { %v728_v8 = vpack.c.bf16 %v727_v7, %v727_v7  ;;  %v806_v35 = vrot.slane %v727_v7, 6  ;;  %v892_v40 = vsel %vm558_vm4, %v4000_v41, %v727_v7 }
 0xfdd   :  { %v730_v10 = vrot.slane %v728_v8, 1 }
 0xfdf   :  { %731 = vrot.lane.b32.xlu0 %v730_v10, %s3734_s19 }
0x1051   :  { %v732_v12 = vpop.permute.xlu0 %731 }
0x1052   :  { %3179 = vmatmul.mubr.msk.bf16.vlgmr.msra.gmra.mxu1 %vm239_vm3, %v732_v12 }
0x1053   :  { %3191 = vmatpush3.bf16.msra.mxu1 %v3854_v1  ;;  %3194 = vmatprep.mubr.msk.bf16.mxu1 %vm3732_vm0, %v3731_v0 }
0x1054   :  { %3192 = vmatprep.subr.bf16.mxu1 %v3731_v0 }
0x1057   :  { %3193 = vmatpush3.bf16.msra.mxu1 %v3863_v3 }
0x1058   :  { %3206 = vmatprep.subr.bf16.mxu1 %v3731_v0 }
0x1112   :  { %v770_v13 = vpop.f32.mrf.mxu1 }
0x1113   :  { %v786_v14 = vadd.f32 %v770_v13, %v3890_v11  ;;  %v777_v22 = vrot.slane %v770_v13, 4 }
0x1114   :  { %v3180_v17 = vpop.f32.mrf.mxu1 }
0x1115   :  { %v788_v18 = vrot.slane %v786_v14, 4  ;;  %v779_v23 = vadd.f32 %v777_v22, %v3994_v25  ;;  %v4065_v22 = vadd.f32 %v3899_v20, %v3960_v42 }
0x1116   :  { %v773_v21 = vpop.f32.mrf.mxu1 }
0x1117   :  { %789 = vrot.lane.b32.xlu1 %v788_v18, %s3725_s30  ;;  %v2952_v24 = vmul.f32 -1.442695, %v779_v23 }
0x1118   :  { %v3181_v19 = vpop.f32.mrf.mxu1 }
0x1119   :  { %3430 = vpow2.f32 %v2952_v24 }
0x1126   :  { %v3431_v26 = vpop.eup %3430 }
0x1127   :  { %v783_v27 = vadd.f32 1.0, %v3431_v26 }
0x1129   :  { %3432 = vrcp.f32 %v783_v27 }
0x1136   :  { %v3433_v28 = vpop.eup %3432 }
0x1137   :  { %v799_v34 = vsub.f32 1.0, %v3433_v28  ;;  %v808_v37 = vmul.f32 %v3433_v28, %v806_v35 }
0x1189   :  { %v790_v29 = vpop.permute.xlu1 %789 }
0x118a   :  { %v792_v30 = vmul.f32 %v3433_v28, %v790_v29 }
0x118c   :  { %794 = vrot.lane.b32.xlu0 %v792_v30, %s3725_s30 }
0x11fe   :  { %v795_v31 = vpop.permute.xlu0 %794 }
0x11ff   :  { %v797_v32 = vadd.f32 %v795_v31, %v3994_v25 }
0x1201   :  { %3434 = vtanh.f32 %v797_v32 }
0x120e   :  { %v3435_v33 = vpop.eup %3434 }
0x120f   :  { %801 = vrot.lane.b32.xlu1 %v3435_v33, %s3734_s19 }
0x1281   :  { %v802_v16 = vpop.permute.xlu1 %801 }
0x1282   :  { %v804_v38 = vmul.f32 %v802_v16, %v799_v34 }
0x1284   :  { %v809_v39 = vadd.f32 %v808_v37, %v804_v38 }
0x1286   :  { %v810_v43 = vpack.c.bf16 %v809_v39, %v809_v39  ;;  %v893_v45 = vsel %vm560_vm5, %v892_v40, %v809_v39  ;;  %v888_v4 = vrot.slane %v809_v39, 6 }
0x1288   :  { %v812_v47 = vrot.slane %v810_v43, 2 }
0x128a   :  { %813 = vrot.lane.b32.xlu0 %v812_v47, %s3734_s19 }
0x12fc   :  { %v814_v48 = vpop.permute.xlu0 %813 }
0x12fd   :  { %3187 = vmatmul.mubr.msk.bf16.vlgmr.msra.gmra.mxu0 %vm239_vm3, %v814_v48 }
0x12fe   :  { %3199 = vmatpush3.bf16.msra.mxu0 %v3854_v1  ;;  %3202 = vmatprep.mubr.msk.bf16.mxu0 %vm3732_vm0, %v3731_v0 }
0x12ff   :  { %3200 = vmatprep.subr.bf16.mxu0 %v3731_v0 }
0x1302   :  { %3201 = vmatpush3.bf16.msra.mxu0 %v3863_v3 }
0x1303   :  { %3214 = vmatprep.subr.bf16.mxu0 %v3731_v0 }
0x13bd   :  { %v852_v41 = vpop.f32.mrf.mxu0 }
0x13be   :  { %v868_v49 = vadd.f32 %v852_v41, %v3890_v11  ;;  %v859_v53 = vrot.slane %v852_v41, 2 }
0x13bf   :  { %v3188_v50 = vpop.f32.mrf.mxu0 }
0x13c0   :  { %v870_v36 = vrot.slane %v868_v49, 2  ;;  %v861_v54 = vadd.f32 %v859_v53, %v3994_v25 }
0x13c1   :  { %v855_v51 = vpop.f32.mrf.mxu0 }
0x13c2   :  { %871 = vrot.lane.b32.xlu1 %v870_v36, %s3725_s30  ;;  %v2954_v55 = vmul.f32 -1.442695, %v861_v54 }
0x13c3   :  { %v3189_v52 = vpop.f32.mrf.mxu0 }
0x13c4   :  { %3436 = vpow2.f32 %v2954_v55 }
0x13d1   :  { %v3437_v56 = vpop.eup %3436 }
0x13d2   :  { %v865_v57 = vadd.f32 1.0, %v3437_v56 }
0x13d4   :  { %3438 = vrcp.f32 %v865_v57 }
0x13e1   :  { %v3439_v58 = vpop.eup %3438 }
0x13e2   :  { %v881_v2 = vsub.f32 1.0, %v3439_v58  ;;  %v890_v6 = vmul.f32 %v3439_v58, %v888_v4 }
0x1434   :  { %v872_v59 = vpop.permute.xlu1 %871 }
0x1435   :  { %v874_v60 = vmul.f32 %v3439_v58, %v872_v59 }
0x1437   :  { %876 = vrot.lane.b32.xlu0 %v874_v60, %s3725_s30 }
0x14a9   :  { %v877_v61 = vpop.permute.xlu0 %876 }
0x14aa   :  { %v879_v62 = vadd.f32 %v877_v61, %v3994_v25 }
0x14ac   :  { %3440 = vtanh.f32 %v879_v62 }
0x14b9   :  { %v3441_v63 = vpop.eup %3440 }
0x14ba   :  { %883 = vrot.lane.b32.xlu1 %v3441_v63, %s3734_s19 }
0x152c   :  { %v884_v5 = vpop.permute.xlu1 %883 }
0x152d   :  { %v886_v7 = vmul.f32 %v884_v5, %v881_v2 }
0x152f   :  { %v891_v8 = vadd.f32 %v890_v6, %v886_v7 }
0x1531   :  { %v900_v10 = vpack.c.bf16 %v891_v8, %v891_v8  ;;  %v4051_v12 = vsel %vm562_vm6, %v893_v45, %v891_v8  ;;  %v974_v34 = vrot.slane %v891_v8, 6 }
0x1533   :  { %v902_v13 = vrot.slane %v900_v10, 3 }
0x1535   :  { %903 = vrot.lane.b32.xlu0 %v902_v13, %s3734_s19 }
0x15a7   :  { %v904_v14 = vpop.permute.xlu0 %903 }
0x15a8   :  { %3195 = vmatmul.mubr.msk.bf16.vlgmr.msra.gmra.mxu1 %vm239_vm3, %v904_v14 }
0x15a9   :  { %3207 = vmatpush3.bf16.msra.mxu1 %v3854_v1  ;;  %3210 = vmatprep.mubr.msk.bf16.mxu1 %vm3732_vm0, %v3731_v0 }
0x15aa   :  { %3208 = vmatprep.subr.bf16.mxu1 %v3731_v0 }
0x15ad   :  { %3209 = vmatpush3.bf16.msra.mxu1 %v3863_v3 }
0x15ae   :  { %3222 = vmatprep.subr.bf16.mxu1 %v3731_v0 }
0x1668   :  { %v942_v25 = vpop.f32.mrf.mxu1 }
0x1669   :  { %v955_v17 = vadd.f32 %v942_v25, %v3890_v11  ;;  %v948_v23 = vadd.f32 %v942_v25, %v4065_v22 }
0x166a   :  { %v3196_v18 = vpop.f32.mrf.mxu1 }
0x166b   :  { %957 = vrot.lane.b32.xlu1 %v955_v17, %s3725_s30  ;;  %v2956_v24 = vmul.f32 -1.442695, %v948_v23 }
0x166c   :  { %v945_v21 = vpop.f32.mrf.mxu1 }
0x166d   :  { %3442 = vpow2.f32 %v2956_v24 }
0x166e   :  { %v3197_v19 = vpop.f32.mrf.mxu1 }
0x167a   :  { %v3443_v26 = vpop.eup %3442 }
0x167b   :  { %v952_v27 = vadd.f32 1.0, %v3443_v26 }
0x167d   :  { %3444 = vrcp.f32 %v952_v27 }
0x168a   :  { %v3445_v28 = vpop.eup %3444 }
0x168b   :  { %v967_v42 = vsub.f32 1.0, %v3445_v28  ;;  %v976_v16 = vmul.f32 %v3445_v28, %v974_v34 }
0x16dd   :  { %v958_v29 = vpop.permute.xlu1 %957 }
0x16de   :  { %v960_v30 = vmul.f32 %v3445_v28, %v958_v29 }
0x16e0   :  { %962 = vrot.lane.b32.xlu0 %v960_v30, %s3725_s30 }
0x1752   :  { %v963_v31 = vpop.permute.xlu0 %962 }
0x1753   :  { %v965_v32 = vadd.f32 %v963_v31, %v4065_v22 }
0x1755   :  { %3446 = vtanh.f32 %v965_v32 }
0x1762   :  { %v3447_v33 = vpop.eup %3446 }
0x1763   :  { %969 = vrot.lane.b32.xlu1 %v3447_v33, %s3734_s19 }
0x17d5   :  { %v970_v35 = vpop.permute.xlu1 %969 }
0x17d6   :  { %v972_v37 = vmul.f32 %v970_v35, %v967_v42 }
0x17d8   :  { %v4071_v38 = vadd.f32 %v976_v16, %v972_v37 }
0x17da   :  { %v978_v39 = vpack.c.bf16 %v4071_v38, %v4071_v38  ;;  %v1055_v61 = vrot.slane %v4071_v38, 6 }
0x17dc   :  { %980 = vrot.lane.b32.xlu0 %v978_v39, %s3734_s19 }
0x184e   :  { %v981_v40 = vpop.permute.xlu0 %980 }
0x184f   :  { %3203 = vmatmul.mubr.msk.bf16.vlgmr.msra.gmra.mxu0 %vm239_vm3, %v981_v40 }
0x1850   :  { %3215 = vmatpush3.bf16.msra.mxu0 %v3854_v1  ;;  %3218 = vmatprep.mubr.msk.bf16.mxu0 %vm3732_vm0, %v3731_v0 }
0x1851   :  { %3216 = vmatprep.subr.bf16.mxu0 %v3731_v0 }
0x1854   :  { %3217 = vmatpush3.bf16.msra.mxu0 %v3863_v3 }
0x1855   :  { %3230 = vmatprep.subr.bf16.mxu0 %v3731_v0 }
0x190f   :  { %v1019_v43 = vpop.f32.mrf.mxu0 }
0x1910   :  { %v1035_v45 = vadd.f32 %v1019_v43, %v3890_v11  ;;  %v1026_v50 = vrot.slane %v1019_v43, 6 }
0x1911   :  { %v3204_v47 = vpop.f32.mrf.mxu0 }
0x1912   :  { %v1037_v48 = vrot.slane %v1035_v45, 6  ;;  %v1028_v36 = vadd.f32 %v1026_v50, %v4065_v22 }
0x1913   :  { %v1022_v41 = vpop.f32.mrf.mxu0 }
0x1914   :  { %1038 = vrot.lane.b32.xlu1 %v1037_v48, %s3725_s30  ;;  %v2958_v51 = vmul.f32 -1.442695, %v1028_v36 }
0x1915   :  { %v3205_v49 = vpop.f32.mrf.mxu0 }
0x1916   :  { %3448 = vpow2.f32 %v2958_v51 }
0x1923   :  { %v3449_v52 = vpop.eup %3448 }
0x1924   :  { %v1032_v53 = vadd.f32 1.0, %v3449_v52 }
0x1926   :  { %3450 = vrcp.f32 %v1032_v53 }
0x1933   :  { %v3451_v54 = vpop.eup %3450 }
0x1934   :  { %v1048_v60 = vsub.f32 1.0, %v3451_v54  ;;  %v1057_v63 = vmul.f32 %v3451_v54, %v1055_v61 }
0x1986   :  { %v1039_v55 = vpop.permute.xlu1 %1038 }
0x1987   :  { %v1041_v56 = vmul.f32 %v3451_v54, %v1039_v55 }
0x1989   :  { %1043 = vrot.lane.b32.xlu0 %v1041_v56, %s3725_s30 }
0x19fb   :  { %v1044_v57 = vpop.permute.xlu0 %1043 }
0x19fc   :  { %v1046_v58 = vadd.f32 %v1044_v57, %v4065_v22 }
0x19fe   :  { %3452 = vtanh.f32 %v1046_v58 }
0x1a0b   :  { %v3453_v59 = vpop.eup %3452 }
0x1a0c   :  { %1050 = vrot.lane.b32.xlu1 %v3453_v59, %s3734_s19 }
0x1a7e   :  { %v1051_v62 = vpop.permute.xlu1 %1050 }
0x1a7f   :  { %v1053_v2 = vmul.f32 %v1051_v62, %v1048_v60 }
0x1a81   :  { %v1058_v4 = vadd.f32 %v1057_v63, %v1053_v2 }
0x1a83   :  { %v1059_v5 = vpack.c.bf16 %v1058_v4, %v1058_v4  ;;  %v1137_v33 = vrot.slane %v1058_v4, 6  ;;  %v1223_v37 = vsel %vm558_vm4, %v4071_v38, %v1058_v4 }
0x1a85   :  { %v1061_v6 = vrot.slane %v1059_v5, 1 }
0x1a87   :  { %1062 = vrot.lane.b32.xlu0 %v1061_v6, %s3734_s19 }
0x1af9   :  { %v1063_v7 = vpop.permute.xlu0 %1062 }
0x1afa   :  { %3211 = vmatmul.mubr.msk.bf16.vlgmr.msra.gmra.mxu1 %vm239_vm3, %v1063_v7 }
0x1afb   :  { %3223 = vmatpush3.bf16.msra.mxu1 %v3854_v1  ;;  %3226 = vmatprep.mubr.msk.bf16.mxu1 %vm3732_vm0, %v3731_v0 }
0x1afc   :  { %3224 = vmatprep.subr.bf16.mxu1 %v3731_v0 }
0x1aff   :  { %3225 = vmatpush3.bf16.msra.mxu1 %v3863_v3 }
0x1b00   :  { %3238 = vmatprep.subr.bf16.mxu1 %v3731_v0 }
0x1bba   :  { %v1101_v8 = vpop.f32.mrf.mxu1 }
0x1bbb   :  { %v1117_v10 = vadd.f32 %v1101_v8, %v3890_v11  ;;  %v1108_v18 = vrot.slane %v1101_v8, 4  ;;  %v4138_v8 = vld [vmem:[%s4562_s2] sm:$0xff]  }
0x1bbc   :  { %v3212_v13 = vpop.f32.mrf.mxu1 }
0x1bbd   :  { %v1119_v14 = vrot.slane %v1117_v10, 4  ;;  %v1110_v21 = vadd.f32 %v1108_v18, %v4065_v22  ;;  %v4146_v18 = vadd.f32 %v3899_v20, %v3962_v44 }
0x1bbe   :  { %v1104_v25 = vpop.f32.mrf.mxu1 }
0x1bbf   :  { %1120 = vrot.lane.b32.xlu1 %v1119_v14, %s3725_s30  ;;  %v2960_v19 = vmul.f32 -1.442695, %v1110_v21 }
0x1bc0   :  { %v3213_v17 = vpop.f32.mrf.mxu1 }
0x1bc1   :  { %3454 = vpow2.f32 %v2960_v19 }
0x1bce   :  { %v3455_v23 = vpop.eup %3454 }
0x1bcf   :  { %v1114_v24 = vadd.f32 1.0, %v3455_v23 }
0x1bd1   :  { %3456 = vrcp.f32 %v1114_v24 }
0x1bde   :  { %v3457_v26 = vpop.eup %3456 }
0x1bdf   :  { %v1130_v32 = vsub.f32 1.0, %v3457_v26  ;;  %v1139_v34 = vmul.f32 %v3457_v26, %v1137_v33 }
0x1c31   :  { %v1121_v27 = vpop.permute.xlu1 %1120 }
0x1c32   :  { %v1123_v28 = vmul.f32 %v3457_v26, %v1121_v27 }
0x1c34   :  { %1125 = vrot.lane.b32.xlu0 %v1123_v28, %s3725_s30 }
0x1ca6   :  { %v1126_v29 = vpop.permute.xlu0 %1125 }
0x1ca7   :  { %v1128_v30 = vadd.f32 %v1126_v29, %v4065_v22 }
0x1ca9   :  { %3458 = vtanh.f32 %v1128_v30 }
0x1cb6   :  { %v3459_v31 = vpop.eup %3458 }
0x1cb7   :  { %1132 = vrot.lane.b32.xlu1 %v3459_v31, %s3734_s19 }
0x1d29   :  { %v1133_v42 = vpop.permute.xlu1 %1132 }
0x1d2a   :  { %v1135_v35 = vmul.f32 %v1133_v42, %v1130_v32 }
0x1d2c   :  { %v1140_v16 = vadd.f32 %v1139_v34, %v1135_v35 }
0x1d2e   :  { %v1141_v39 = vpack.c.bf16 %v1140_v16, %v1140_v16  ;;  %v1224_v40 = vsel %vm560_vm5, %v1223_v37, %v1140_v16  ;;  %v1219_v60 = vrot.slane %v1140_v16, 6 }
0x1d30   :  { %v1143_v43 = vrot.slane %v1141_v39, 2 }
0x1d32   :  { %1144 = vrot.lane.b32.xlu0 %v1143_v43, %s3734_s19 }
0x1da4   :  { %v1145_v45 = vpop.permute.xlu0 %1144 }
0x1da5   :  { %3219 = vmatmul.mubr.msk.bf16.vlgmr.msra.gmra.mxu0 %vm239_vm3, %v1145_v45 }
0x1da6   :  { %3231 = vmatpush3.bf16.msra.mxu0 %v3854_v1  ;;  %3234 = vmatprep.mubr.msk.bf16.mxu0 %vm3732_vm0, %v3731_v0 }
0x1da7   :  { %3232 = vmatprep.subr.bf16.mxu0 %v3731_v0 }
0x1daa   :  { %3233 = vmatpush3.bf16.msra.mxu0 %v3863_v3 }
0x1dab   :  { %3246 = vmatprep.subr.bf16.mxu0 %v3731_v0 }
0x1e65   :  { %v1183_v38 = vpop.f32.mrf.mxu0 }
0x1e66   :  { %v1199_v47 = vadd.f32 %v1183_v38, %v3890_v11  ;;  %v1190_v36 = vrot.slane %v1183_v38, 2 }
0x1e67   :  { %v3220_v48 = vpop.f32.mrf.mxu0 }
0x1e68   :  { %v1201_v41 = vrot.slane %v1199_v47, 2  ;;  %v1192_v1 = vadd.f32 %v1190_v36, %v4065_v22 }
0x1e69   :  { %v1186_v49 = vpop.f32.mrf.mxu0 }
0x1e6a   :  { %1202 = vrot.lane.b32.xlu1 %v1201_v41, %s3725_s30  ;;  %v2962_v51 = vmul.f32 -1.442695, %v1192_v1 }
0x1e6b   :  { %v3221_v50 = vpop.f32.mrf.mxu0 }
0x1e6c   :  { %3460 = vpow2.f32 %v2962_v51 }
0x1e79   :  { %v3461_v52 = vpop.eup %3460 }
0x1e7a   :  { %v1196_v53 = vadd.f32 1.0, %v3461_v52 }
0x1e7c   :  { %3462 = vrcp.f32 %v1196_v53 }
0x1e89   :  { %v3463_v3 = vpop.eup %3462 }
0x1e8a   :  { %v1212_v59 = vsub.f32 1.0, %v3463_v3  ;;  %v1221_v62 = vmul.f32 %v3463_v3, %v1219_v60 }
0x1edc   :  { %v1203_v54 = vpop.permute.xlu1 %1202 }
0x1edd   :  { %v1205_v55 = vmul.f32 %v3463_v3, %v1203_v54 }
0x1edf   :  { %1207 = vrot.lane.b32.xlu0 %v1205_v55, %s3725_s30 }
0x1f51   :  { %v1208_v56 = vpop.permute.xlu0 %1207 }
0x1f52   :  { %v1210_v57 = vadd.f32 %v1208_v56, %v4065_v22  ;;  %v4129_v22 = vld [vmem:[%s4562_s2 + $0x8] sm:$0xff]  }
0x1f54   :  { %3464 = vtanh.f32 %v1210_v57 }
0x1f61   :  { %v3465_v58 = vpop.eup %3464 }
0x1f62   :  { %1214 = vrot.lane.b32.xlu1 %v3465_v58, %s3734_s19 }
0x1fd4   :  { %v1215_v61 = vpop.permute.xlu1 %1214 }
0x1fd5   :  { %v1217_v63 = vmul.f32 %v1215_v61, %v1212_v59 }
0x1fd7   :  { %v1222_v2 = vadd.f32 %v1221_v62, %v1217_v63 }
0x1fd9   :  { %v1231_v4 = vpack.c.bf16 %v1222_v2, %v1222_v2  ;;  %v4122_v5 = vsel %vm562_vm6, %v1224_v40, %v1222_v2  ;;  %v1305_v44 = vrot.slane %v1222_v2, 6 }
0x1fdb   :  { %v1233_v6 = vrot.slane %v1231_v4, 3 }
0x1fdd   :  { %1234 = vrot.lane.b32.xlu0 %v1233_v6, %s3734_s19 }
0x204f   :  { %v1235_v7 = vpop.permute.xlu0 %1234 }
0x2050   :  { %3227 = vmatmul.mubr.msk.bf16.vlgmr.msra.gmra.mxu1 %vm239_vm3, %v1235_v7 }
0x2051   :  { %3239 = vmatpush3.bf16.msra.mxu1 %v4129_v22  ;;  %3242 = vmatprep.mubr.msk.bf16.mxu1 %vm3732_vm0, %v3731_v0 }
0x2052   :  { %3240 = vmatprep.subr.bf16.mxu1 %v3731_v0 }
0x2055   :  { %3241 = vmatpush3.bf16.msra.mxu1 %v4138_v8 }
0x2056   :  { %3254 = vmatprep.subr.bf16.mxu1 %v3731_v0 }
0x2110   :  { %v1273_v10 = vpop.f32.mrf.mxu1 }
0x2111   :  { %v1286_v13 = vadd.f32 %v1273_v10, %v3890_v11  ;;  %v1279_v21 = vadd.f32 %v1273_v10, %v4146_v18 }
0x2112   :  { %v3228_v14 = vpop.f32.mrf.mxu1 }
0x2113   :  { %1288 = vrot.lane.b32.xlu1 %v1286_v13, %s3725_s30  ;;  %v2964_v19 = vmul.f32 -1.442695, %v1279_v21 }
0x2114   :  { %v1276_v25 = vpop.f32.mrf.mxu1 }
0x2115   :  { %3466 = vpow2.f32 %v2964_v19 }
0x2116   :  { %v3229_v17 = vpop.f32.mrf.mxu1 }
0x2122   :  { %v3467_v23 = vpop.eup %3466 }
0x2123   :  { %v1283_v24 = vadd.f32 1.0, %v3467_v23 }
0x2125   :  { %3468 = vrcp.f32 %v1283_v24 }
0x2132   :  { %v3469_v26 = vpop.eup %3468 }
0x2133   :  { %v1298_v20 = vsub.f32 1.0, %v3469_v26  ;;  %v1307_v33 = vmul.f32 %v3469_v26, %v1305_v44 }
0x2185   :  { %v1289_v27 = vpop.permute.xlu1 %1288 }
0x2186   :  { %v1291_v28 = vmul.f32 %v3469_v26, %v1289_v27 }
0x2188   :  { %1293 = vrot.lane.b32.xlu0 %v1291_v28, %s3725_s30 }
0x21fa   :  { %v1294_v29 = vpop.permute.xlu0 %1293 }
0x21fb   :  { %v1296_v30 = vadd.f32 %v1294_v29, %v4146_v18 }
0x21fd   :  { %3470 = vtanh.f32 %v1296_v30 }
0x220a   :  { %v3471_v31 = vpop.eup %3470 }
0x220b   :  { %1300 = vrot.lane.b32.xlu1 %v3471_v31, %s3734_s19 }
0x227d   :  { %v1301_v32 = vpop.permute.xlu1 %1300 }
0x227e   :  { %v1303_v42 = vmul.f32 %v1301_v32, %v1298_v20 }
0x2280   :  { %v4152_v34 = vadd.f32 %v1307_v33, %v1303_v42 }
0x2282   :  { %v1309_v35 = vpack.c.bf16 %v4152_v34, %v4152_v34  ;;  %v1386_v55 = vrot.slane %v4152_v34, 6 }
0x2284   :  { %1311 = vrot.lane.b32.xlu0 %v1309_v35, %s3734_s19 }
0x22f6   :  { %v1312_v16 = vpop.permute.xlu0 %1311 }
0x22f7   :  { %3235 = vmatmul.mubr.msk.bf16.vlgmr.msra.gmra.mxu0 %vm239_vm3, %v1312_v16 }
0x22f8   :  { %3247 = vmatpush3.bf16.msra.mxu0 %v4129_v22  ;;  %3250 = vmatprep.mubr.msk.bf16.mxu0 %vm3732_vm0, %v3731_v0 }
0x22f9   :  { %3248 = vmatprep.subr.bf16.mxu0 %v3731_v0 }
0x22fc   :  { %3249 = vmatpush3.bf16.msra.mxu0 %v4138_v8 }
0x22fd   :  { %3262 = vmatprep.subr.bf16.mxu0 %v3731_v0 }
0x23b7   :  { %v1350_v37 = vpop.f32.mrf.mxu0 }
0x23b8   :  { %v1366_v39 = vadd.f32 %v1350_v37, %v3890_v11  ;;  %v1357_v47 = vrot.slane %v1350_v37, 6 }
0x23b9   :  { %v3236_v40 = vpop.f32.mrf.mxu0 }
0x23ba   :  { %v1368_v43 = vrot.slane %v1366_v39, 6  ;;  %v1359_v48 = vadd.f32 %v1357_v47, %v4146_v18 }
0x23bb   :  { %v1353_v45 = vpop.f32.mrf.mxu0 }
0x23bc   :  { %1369 = vrot.lane.b32.xlu1 %v1368_v43, %s3725_s30  ;;  %v2966_v41 = vmul.f32 -1.442695, %v1359_v48 }
0x23bd   :  { %v3237_v38 = vpop.f32.mrf.mxu0 }
0x23be   :  { %3472 = vpow2.f32 %v2966_v41 }
0x23cb   :  { %v3473_v49 = vpop.eup %3472 }
0x23cc   :  { %v1363_v50 = vadd.f32 1.0, %v3473_v49 }
0x23ce   :  { %3474 = vrcp.f32 %v1363_v50 }
0x23db   :  { %v3475_v36 = vpop.eup %3474 }
0x23dc   :  { %v1379_v54 = vsub.f32 1.0, %v3475_v36  ;;  %v1388_v57 = vmul.f32 %v3475_v36, %v1386_v55 }
0x242e   :  { %v1370_v1 = vpop.permute.xlu1 %1369 }
0x242f   :  { %v1372_v51 = vmul.f32 %v3475_v36, %v1370_v1 }
0x2431   :  { %1374 = vrot.lane.b32.xlu0 %v1372_v51, %s3725_s30 }
0x24a3   :  { %v1375_v52 = vpop.permute.xlu0 %1374 }
0x24a4   :  { %v1377_v53 = vadd.f32 %v1375_v52, %v4146_v18 }
0x24a6   :  { %3476 = vtanh.f32 %v1377_v53 }
0x24b3   :  { %v3477_v3 = vpop.eup %3476 }
0x24b4   :  { %1381 = vrot.lane.b32.xlu1 %v3477_v3, %s3734_s19 }
0x2526   :  { %v1382_v56 = vpop.permute.xlu1 %1381 }
0x2527   :  { %v1384_v58 = vmul.f32 %v1382_v56, %v1379_v54 }
0x2529   :  { %v1389_v59 = vadd.f32 %v1388_v57, %v1384_v58 }
0x252b   :  { %v1390_v60 = vpack.c.bf16 %v1389_v59, %v1389_v59  ;;  %v1468_v30 = vrot.slane %v1389_v59, 6  ;;  %v1554_v33 = vsel %vm558_vm4, %v4152_v34, %v1389_v59 }
0x252d   :  { %v1392_v61 = vrot.slane %v1390_v60, 1 }
0x252f   :  { %1393 = vrot.lane.b32.xlu0 %v1392_v61, %s3734_s19 }
0x25a1   :  { %v1394_v62 = vpop.permute.xlu0 %1393 }
0x25a2   :  { %3243 = vmatmul.mubr.msk.bf16.vlgmr.msra.gmra.mxu1 %vm239_vm3, %v1394_v62 }
0x25a3   :  { %3255 = vmatpush3.bf16.msra.mxu1 %v4129_v22  ;;  %3258 = vmatprep.mubr.msk.bf16.mxu1 %vm3732_vm0, %v3731_v0 }
0x25a4   :  { %3256 = vmatprep.subr.bf16.mxu1 %v3731_v0 }
0x25a7   :  { %3257 = vmatpush3.bf16.msra.mxu1 %v4138_v8 }
0x25a8   :  { %3270 = vmatprep.subr.bf16.mxu1 %v3731_v0 }
0x2662   :  { %v1432_v63 = vpop.f32.mrf.mxu1 }
0x2663   :  { %v1448_v2 = vadd.f32 %v1432_v63, %v3890_v11  ;;  %v1439_v13 = vrot.slane %v1432_v63, 4 }
0x2664   :  { %v3244_v4 = vpop.f32.mrf.mxu1 }
0x2665   :  { %v1450_v6 = vrot.slane %v1448_v2, 4  ;;  %v1441_v14 = vadd.f32 %v1439_v13, %v4146_v18 }
0x2666   :  { %v1435_v7 = vpop.f32.mrf.mxu1 }
0x2667   :  { %1451 = vrot.lane.b32.xlu1 %v1450_v6, %s3725_s30  ;;  %v2968_v25 = vmul.f32 -1.442695, %v1441_v14 }
0x2668   :  { %v3245_v10 = vpop.f32.mrf.mxu1 }
0x2669   :  { %3478 = vpow2.f32 %v2968_v25  ;;  %v3594_v10 = vld [vmem:[%s4563_s3] ss:$0 sm:$0xff] }
0x266a   :  { %v4219_v13 = vadd.f32 %v3594_v10, %v3964_v46 }
0x2676   :  { %v3479_v17 = vpop.eup %3478 }
0x2677   :  { %v1445_v21 = vadd.f32 1.0, %v3479_v17 }
0x2679   :  { %3480 = vrcp.f32 %v1445_v21 }
0x2686   :  { %v3481_v19 = vpop.eup %3480 }
0x2687   :  { %v1461_v29 = vsub.f32 1.0, %v3481_v19  ;;  %v1470_v20 = vmul.f32 %v3481_v19, %v1468_v30 }
0x26d9   :  { %v1452_v23 = vpop.permute.xlu1 %1451 }
0x26da   :  { %v1454_v24 = vmul.f32 %v3481_v19, %v1452_v23 }
0x26dc   :  { %1456 = vrot.lane.b32.xlu0 %v1454_v24, %s3725_s30 }
0x274e   :  { %v1457_v26 = vpop.permute.xlu0 %1456 }
0x274f   :  { %v1459_v27 = vadd.f32 %v1457_v26, %v4146_v18 }
0x2751   :  { %3482 = vtanh.f32 %v1459_v27 }
0x275e   :  { %v3483_v28 = vpop.eup %3482 }
0x275f   :  { %1463 = vrot.lane.b32.xlu1 %v3483_v28, %s3734_s19 }
0x27d1   :  { %v1464_v31 = vpop.permute.xlu1 %1463 }
0x27d2   :  { %v1466_v44 = vmul.f32 %v1464_v31, %v1461_v29 }
0x27d4   :  { %v1471_v32 = vadd.f32 %v1470_v20, %v1466_v44 }
0x27d6   :  { %v1472_v42 = vpack.c.bf16 %v1471_v32, %v1471_v32  ;;  %v1555_v35 = vsel %vm560_vm5, %v1554_v33, %v1471_v32  ;;  %v1550_v55 = vrot.slane %v1471_v32, 6 }
0x27d8   :  { %v1474_v16 = vrot.slane %v1472_v42, 2 }
0x27da   :  { %1475 = vrot.lane.b32.xlu0 %v1474_v16, %s3734_s19 }
0x284c   :  { %v1476_v37 = vpop.permute.xlu0 %1475 }
0x284d   :  { %3251 = vmatmul.mubr.msk.bf16.vlgmr.msra.gmra.mxu0 %vm239_vm3, %v1476_v37 }
0x284e   :  { %3263 = vmatpush3.bf16.msra.mxu0 %v4129_v22  ;;  %3266 = vmatprep.mubr.msk.bf16.mxu0 %vm3732_vm0, %v3731_v0 }
0x284f   :  { %3264 = vmatprep.subr.bf16.mxu0 %v3731_v0 }
0x2852   :  { %3265 = vmatpush3.bf16.msra.mxu0 %v4138_v8 }
0x2853   :  { %3278 = vmatprep.subr.bf16.mxu0 %v3731_v0 }
0x290d   :  { %v1514_v34 = vpop.f32.mrf.mxu0 }
0x290e   :  { %v1530_v39 = vadd.f32 %v1514_v34, %v3890_v11  ;;  %v1521_v47 = vrot.slane %v1514_v34, 2 }
0x290f   :  { %v3252_v40 = vpop.f32.mrf.mxu0 }
0x2910   :  { %v1532_v43 = vrot.slane %v1530_v39, 2  ;;  %v1523_v48 = vadd.f32 %v1521_v47, %v4146_v18 }
0x2911   :  { %v1517_v45 = vpop.f32.mrf.mxu0 }
0x2912   :  { %1533 = vrot.lane.b32.xlu1 %v1532_v43, %s3725_s30  ;;  %v2970_v41 = vmul.f32 -1.442695, %v1523_v48 }
0x2913   :  { %v3253_v38 = vpop.f32.mrf.mxu0 }
0x2914   :  { %3484 = vpow2.f32 %v2970_v41 }
0x2921   :  { %v3485_v49 = vpop.eup %3484 }
0x2922   :  { %v1527_v50 = vadd.f32 1.0, %v3485_v49 }
0x2924   :  { %3486 = vrcp.f32 %v1527_v50 }
0x2931   :  { %v3487_v36 = vpop.eup %3486 }
0x2932   :  { %v1543_v54 = vsub.f32 1.0, %v3487_v36  ;;  %v1552_v57 = vmul.f32 %v3487_v36, %v1550_v55 }
0x2984   :  { %v1534_v1 = vpop.permute.xlu1 %1533 }
0x2985   :  { %v1536_v51 = vmul.f32 %v3487_v36, %v1534_v1 }
0x2987   :  { %1538 = vrot.lane.b32.xlu0 %v1536_v51, %s3725_s30 }
0x29f9   :  { %v1539_v52 = vpop.permute.xlu0 %1538 }
0x29fa   :  { %v1541_v53 = vadd.f32 %v1539_v52, %v4146_v18 }
0x29fc   :  { %3488 = vtanh.f32 %v1541_v53 }
0x2a09   :  { %v3489_v3 = vpop.eup %3488 }
0x2a0a   :  { %1545 = vrot.lane.b32.xlu1 %v3489_v3, %s3734_s19 }
0x2a7c   :  { %v1546_v56 = vpop.permute.xlu1 %1545 }
0x2a7d   :  { %v1548_v58 = vmul.f32 %v1546_v56, %v1543_v54 }
0x2a7f   :  { %v1553_v59 = vadd.f32 %v1552_v57, %v1548_v58 }
0x2a81   :  { %v1562_v60 = vpack.c.bf16 %v1553_v59, %v1553_v59  ;;  %v4203_v61 = vsel %vm562_vm6, %v1555_v35, %v1553_v59  ;;  %v1636_v29 = vrot.slane %v1553_v59, 6 }
0x2a83   :  { %v1564_v62 = vrot.slane %v1562_v60, 3 }
0x2a85   :  { %1565 = vrot.lane.b32.xlu0 %v1564_v62, %s3734_s19 }
0x2af7   :  { %v1566_v63 = vpop.permute.xlu0 %1565 }
0x2af8   :  { %3259 = vmatmul.mubr.msk.bf16.vlgmr.msra.gmra.mxu1 %vm239_vm3, %v1566_v63 }
0x2af9   :  { %3271 = vmatpush3.bf16.msra.mxu1 %v4129_v22  ;;  %3274 = vmatprep.mubr.msk.bf16.mxu1 %vm3732_vm0, %v3731_v0 }
0x2afa   :  { %3272 = vmatprep.subr.bf16.mxu1 %v3731_v0 }
0x2afd   :  { %3273 = vmatpush3.bf16.msra.mxu1 %v4138_v8 }
0x2afe   :  { %3286 = vmatprep.subr.bf16.mxu1 %v3731_v0 }
0x2bb8   :  { %v1604_v18 = vpop.f32.mrf.mxu1 }
0x2bb9   :  { %v1617_v2 = vadd.f32 %v1604_v18, %v3890_v11  ;;  %v1610_v14 = vadd.f32 %v1604_v18, %v4219_v13 }
0x2bba   :  { %v3260_v4 = vpop.f32.mrf.mxu1 }
0x2bbb   :  { %1619 = vrot.lane.b32.xlu1 %v1617_v2, %s3725_s30  ;;  %v2972_v25 = vmul.f32 -1.442695, %v1610_v14 }
0x2bbc   :  { %v1607_v6 = vpop.f32.mrf.mxu1 }
0x2bbd   :  { %3490 = vpow2.f32 %v2972_v25 }
0x2bbe   :  { %v3261_v7 = vpop.f32.mrf.mxu1 }
0x2bca   :  { %v3491_v17 = vpop.eup %3490 }
0x2bcb   :  { %v1614_v21 = vadd.f32 1.0, %v3491_v17 }
0x2bcd   :  { %3492 = vrcp.f32 %v1614_v21 }
0x2bda   :  { %v3493_v19 = vpop.eup %3492 }
0x2bdb   :  { %v1629_v46 = vsub.f32 1.0, %v3493_v19  ;;  %v1638_v31 = vmul.f32 %v3493_v19, %v1636_v29 }
0x2c2d   :  { %v1620_v23 = vpop.permute.xlu1 %1619 }
0x2c2e   :  { %v1622_v24 = vmul.f32 %v3493_v19, %v1620_v23 }
0x2c30   :  { %1624 = vrot.lane.b32.xlu0 %v1622_v24, %s3725_s30 }
0x2ca2   :  { %v1625_v26 = vpop.permute.xlu0 %1624 }
0x2ca3   :  { %v1627_v27 = vadd.f32 %v1625_v26, %v4219_v13 }
0x2ca5   :  { %3494 = vtanh.f32 %v1627_v27 }
0x2cb2   :  { %v3495_v28 = vpop.eup %3494 }
0x2cb3   :  { %1631 = vrot.lane.b32.xlu1 %v3495_v28, %s3734_s19 }
0x2d25   :  { %v1632_v30 = vpop.permute.xlu1 %1631 }
0x2d26   :  { %v1634_v20 = vmul.f32 %v1632_v30, %v1629_v46  ;;  %v3389_v46 = vld [vmem:[%s4565_s5 + $0x8] sm:$0xff]  }
0x2d28   :  { %v4225_v44 = vadd.f32 %v1638_v31, %v1634_v20  ;;  %v3390_v31 = vld [vmem:[%s4565_s5] sm:$0xff]   ;;  %s3735_s5 = smov 48  }
0x2d2a   :  { %v1640_v32 = vpack.c.bf16 %v4225_v44, %v4225_v44  ;;  %v1717_v1 = vrot.slane %v4225_v44, 6 }
0x2d2c   :  { %1642 = vrot.lane.b32.xlu0 %v1640_v32, %s3734_s19 }
0x2d9e   :  { %v1643_v33 = vpop.permute.xlu0 %1642 }
0x2d9f   :  { %3267 = vmatmul.mubr.msk.bf16.vlgmr.msra.gmra.mxu0 %vm239_vm3, %v1643_v33 }
0x2da0   :  { %3279 = vmatpush3.bf16.msra.mxu0 %v4129_v22  ;;  %3282 = vmatprep.mubr.msk.bf16.mxu0 %vm3732_vm0, %v3731_v0 }
0x2da1   :  { %3280 = vmatprep.subr.bf16.mxu0 %v3731_v0 }
0x2da4   :  { %3281 = vmatpush3.bf16.msra.mxu0 %v4138_v8 }
0x2da5   :  { %3302 = vmatprep.subr.bf16.mxu0 %v3731_v0 }
0x2e5f   :  { %v1681_v42 = vpop.f32.mrf.mxu0 }
0x2e60   :  { %v1697_v35 = vadd.f32 %v1681_v42, %v3890_v11  ;;  %v1688_v40 = vrot.slane %v1681_v42, 6  ;;  %v2985_v42 = vld [vmem:[#allocation8] ss:$0 sm:$0xff] }
0x2e61   :  { %v3268_v16 = vpop.f32.mrf.mxu0 }
0x2e62   :  { %v1699_v37 = vrot.slane %v1697_v35, 6  ;;  %v1690_v22 = vadd.f32 %v1688_v40, %v4219_v13 }
0x2e63   :  { %v1684_v34 = vpop.f32.mrf.mxu0 }
0x2e64   :  { %1700 = vrot.lane.b32.xlu1 %v1699_v37, %s3725_s30  ;;  %v2974_v43 = vmul.f32 -1.442695, %v1690_v22  ;;  %v4290_v37 = vld [vmem:[%s4566_s6] sm:$0xff]  }
0x2e65   :  { %v3269_v39 = vpop.f32.mrf.mxu0 }
0x2e66   :  { %3496 = vpow2.f32 %v2974_v43 }
0x2e73   :  { %v3497_v45 = vpop.eup %3496 }
0x2e74   :  { %v1694_v38 = vadd.f32 1.0, %v3497_v45 }
0x2e76   :  { %3498 = vrcp.f32 %v1694_v38 }
0x2e83   :  { %v3499_v8 = vpop.eup %3498 }
0x2e84   :  { %v1710_v36 = vsub.f32 1.0, %v3499_v8  ;;  %v1719_v52 = vmul.f32 %v3499_v8, %v1717_v1 }
0x2ed6   :  { %v1701_v47 = vpop.permute.xlu1 %1700 }
0x2ed7   :  { %v1703_v48 = vmul.f32 %v3499_v8, %v1701_v47 }
0x2ed9   :  { %1705 = vrot.lane.b32.xlu0 %v1703_v48, %s3725_s30 }
0x2f4b   :  { %v1706_v41 = vpop.permute.xlu0 %1705 }
0x2f4c   :  { %v1708_v49 = vadd.f32 %v1706_v41, %v4219_v13 }
0x2f4e   :  { %3500 = vtanh.f32 %v1708_v49 }
0x2f5b   :  { %v3501_v50 = vpop.eup %3500 }
0x2f5c   :  { %1712 = vrot.lane.b32.xlu1 %v3501_v50, %s3734_s19 }
0x2fce   :  { %v1713_v51 = vpop.permute.xlu1 %1712 }
0x2fcf   :  { %v1715_v53 = vmul.f32 %v1713_v51, %v1710_v36 }
0x2fd1   :  { %v1720_v3 = vadd.f32 %v1719_v52, %v1715_v53  ;;  %v4317_v53 = vld [vmem:[#allocation6] ss:$0 sm:$0xff] }
0x2fd3   :  { %v1721_v54 = vpack.c.bf16 %v1720_v3, %v1720_v3  ;;  %v1799_v24 = vrot.slane %v1720_v3, 6 }
0x2fd5   :  { %v1723_v55 = vrot.slane %v1721_v54, 1 }
0x2fd7   :  { %1724 = vrot.lane.b32.xlu0 %v1723_v55, %s3734_s19 }
0x3049   :  { %v1725_v56 = vpop.permute.xlu0 %1724 }
0x304a   :  { %3275 = vmatmul.mubr.msk.bf16.vlgmr.msra.gmra.mxu1 %vm239_vm3, %v1725_v56 }
0x304b   :  { %3290 = vmatprep.mubr.msk.bf16.mxu1 %vm3732_vm0, %v3731_v0  ;;  %3287 = vmatpush3.bf16.msra.mxu1 %v3389_v46 }
0x304c   :  { %3288 = vmatprep.subr.bf16.mxu1 %v3731_v0 }
0x304f   :  { %3289 = vmatpush3.bf16.msra.mxu1 %v3390_v31 }
0x3050   :  { %3326 = vmatprep.subr.bf16.mxu1 %v3731_v0 }
0x310a   :  { %v1763_v57 = vpop.f32.mrf.mxu1 }
0x310b   :  { %v1779_v58 = vadd.f32 %v1763_v57, %v3890_v11  ;;  %v1770_v18 = vrot.slane %v1763_v57, 4 }
0x310c   :  { %v3276_v59 = vpop.f32.mrf.mxu1 }
0x310d   :  { %v1781_v60 = vrot.slane %v1779_v58, 4  ;;  %v1772_v2 = vadd.f32 %v1770_v18, %v4219_v13 }
0x310e   :  { %v1766_v62 = vpop.f32.mrf.mxu1 }
0x310f   :  { %1782 = vrot.lane.b32.xlu1 %v1781_v60, %s3725_s30  ;;  %v2976_v4 = vmul.f32 -1.442695, %v1772_v2 }
0x3110   :  { %v3277_v63 = vpop.f32.mrf.mxu1 }
0x3111   :  { %3502 = vpow2.f32 %v2976_v4 }
0x311e   :  { %v3503_v6 = vpop.eup %3502 }
0x311f   :  { %v1776_v7 = vadd.f32 1.0, %v3503_v6 }
0x3121   :  { %3504 = vrcp.f32 %v1776_v7 }
0x312e   :  { %v3505_v10 = vpop.eup %3504 }
0x312f   :  { %v1792_v23 = vsub.f32 1.0, %v3505_v10  ;;  %v1801_v27 = vmul.f32 %v3505_v10, %v1799_v24 }
0x3181   :  { %v1783_v14 = vpop.permute.xlu1 %1782 }
0x3182   :  { %v1785_v25 = vmul.f32 %v3505_v10, %v1783_v14 }
0x3184   :  { %1787 = vrot.lane.b32.xlu0 %v1785_v25, %s3725_s30 }
0x31f6   :  { %v1788_v17 = vpop.permute.xlu0 %1787 }
0x31f7   :  { %v1790_v21 = vadd.f32 %v1788_v17, %v4219_v13 }
0x31f9   :  { %3506 = vtanh.f32 %v1790_v21 }
0x3206   :  { %v3507_v19 = vpop.eup %3506 }
0x3207   :  { %1794 = vrot.lane.b32.xlu1 %v3507_v19, %s3734_s19 }
0x320b   :  { %565 = vrot.lane.b32.xlu1 %v3980_v15, %s3734_s19  ;;  %v1885_v15 = vsel %vm558_vm4, %v4225_v44, %v1720_v3  ;;  %v3387_v44 = vld [vmem:[%s4566_s6 + $0x8] ss:$0 sps:$4 sm:$0xff]   ;;  %s3736_s6 = smov 80  }
0x320c   :  { %v4283_v35 = vsel %vm560_vm5, %v3387_v44, 0 }
0x320f   :  { %2059 = vrot.lane.b32.xlu1 %v2985_v42, %s3735_s5 }
0x3279   :  { %v1795_v26 = vpop.permute.xlu1 %1794 }
0x327a   :  { %v1797_v28 = vmul.f32 %v1795_v26, %v1792_v23 }
0x327c   :  { %v4259_v29 = vadd.f32 %v1801_v27, %v1797_v28 }
0x327d   :  { %v566_v30 = vpop.permute.xlu1 %565 }
0x327e   :  { %568 = vst.msk [vmem:[#allocation2] sm:$0xff] %vm239_vm3, %v566_v30  ;;  %v1803_v20 = vpack.c.bf16 %v4259_v29, %v4259_v29  ;;  %v4272_v32 = vsel %vm560_vm5, %v1885_v15, %v4259_v29 }
0x3280   :  { %v1805_v33 = vrot.slane %v1803_v20, 2 }
0x3281   :  { %v4313_v8 = vpop.permute.xlu1 %2059 }
0x3282   :  { %1806 = vrot.lane.b32.xlu0 %v1805_v33, %s3734_s19 }
0x3285   :  { %v1893_v34 = vld [vmem:[#allocation2] sm:$0xff] }
0x3286   :  { %896 = vrot.lane.b32.xlu0 %v4051_v12, %s3734_s19 }
0x32f4   :  { %v1807_v16 = vpop.permute.xlu0 %1806 }
0x32f5   :  { %3283 = vmatmul.mubr.msk.bf16.vlgmr.msra.gmra.mxu0 %vm239_vm3, %v1807_v16 }
0x32f6   :  { %3303 = vmatpush3.bf16.msra.mxu0 %v4283_v35  ;;  %3306 = vmatprep.mubr.msk.bf16.mxu0 %vm3732_vm0, %v3731_v0 }
0x32f7   :  { %3304 = vmatprep.subr.bf16.mxu0 %v3731_v0 }
0x32f8   :  { %v897_v12 = vpop.permute.xlu0 %896 }
0x32f9   :  { %899 = vst.msk [vmem:[#allocation2 + $0x8] sm:$0xff] %vm239_vm3, %v897_v12 }
0x32fa   :  { %3305 = vmatpush3.bf16.msra.mxu0 %v4290_v37 }
0x32fb   :  { %3310 = vmatprep.subr.bf16.mxu0 %v3731_v0 }
0x32fd   :  { %3307 = vmatmul.mubr.bf16.vlgmr.msra.gmra.mxu0 %v3733_v9 }
0x32fe   :  { %3311 = vmatpush3.bf16.msra.mxu0 %v4283_v35  ;;  %3314 = vmatprep.mubr.msk.bf16.mxu0 %vm3732_vm0, %v3731_v0 }
0x32ff   :  { %3312 = vmatprep.subr.bf16.mxu0 %v3731_v0 }
0x3300   :  { %v1894_v39 = vld [vmem:[#allocation2 + $0x8] sm:$0xff] }
0x3301   :  { %v1898_v40 = vpack.c.bf16 %v1894_v39, %v1893_v34 }
0x3302   :  { %3313 = vmatpush3.bf16.msra.mxu0 %v4290_v37 }
0x3303   :  { %3291 = vmatmul.mubr.msk.bf16.vlgmr.msra.gmra.mxu1 %vm239_vm3, %v1898_v40  ;;  %3318 = vmatprep.subr.bf16.mxu0 %v3731_v0 }
0x3304   :  { %3294 = vmatprep.mubr.msk.bf16.mxu1 %vm3732_vm0, %v3731_v0  ;;  %3327 = vmatpush3.bf16.msra.mxu1 %v4283_v35 }
0x3305   :  { %3328 = vmatprep.subr.bf16.mxu1 %v3731_v0 }
0x3308   :  { %3329 = vmatpush3.bf16.msra.mxu1 %v4290_v37 }
0x33b5   :  { %v4311_v22 = vpop.f32.mrf.mxu0 }
0x33b6   :  { %v1861_v16 = vadd.f32 %v4311_v22, %v3890_v11  ;;  %v1852_v34 = vrot.slane %v4311_v22, 2 }
0x33b7   :  { %v3284_v43 = vpop.f32.mrf.mxu0 }
0x33b8   :  { %v1863_v12 = vrot.slane %v1861_v16, 2  ;;  %v1854_v39 = vadd.f32 %v1852_v34, %v4219_v13 }
0x33b9   :  { %v1848_v45 = vpop.f32.mrf.mxu0 }
0x33ba   :  { %v2978_v40 = vmul.f32 -1.442695, %v1854_v39 }
0x33bb   :  { %v3285_v38 = vpop.f32.mrf.mxu0 }
0x33bd   :  { %v2046_v47 = vpop.f32.mrf.mxu0 }
0x33be   :  { %v2062_v48 = vadd.f32 %v4313_v8, %v2046_v47 }
0x33bf   :  { %v3308_v41 = vpop.f32.mrf.mxu0 }
0x33c0   :  { %2064 = vrot.lane.b32.xlu0 %v2062_v48, %s3736_s6 }
0x33c1   :  { %v2049_v49 = vpop.f32.mrf.mxu0 }
0x33c3   :  { %v1967_v50 = vpop.f32.mrf.mxu1  ;;  %v3309_v36 = vpop.f32.mrf.mxu0 }
0x33c4   :  { %v1968_v3 = vadd.f32 %v4317_v53, %v1967_v50 }
0x33c5   :  { %v3292_v1 = vpop.f32.mrf.mxu1 }
0x33c6   :  { %v2052_v54 = vadd.f32 %v2046_v47, %v1968_v3 }
0x33c7   :  { %v1970_v51 = vpop.f32.mrf.mxu1 }
0x33c8   :  { %v2988_v55 = vmul.f32 -1.442695, %v2052_v54  ;;  %v1971_v26 = vadd.f32 %v4317_v53, %v1970_v51 }
0x33c9   :  { %v3293_v52 = vpop.f32.mrf.mxu1 }
0x33ca   :  { %3508 = vpow2.f32 %v2988_v55 }
0x33d7   :  { %v3509_v56 = vpop.eup %3508 }
0x33d8   :  { %v2056_v57 = vadd.f32 1.0, %v3509_v56 }
0x33da   :  { %3510 = vrcp.f32 %v2056_v57  ;;  %v1881_v57 = vrot.slane %v4259_v29, 6 }
0x33e7   :  { %v3511_v58 = vpop.eup %3510 }
0x33e8   :  { %v2074_v2 = vsub.f32 1.0, %v3511_v58  ;;  %v2080_v6 = vmul.f32 0.0, %v3511_v58 }
0x3432   :  { %v2065_v59 = vpop.permute.xlu0 %2064 }
0x3433   :  { %v2067_v60 = vmul.f32 %v3511_v58, %v2065_v59 }
0x3435   :  { %2069 = vrot.lane.b32.xlu1 %v2067_v60, %s3735_s5 }
0x34a7   :  { %v2070_v62 = vpop.permute.xlu1 %2069 }
0x34a8   :  { %v2072_v63 = vadd.f32 %v2070_v62, %v1968_v3 }
0x34aa   :  { %3512 = vtanh.f32 %v2072_v63 }
0x34b7   :  { %v3513_v18 = vpop.eup %3512 }
0x34b8   :  { %2076 = vrot.lane.b32.xlu0 %v3513_v18, %s3737_s1 }
0x352a   :  { %v2077_v4 = vpop.permute.xlu0 %2076 }
0x352b   :  { %v2079_v7 = vmul.f32 %v2077_v4, %v2074_v2 }
0x352d   :  { %v4328_v10 = vadd.f32 %v2080_v6, %v2079_v7 }
0x352f   :  { %v2087_v14 = vpack.c.bf16 %v4328_v10, %v4328_v10 }
0x3531   :  { %2089 = vrot.lane.b32.xlu1 %v2087_v14, %s3737_s1 }
0x35a3   :  { %v2090_v25 = vpop.permute.xlu1 %2089 }
0x35a4   :  { %3315 = vmatmul.mubr.msk.bf16.vlgmr.msra.gmra.mxu0 %vm121_vm7, %v2090_v25 }
0x35a5   :  { %3319 = vmatpush3.bf16.msra.mxu0 %v4283_v35  ;;  %3322 = vmatprep.mubr.msk.bf16.mxu0 %vm3732_vm0, %v3731_v0 }
0x35a6   :  { %3320 = vmatprep.subr.bf16.mxu0 %v3731_v0 }
0x35a9   :  { %3321 = vmatpush3.bf16.msra.mxu0 %v4290_v37 }
0x35aa   :  { %3334 = vmatprep.subr.bf16.mxu0 %v3731_v0 }
0x3664   :  { %v2128_v17 = vpop.f32.mrf.mxu0 }
0x3665   :  { %v2141_v21 = vadd.f32 %v2128_v17, %v4313_v8  ;;  %v2134_v27 = vadd.f32 %v2128_v17, %v1971_v26 }
0x3666   :  { %v3316_v19 = vpop.f32.mrf.mxu0 }
0x3667   :  { %2143 = vrot.lane.b32.xlu0 %v2141_v21, %s3736_s6  ;;  %v2990_v28 = vmul.f32 -1.442695, %v2134_v27 }
0x3668   :  { %v2131_v23 = vpop.f32.mrf.mxu0 }
0x3669   :  { %3514 = vpow2.f32 %v2990_v28 }
0x366a   :  { %v3317_v24 = vpop.f32.mrf.mxu0 }
0x3676   :  { %v3515_v46 = vpop.eup %3514 }
0x3677   :  { %v2138_v30 = vadd.f32 1.0, %v3515_v46 }
0x3679   :  { %3516 = vrcp.f32 %v2138_v30 }
0x3686   :  { %v3517_v31 = vpop.eup %3516 }
0x3687   :  { %v2153_v38 = vsub.f32 1.0, %v3517_v31  ;;  %v2159_v48 = vmul.f32 %v3517_v31, %v4328_v10 }
0x36d9   :  { %v2144_v15 = vpop.permute.xlu0 %2143 }
0x36da   :  { %v2146_v20 = vmul.f32 %v3517_v31, %v2144_v15 }
0x36dc   :  { %2148 = vrot.lane.b32.xlu1 %v2146_v20, %s3735_s5 }
0x374e   :  { %v2149_v33 = vpop.permute.xlu1 %2148 }
0x374f   :  { %v2151_v42 = vadd.f32 %v2149_v33, %v1971_v26 }
0x3751   :  { %3518 = vtanh.f32 %v2151_v42 }
0x3752   :  { %3520 = vpow2.f32 %v2978_v40 }
0x375e   :  { %v3519_v44 = vpop.eup %3518 }
0x375f   :  { %2155 = vrot.lane.b32.xlu0 %v3519_v44, %s3737_s1  ;;  %v3521_v43 = vpop.eup %3520 }
0x3760   :  { %v1858_v45 = vadd.f32 1.0, %v3521_v43 }
0x3762   :  { %3522 = vrcp.f32 %v1858_v45 }
0x3763   :  { %1227 = vrot.lane.b32.xlu0 %v4122_v5, %s3734_s19 }
0x3767   :  { %1864 = vrot.lane.b32.xlu0 %v1863_v12, %s3725_s30 }
0x376f   :  { %v3523_v49 = vpop.eup %3522 }
0x3770   :  { %v1874_v56 = vsub.f32 1.0, %v3523_v49  ;;  %v1883_v59 = vmul.f32 %v3523_v49, %v1881_v57 }
0x37d1   :  { %v2156_v47 = vpop.permute.xlu0 %2155 }
0x37d2   :  { %v2158_v11 = vmul.f32 %v2156_v47, %v2153_v38 }
0x37d4   :  { %v4353_v41 = vadd.f32 %v2159_v48, %v2158_v11 }
0x37d5   :  { %v1228_v5 = vpop.permute.xlu0 %1227 }
0x37d6   :  { %1230 = vst.msk [vmem:[#allocation2 + $0x10] sm:$0xff] %vm239_vm3, %v1228_v5  ;;  %v2166_v22 = vpack.c.bf16 %v4353_v41, %v4353_v41 }
0x37d8   :  { %2168 = vrot.lane.b32.xlu1 %v2166_v22, %s3737_s1 }
0x37d9   :  { %v1865_v50 = vpop.permute.xlu0 %1864 }
0x37da   :  { %v1867_v36 = vmul.f32 %v3523_v49, %v1865_v50 }
0x37dc   :  { %1558 = vrot.lane.b32.xlu1 %v4203_v61, %s3734_s19  ;;  %1869 = vrot.lane.b32.xlu0 %v1867_v36, %s3725_s30 }
0x37dd   :  { %v1895_v61 = vld [vmem:[#allocation2 + $0x10] sm:$0xff] }
0x384a   :  { %v2169_v1 = vpop.permute.xlu1 %2168 }
0x384b   :  { %3323 = vmatmul.mubr.msk.bf16.vlgmr.msra.gmra.mxu0 %vm121_vm7, %v2169_v1 }
0x384c   :  { %3335 = vmatpush3.bf16.msra.mxu0 %v4283_v35  ;;  %3338 = vmatprep.mubr.msk.bf16.mxu0 %vm3732_vm0, %v3731_v0 }
0x384d   :  { %3336 = vmatprep.subr.bf16.mxu0 %v3731_v0 }
0x384e   :  { %v1559_v51 = vpop.permute.xlu1 %1558  ;;  %v1870_v52 = vpop.permute.xlu0 %1869 }
0x384f   :  { %1561 = vst.msk [vmem:[#allocation2 + $0x18] sm:$0xff] %vm239_vm3, %v1559_v51  ;;  %v1872_v3 = vadd.f32 %v1870_v52, %v4219_v13 }
0x3850   :  { %3337 = vmatpush3.bf16.msra.mxu0 %v4290_v37 }
0x3851   :  { %3524 = vtanh.f32 %v1872_v3 }
0x3856   :  { %v1896_v54 = vld [vmem:[#allocation2 + $0x18] sm:$0xff] }
0x3857   :  { %v1899_v55 = vpack.c.bf16 %v1896_v54, %v1895_v61 }
0x3859   :  { %3295 = vmatmul.mubr.msk.bf16.gmra.mxu1 %vm239_vm3, %v1899_v55  ;;  %v3391_v55 = vld [vmem:[#allocation9] sm:$0xff]  }
0x385a   :  { %3298 = vmatprep.mubr.msk.bf16.mxu1 %vm3732_vm0, %v3731_v0  ;;  %3354 = vmatprep.subr.bf16.mxu0 %v3391_v55 }
0x385e   :  { %v3525_v35 = vpop.eup %3524 }
0x385f   :  { %1876 = vrot.lane.b32.xlu0 %v3525_v35, %s3734_s19 }
0x38d1   :  { %v1877_v58 = vpop.permute.xlu0 %1876 }
0x38d2   :  { %v1879_v13 = vmul.f32 %v1877_v58, %v1874_v56 }
0x38d4   :  { %v4375_v60 = vadd.f32 %v1883_v59, %v1879_v13  ;;  %v3392_v59 = vld [vmem:[%s4569_s9 + $0x8] ss:$0 sps:$4 sm:$0xff]   ;;  %v3393_v13 = vld [vmem:[%s4569_s9] sm:$0xff]   ;;  %s3738_s9 = smov 32  }
0x38d5   :  { %3366 = vmatprep.subr.msk.bf16.mxu1 %vm560_vm5, %v3392_v59 }
0x38d6   :  { %v1887_v37 = vsel %vm562_vm6, %v4272_v32, %v4375_v60 }
0x38d7   :  { %1889 = vrot.lane.b32.xlu0 %v1887_v37, %s3734_s19 }
0x390b   :  { %v2207_v62 = vpop.f32.mrf.mxu0 }
0x390c   :  { %v2220_v63 = vadd.f32 %v2207_v62, %v4313_v8 }
0x390d   :  { %v3324_v18 = vpop.f32.mrf.mxu0 }
0x390e   :  { %2222 = vrot.lane.b32.xlu1 %v2220_v63, %s3736_s6 }
0x390f   :  { %v2210_v2 = vpop.f32.mrf.mxu0 }
0x3910   :  { %v3004_v2 = vld [vmem:[#allocation12] ss:$0 sm:$0xff] }
0x3911   :  { %v3325_v4 = vpop.f32.mrf.mxu0 }
0x3919   :  { %v1975_v29 = vpop.f32.mrf.mxu1 }
0x391a   :  { %v1976_v32 = vadd.f32 %v4317_v53, %v1975_v29 }
0x391b   :  { %v3296_v6 = vpop.f32.mrf.mxu1 }
0x391c   :  { %v2213_v19 = vadd.f32 %v2207_v62, %v1976_v32 }
0x391d   :  { %v1978_v7 = vpop.f32.mrf.mxu1 }
0x391e   :  { %v2992_v23 = vmul.f32 -1.442695, %v2213_v19  ;;  %v1979_v5 = vadd.f32 %v4317_v53, %v1978_v7 }
0x391f   :  { %v3297_v14 = vpop.f32.mrf.mxu1 }
0x3920   :  { %3526 = vpow2.f32 %v2992_v23 }
0x392d   :  { %v3527_v24 = vpop.eup %3526 }
0x392e   :  { %v2217_v26 = vadd.f32 1.0, %v3527_v24 }
0x3930   :  { %3528 = vrcp.f32 %v2217_v26 }
0x393d   :  { %v3529_v27 = vpop.eup %3528 }
0x393e   :  { %v2232_v44 = vsub.f32 1.0, %v3529_v27  ;;  %v2238_v12 = vmul.f32 %v3529_v27, %v4353_v41 }
0x3949   :  { %v1890_v25 = vpop.permute.xlu0 %1889 }
0x394a   :  { %1892 = vst.msk [vmem:[#allocation2 + $0x20] sm:$0xff] %vm239_vm3, %v1890_v25 }
0x3951   :  { %v1897_v17 = vld [vmem:[#allocation2 + $0x20] sm:$0xff] }
0x3952   :  { %v1900_v21 = vpack.c.bf16 %v1897_v17, %v1897_v17 }
0x3954   :  { %3299 = vmatmul.mubr.msk.bf16.gmra.mxu1 %vm239_vm3, %v1900_v21 }
0x3955   :  { %3330 = vmatprep.mubr.msk.bf16.mxu1 %vm3732_vm0, %v3731_v0 }
0x3980   :  { %v2223_v28 = vpop.permute.xlu1 %2222 }
0x3981   :  { %v2225_v46 = vmul.f32 %v3529_v27, %v2223_v28 }
0x3983   :  { %2227 = vrot.lane.b32.xlu1 %v2225_v46, %s3735_s5 }
0x39f5   :  { %v2228_v30 = vpop.permute.xlu1 %2227 }
0x39f6   :  { %v2230_v31 = vadd.f32 %v2228_v30, %v1976_v32 }
0x39f8   :  { %3530 = vtanh.f32 %v2230_v31 }
0x3a05   :  { %v3531_v15 = vpop.eup %3530 }
0x3a06   :  { %2234 = vrot.lane.b32.xlu1 %v3531_v15, %s3737_s1 }
0x3a14   :  { %v4390_v20 = vpop.f32.mrf.mxu1 }
0x3a16   :  { %v3300_v0 = vpop.f32.mrf.mxu1 }
0x3a18   :  { %v1986_v33 = vpop.f32.mrf.mxu1 }
0x3a1a   :  { %v3301_v42 = vpop.f32.mrf.mxu1 }
0x3a78   :  { %v2235_v16 = vpop.permute.xlu1 %2234 }
0x3a79   :  { %v2237_v34 = vmul.f32 %v2235_v16, %v2232_v44 }
0x3a7b   :  { %v2239_v39 = vadd.f32 %v2238_v12, %v2237_v34  ;;  %v4442_v12 = vld [vmem:[#allocation11] ss:$0 sm:$0xff] }
0x3a7d   :  { %v2245_v40 = vpack.c.bf16 %v2239_v39, %v2239_v39 }
0x3a7f   :  { %2247 = vrot.lane.b32.xlu1 %v2245_v40, %s3737_s1 }
0x3af1   :  { %v2248_v43 = vpop.permute.xlu1 %2247 }
0x3af2   :  { %3331 = vmatmul.mubr.msk.bf16.vlgmr.msra.gmra.mxu1 %vm121_vm7, %v2248_v43 }
0x3bb2   :  { %v2286_v45 = vpop.f32.mrf.mxu1 }
0x3bb3   :  { %v2299_v38 = vadd.f32 %v2286_v45, %v4313_v8  ;;  %v2292_v22 = vadd.f32 %v2286_v45, %v1979_v5 }
0x3bb4   :  { %v3332_v47 = vpop.f32.mrf.mxu1 }
0x3bb5   :  { %2301 = vrot.lane.b32.xlu0 %v2299_v38, %s3736_s6  ;;  %v2994_v49 = vmul.f32 -1.442695, %v2292_v22 }
0x3bb6   :  { %v2289_v48 = vpop.f32.mrf.mxu1 }
0x3bb7   :  { %3532 = vpow2.f32 %v2994_v49 }
0x3bb8   :  { %v3333_v11 = vpop.f32.mrf.mxu1 }
0x3bb9   :  { %v1984_v11 = vadd.f32 %v4317_v53, %v4390_v20 }
0x3bc4   :  { %v3533_v50 = vpop.eup %3532 }
0x3bc5   :  { %v2296_v36 = vadd.f32 1.0, %v3533_v50 }
0x3bc7   :  { %3534 = vrcp.f32 %v2296_v36 }
0x3bd4   :  { %v3535_v1 = vpop.eup %3534 }
0x3bd5   :  { %v2311_v35 = vsub.f32 1.0, %v3535_v1  ;;  %v2317_v57 = vmul.f32 %v3535_v1, %v2239_v39 }
0x3c27   :  { %v2302_v51 = vpop.permute.xlu0 %2301 }
0x3c28   :  { %v2304_v52 = vmul.f32 %v3535_v1, %v2302_v51 }
0x3c2a   :  { %2306 = vrot.lane.b32.xlu1 %v2304_v52, %s3735_s5 }
0x3c9c   :  { %v2307_v3 = vpop.permute.xlu1 %2306 }
0x3c9d   :  { %v2309_v61 = vadd.f32 %v2307_v3, %v1979_v5 }
0x3c9f   :  { %3536 = vtanh.f32 %v2309_v61 }
0x3cac   :  { %v3537_v54 = vpop.eup %3536 }
0x3cad   :  { %2313 = vrot.lane.b32.xlu0 %v3537_v54, %s3737_s1 }
0x3cb1   :  { %2083 = vrot.lane.b32.xlu0 %v4328_v10, %s3737_s1  ;;  %v2447_v10 = vsel %vm560_vm5, %v3392_v59, 0 }
0x3cb2   :  { %3343 = vmatpush3.bf16.msra.mxu1 %v2447_v10 }
0x3cb3   :  { %3344 = vmatprep.subr.bf16.mxu1 %v3393_v13 }
0x3cb5   :  { %2241 = vrot.lane.b32.xlu0 %v2239_v39, %s3737_s1 }
0x3cb6   :  { %3345 = vmatpush3.bf16.msra.mxu1 %v3393_v13 }
0x3cb9   :  { %2608 = vrot.lane.b32.xlu0 %v3004_v2, %s3738_s9 }
0x3d1f   :  { %v2314_v56 = vpop.permute.xlu0 %2313 }
0x3d20   :  { %v2316_v58 = vmul.f32 %v2314_v56, %v2311_v35 }
0x3d22   :  { %v4409_v37 = vadd.f32 %v2317_v57, %v2316_v58 }
0x3d23   :  { %v2084_v62 = vpop.permute.xlu0 %2083 }
0x3d24   :  { %v2324_v63 = vpack.c.bf16 %v4409_v37, %v4409_v37  ;;  %2086 = vst.msk [vmem:[#allocation3] sm:$0xff] %vm121_vm7, %v2084_v62 }
0x3d26   :  { %2326 = vrot.lane.b32.xlu1 %v2324_v63, %s3737_s1 }
0x3d27   :  { %v2242_v18 = vpop.permute.xlu0 %2241 }
0x3d28   :  { %2244 = vst.msk [vmem:[#allocation3 + $0x10] sm:$0xff] %vm121_vm7, %v2242_v18 }
0x3d2a   :  { %2162 = vrot.lane.b32.xlu1 %v4353_v41, %s3737_s1 }
0x3d2b   :  { %v2403_v41 = vld [vmem:[#allocation3] sm:$0xff]  ;;  %v4430_v27 = vpop.permute.xlu0 %2608 }
0x3d2e   :  { %2320 = vrot.lane.b32.xlu1 %v4409_v37, %s3737_s1 }
0x3d2f   :  { %v2405_v25 = vld [vmem:[#allocation3 + $0x10] sm:$0xff] }
0x3d98   :  { %v2327_v4 = vpop.permute.xlu1 %2326 }
0x3d99   :  { %3339 = vmatmul.mubr.msk.bf16.vlgmr.msra.gmra.mxu0 %vm121_vm7, %v2327_v4 }
0x3d9a   :  { %3355 = vmatpush3.bf16.msra.mxu0 %v3391_v55  ;;  %3356 = vmatprep.mubr.bf16.mxu0 %v3733_v9 }
0x3d9b   :  { %3360 = vmatprep.subr.bf16.mxu0 %v3391_v55 }
0x3d9c   :  { %v2163_v29 = vpop.permute.xlu1 %2162 }
0x3d9d   :  { %2165 = vst.msk [vmem:[#allocation3 + $0x8] sm:$0xff] %vm121_vm7, %v2163_v29 }
0x3da0   :  { %v2321_v6 = vpop.permute.xlu1 %2320 }
0x3da1   :  { %2323 = vst.msk [vmem:[#allocation3 + $0x18] sm:$0xff] %vm121_vm7, %v2321_v6  ;;  %3357 = vmatmul.mubr.bf16.vlgmr.msra.gmra.mxu0 %v3733_v9 }
0x3da2   :  { %3361 = vmatpush3.bf16.msra.mxu0 %v3391_v55 }
0x3da4   :  { %v2404_v7 = vld [vmem:[#allocation3 + $0x8] sm:$0xff] }
0x3da5   :  { %v2411_v14 = vpack.c.bf16 %v2404_v7, %v2403_v41 }
0x3da7   :  { %3346 = vmatprep.mubr.msk.bf16.mxu1 %vm121_vm7, %v2411_v14 }
0x3da8   :  { %v2406_v17 = vld [vmem:[#allocation3 + $0x18] sm:$0xff] }
0x3da9   :  { %v2412_v21 = vpack.c.bf16 %v2406_v17, %v2405_v25 }
0x3dab   :  { %3347 = vmatmul.mubr.msk.bf16.vlgmr.msra.gmra.mxu1 %vm121_vm7, %v2412_v21 }
0x3e59   :  { %v2365_v32 = vpop.f32.mrf.mxu0 }
0x3e5a   :  { %v2378_v0 = vadd.f32 %v2365_v32, %v4313_v8  ;;  %v2371_v5 = vadd.f32 %v2365_v32, %v1984_v11 }
0x3e5b   :  { %v3340_v19 = vpop.f32.mrf.mxu0 }
0x3e5c   :  { %v2996_v36 = vmul.f32 -1.442695, %v2371_v5 }
0x3e5d   :  { %v2368_v23 = vpop.f32.mrf.mxu0 }
0x3e5f   :  { %v3341_v24 = vpop.f32.mrf.mxu0 }
0x3e61   :  { %v3358_v26 = vpop.f32.mrf.mxu0 }
0x3e62   :  { %v2613_v31 = vadd.f32 %v3358_v26, %v4430_v27 }
0x3e63   :  { %v2565_v28 = vpop.f32.mrf.mxu0 }
0x3e64   :  { %v2611_v9 = vadd.f32 %v4430_v27, %v2565_v28 }
0x3e65   :  { %v3359_v46 = vpop.f32.mrf.mxu0 }
0x3e66   :  { %2619 = vrot.lane.b32.xlu1 %v2611_v9, %s3734_s19  ;;  %v2614_v33 = vadd.f32 %v3359_v46, %v4430_v27 }
0x3e67   :  { %v2568_v30 = vpop.f32.mrf.mxu0 }
0x3e68   :  { %v2612_v15 = vadd.f32 %v4430_v27, %v2568_v30 }
0x3e6a   :  { %2623 = vrot.lane.b32.xlu1 %v2613_v31, %s3734_s19  ;;  %2621 = vrot.lane.b32.xlu0 %v2612_v15, %s3734_s19 }
0x3e6b   :  { %v3348_v42 = vpop.f32.mrf.mxu1 }
0x3e6c   :  { %v2492_v40 = vadd.f32 %v3348_v42, %v4442_v12 }
0x3e6d   :  { %v2483_v44 = vpop.f32.mrf.mxu1 }
0x3e6e   :  { %2380 = vrot.lane.b32.xlu1 %v2378_v0, %s3736_s6  ;;  %2625 = vrot.lane.b32.xlu0 %v2614_v33, %s3734_s19  ;;  %v2484_v34 = vadd.f32 %v4442_v12, %v2483_v44  ;;  %v2582_v8 = vadd.f32 %v3358_v26, %v2492_v40 }
0x3e6f   :  { %v3349_v16 = vpop.f32.mrf.mxu1 }
0x3e70   :  { %v2580_v43 = vadd.f32 %v2565_v28, %v2484_v34  ;;  %v2495_v47 = vadd.f32 %v3349_v16, %v4442_v12  ;;  %v3008_v22 = vmul.f32 -1.442695, %v2582_v8 }
0x3e71   :  { %v2486_v39 = vpop.f32.mrf.mxu1 }
0x3e72   :  { %v2487_v45 = vadd.f32 %v4442_v12, %v2486_v39  ;;  %v3006_v38 = vmul.f32 -1.442695, %v2580_v43  ;;  %v2583_v49 = vadd.f32 %v3359_v46, %v2495_v47 }
0x3e74   :  { %v2581_v48 = vadd.f32 %v2568_v30, %v2487_v45  ;;  %3538 = vpow2.f32 %v3006_v38  ;;  %v3009_v1 = vmul.f32 -1.442695, %v2583_v49 }
0x3e75   :  { %3540 = vpow2.f32 %v3008_v22 }
0x3e76   :  { %v3007_v50 = vmul.f32 -1.442695, %v2581_v48 }
0x3e78   :  { %3542 = vpow2.f32 %v3007_v50 }
0x3e79   :  { %3544 = vpow2.f32 %v2996_v36 }
0x3e7a   :  { %3546 = vpow2.f32 %v3009_v1 }
0x3e81   :  { %v3539_v51 = vpop.eup %3538 }
0x3e82   :  { %v3541_v52 = vpop.eup %3540  ;;  %v2596_v3 = vadd.f32 1.0, %v3539_v51 }
0x3e83   :  { %v2598_v54 = vadd.f32 1.0, %v3541_v52 }
0x3e84   :  { %3548 = vrcp.f32 %v2596_v3 }
0x3e85   :  { %v3543_v61 = vpop.eup %3542  ;;  %3550 = vrcp.f32 %v2598_v54 }
0x3e86   :  { %v3545_v55 = vpop.eup %3544  ;;  %v2597_v35 = vadd.f32 1.0, %v3543_v61 }
0x3e87   :  { %v3547_v53 = vpop.eup %3546  ;;  %v2375_v20 = vadd.f32 1.0, %v3545_v55 }
0x3e88   :  { %v2599_v56 = vadd.f32 1.0, %v3547_v53  ;;  %3552 = vrcp.f32 %v2597_v35 }
0x3e89   :  { %3554 = vrcp.f32 %v2375_v20 }
0x3e8a   :  { %3556 = vrcp.f32 %v2599_v56 }
0x3e91   :  { %v3549_v57 = vpop.eup %3548 }
0x3e92   :  { %v3551_v13 = vpop.eup %3550  ;;  %v2659_v42 = vsub.f32 1.0, %v3549_v57 }
0x3e93   :  { %v2661_v8 = vsub.f32 1.0, %v3551_v13  ;;  %v2685_v49 = vmul.f32 0.0, %v3551_v13 }
0x3e95   :  { %v3553_v62 = vpop.eup %3552 }
0x3e96   :  { %v3555_v4 = vpop.eup %3554  ;;  %v2660_v16 = vsub.f32 1.0, %v3553_v62  ;;  %v2684_v43 = vmul.f32 0.0, %v3553_v62 }
0x3e97   :  { %v3557_v29 = vpop.eup %3556  ;;  %v2390_v38 = vsub.f32 1.0, %v3555_v4  ;;  %v2396_v54 = vmul.f32 %v3555_v4, %v4409_v37  ;;  %v2409_v37 = vld [vmem:[#allocation3 + $0x30] sm:$0xff] }
0x3e98   :  { %v2662_v5 = vsub.f32 1.0, %v3557_v29  ;;  %v2686_v1 = vmul.f32 0.0, %v3557_v29 }
0x3ed8   :  { %v2620_v58 = vpop.permute.xlu1 %2619 }
0x3ed9   :  { %v2631_v59 = vmul.f32 %v3549_v57, %v2620_v58  ;;  %v2408_v58 = vld [vmem:[#allocation3 + $0x28] sm:$0xff] }
0x3edb   :  { %2639 = vrot.lane.b32.xlu0 %v2631_v59, %s3738_s9 }
0x3edc   :  { %v2624_v10 = vpop.permute.xlu1 %2623  ;;  %v2622_v63 = vpop.permute.xlu0 %2621 }
0x3edd   :  { %v2633_v18 = vmul.f32 %v3551_v13, %v2624_v10  ;;  %v2632_v2 = vmul.f32 %v3553_v62, %v2622_v63 }
0x3edf   :  { %2643 = vrot.lane.b32.xlu0 %v2633_v18, %s3738_s9  ;;  %2641 = vrot.lane.b32.xlu1 %v2632_v2, %s3738_s9 }
0x3ee0   :  { %v2381_v6 = vpop.permute.xlu1 %2380  ;;  %v2626_v41 = vpop.permute.xlu0 %2625 }
0x3ee1   :  { %v2383_v7 = vmul.f32 %v3555_v4, %v2381_v6  ;;  %v2634_v14 = vmul.f32 %v3557_v29, %v2626_v41 }
0x3ee3   :  { %2385 = vrot.lane.b32.xlu0 %v2383_v7, %s3735_s5  ;;  %2645 = vrot.lane.b32.xlu1 %v2634_v14, %s3738_s9 }
0x3f4d   :  { %v2640_v25 = vpop.permute.xlu0 %2639 }
0x3f4e   :  { %v2651_v17 = vadd.f32 %v2640_v25, %v2484_v34 }
0x3f50   :  { %3558 = vtanh.f32 %v2651_v17 }
0x3f51   :  { %v2644_v21 = vpop.permute.xlu0 %2643  ;;  %v2642_v32 = vpop.permute.xlu1 %2641 }
0x3f52   :  { %v2653_v19 = vadd.f32 %v2644_v21, %v2492_v40  ;;  %v2652_v23 = vadd.f32 %v2642_v32, %v2487_v45  ;;  %v2683_v40 = vmul.f32 0.0, %v3549_v57  ;;  %v2410_v57 = vld [vmem:[#allocation3 + $0x38] sm:$0xff] }
0x3f53   :  { %v2414_v13 = vpack.c.bf16 %v2410_v57, %v2409_v37 }
0x3f54   :  { %3560 = vtanh.f32 %v2653_v19 }
0x3f55   :  { %3562 = vtanh.f32 %v2652_v23  ;;  %v2386_v24 = vpop.permute.xlu0 %2385  ;;  %v2646_v26 = vpop.permute.xlu1 %2645 }
0x3f56   :  { %v2388_v28 = vadd.f32 %v2386_v24, %v1984_v11  ;;  %v2654_v9 = vadd.f32 %v2646_v26, %v2495_v47 }
0x3f58   :  { %3564 = vtanh.f32 %v2388_v28 }
0x3f59   :  { %3566 = vtanh.f32 %v2654_v9 }
0x3f5d   :  { %v3559_v46 = vpop.eup %3558 }
0x3f5e   :  { %2667 = vrot.lane.b32.xlu1 %v3559_v46, %s3739_s21 }
0x3f61   :  { %v3561_v30 = vpop.eup %3560 }
0x3f62   :  { %v3563_v31 = vpop.eup %3562  ;;  %2671 = vrot.lane.b32.xlu1 %v3561_v30, %s3739_s21 }
0x3f63   :  { %2669 = vrot.lane.b32.xlu0 %v3563_v31, %s3739_s21 }
0x3f65   :  { %v3565_v15 = vpop.eup %3564 }
0x3f66   :  { %v3567_v0 = vpop.eup %3566  ;;  %2392 = vrot.lane.b32.xlu1 %v3565_v15, %s3737_s1 }
0x3f67   :  { %2673 = vrot.lane.b32.xlu0 %v3567_v0, %s3739_s21 }
0x3fd0   :  { %v2668_v33 = vpop.permute.xlu1 %2667 }
0x3fd1   :  { %v2679_v44 = vmul.f32 %v2668_v33, %v2659_v42 }
0x3fd3   :  { %v4460_v47 = vadd.f32 %v2683_v40, %v2679_v44 }
0x3fd4   :  { %v2672_v34 = vpop.permute.xlu1 %2671 }
0x3fd5   :  { %v2670_v39 = vpop.permute.xlu0 %2669  ;;  %v2681_v11 = vmul.f32 %v2672_v34, %v2661_v8 }
0x3fd6   :  { %v2680_v45 = vmul.f32 %v2670_v39, %v2660_v16 }
0x3fd7   :  { %v4466_v3 = vadd.f32 %v2685_v49, %v2681_v11 }
0x3fd8   :  { %v4462_v48 = vadd.f32 %v2684_v43, %v2680_v45  ;;  %v2393_v22 = vpop.permute.xlu1 %2392 }
0x3fd9   :  { %v2674_v50 = vpop.permute.xlu0 %2673  ;;  %v2395_v52 = vmul.f32 %v2393_v22, %v2390_v38 }
0x3fda   :  { %v2711_v36 = vpack.c.bf16 %v4462_v48, %v4460_v47  ;;  %v2682_v51 = vmul.f32 %v2674_v50, %v2662_v5 }
0x3fdb   :  { %v2397_v35 = vadd.f32 %v2396_v54, %v2395_v52 }
0x3fdc   :  { %v4468_v61 = vadd.f32 %v2686_v1, %v2682_v51  ;;  %2715 = vrot.lane.b32.xlu0 %v2711_v36, %s3739_s21 }
0x3fde   :  { %v2712_v55 = vpack.c.bf16 %v4468_v61, %v4466_v3 }
0x3fe0   :  { %2717 = vrot.lane.b32.xlu1 %v2712_v55, %s3739_s21  ;;  %2399 = vrot.lane.b32.xlu0 %v2397_v35, %s3737_s1 }
0x404e   :  { %v2716_v53 = vpop.permute.xlu0 %2715 }
0x404f   :  { %3362 = vmatprep.mubr.msk.bf16.mxu0 %vm2528_vm8, %v2716_v53 }
0x4052   :  { %v2400_v20 = vpop.permute.xlu0 %2399  ;;  %v2718_v56 = vpop.permute.xlu1 %2717 }
0x4053   :  { %2402 = vst.msk [vmem:[#allocation3 + $0x20] sm:$0xff] %vm121_vm7, %v2400_v20  ;;  %3363 = vmatmul.mubr.msk.bf16.vlgmr.msra.gmra.mxu0 %vm2528_vm8, %v2718_v56 }
0x4054   :  { %2909 = vst.msk [vmem:[%s4575_s15 - $0x6] sm:$0xc0] %vm2908_vm9, %v2400_v20 }
0x405a   :  { %v2407_v59 = vld [vmem:[#allocation3 + $0x20] sm:$0xff] }
0x405b   :  { %v2413_v62 = vpack.c.bf16 %v2408_v58, %v2407_v59 }
0x405d   :  { %3350 = vmatprep.mubr.msk.bf16.mxu1 %vm121_vm7, %v2413_v62 }
0x405e   :  { %3351 = vmatmul.mubr.msk.bf16.gmra.mxu1 %vm121_vm7, %v2414_v13 }
0x4113   :  { %v3364_v10 = vpop.f32.mrf.mxu0 }
0x4114   :  { %v2804_v29 = vadd.f32 %v3364_v10, %v4430_v27 }
0x4115   :  { %v2759_v63 = vpop.f32.mrf.mxu0 }
0x4116   :  { %v2802_v18 = vadd.f32 %v2759_v63, %v4430_v27 }
0x4117   :  { %v3365_v2 = vpop.f32.mrf.mxu0 }
0x4118   :  { %2810 = vrot.lane.b32.xlu1 %v2802_v18, %s3734_s19  ;;  %v2805_v41 = vadd.f32 %v3365_v2, %v4430_v27 }
0x4119   :  { %v2762_v4 = vpop.f32.mrf.mxu0 }
0x411a   :  { %v2803_v6 = vadd.f32 %v2762_v4, %v4430_v27 }
0x411c   :  { %2814 = vrot.lane.b32.xlu1 %v2804_v29, %s3734_s19  ;;  %2812 = vrot.lane.b32.xlu0 %v2803_v6, %s3734_s19 }
0x411e   :  { %v3352_v7 = vpop.f32.mrf.mxu1 }
0x411f   :  { %v2508_v32 = vadd.f32 %v3352_v7, %v4442_v12 }
0x4120   :  { %2816 = vrot.lane.b32.xlu0 %v2805_v41, %s3734_s19  ;;  %v2499_v14 = vpop.f32.mrf.mxu1 }
0x4121   :  { %v2500_v17 = vadd.f32 %v4442_v12, %v2499_v14  ;;  %v2776_v24 = vadd.f32 %v3364_v10, %v2508_v32 }
0x4122   :  { %v3353_v25 = vpop.f32.mrf.mxu1 }
0x4123   :  { %v2774_v19 = vadd.f32 %v2759_v63, %v2500_v17  ;;  %v2511_v28 = vadd.f32 %v3353_v25, %v4442_v12  ;;  %v3014_v46 = vmul.f32 -1.442695, %v2776_v24 }
0x4124   :  { %v2502_v21 = vpop.f32.mrf.mxu1 }
0x4125   :  { %v2503_v23 = vadd.f32 %v4442_v12, %v2502_v21  ;;  %v3012_v26 = vmul.f32 -1.442695, %v2774_v19  ;;  %v2777_v27 = vadd.f32 %v3365_v2, %v2511_v28 }
0x4127   :  { %v2775_v9 = vadd.f32 %v2762_v4, %v2503_v23  ;;  %3568 = vpow2.f32 %v3012_v26  ;;  %v3015_v31 = vmul.f32 -1.442695, %v2777_v27 }
0x4128   :  { %3570 = vpow2.f32 %v3014_v46 }
0x4129   :  { %v3013_v30 = vmul.f32 -1.442695, %v2775_v9 }
0x412b   :  { %3572 = vpow2.f32 %v3013_v30 }
0x412c   :  { %3574 = vpow2.f32 %v3015_v31 }
0x4134   :  { %v3569_v15 = vpop.eup %3568 }
0x4135   :  { %v3571_v0 = vpop.eup %3570  ;;  %v2790_v33 = vadd.f32 1.0, %v3569_v15 }
0x4136   :  { %v2792_v44 = vadd.f32 1.0, %v3571_v0 }
0x4137   :  { %3576 = vrcp.f32 %v2790_v33 }
0x4138   :  { %v3573_v42 = vpop.eup %3572  ;;  %3578 = vrcp.f32 %v2792_v44 }
0x4139   :  { %v2791_v16 = vadd.f32 1.0, %v3573_v42  ;;  %v3575_v34 = vpop.eup %3574 }
0x413a   :  { %v2793_v39 = vadd.f32 1.0, %v3575_v34 }
0x413b   :  { %3580 = vrcp.f32 %v2791_v16 }
0x413c   :  { %3582 = vrcp.f32 %v2793_v39 }
0x4144   :  { %v3577_v12 = vpop.eup %3576 }
0x4145   :  { %v3579_v45 = vpop.eup %3578  ;;  %v2850_v4 = vsub.f32 1.0, %v3577_v12 }
0x4146   :  { %v2852_v10 = vsub.f32 1.0, %v3579_v45  ;;  %v2876_v29 = vmul.f32 %v3579_v45, %v4466_v3 }
0x4148   :  { %v3581_v8 = vpop.eup %3580 }
0x4149   :  { %v3583_v49 = vpop.eup %3582  ;;  %v2851_v13 = vsub.f32 1.0, %v3581_v8  ;;  %v2875_v63 = vmul.f32 %v3581_v8, %v4462_v48 }
0x414a   :  { %v2853_v7 = vsub.f32 1.0, %v3583_v49  ;;  %v2877_v21 = vmul.f32 %v3583_v49, %v4468_v61 }
0x418a   :  { %v2811_v40 = vpop.permute.xlu1 %2810 }
0x418b   :  { %v2822_v43 = vmul.f32 %v3577_v12, %v2811_v40 }
0x418d   :  { %2830 = vrot.lane.b32.xlu1 %v2822_v43, %s3738_s9 }
0x418e   :  { %v2815_v38 = vpop.permute.xlu1 %2814  ;;  %v2813_v11 = vpop.permute.xlu0 %2812 }
0x418f   :  { %v2824_v5 = vmul.f32 %v3579_v45, %v2815_v38  ;;  %v2823_v22 = vmul.f32 %v3581_v8, %v2813_v11 }
0x4191   :  { %2832 = vrot.lane.b32.xlu0 %v2823_v22, %s3738_s9  ;;  %2834 = vrot.lane.b32.xlu1 %v2824_v5, %s3738_s9 }
0x4192   :  { %v2817_v50 = vpop.permute.xlu0 %2816 }
0x4193   :  { %v2825_v36 = vmul.f32 %v3583_v49, %v2817_v50 }
0x4195   :  { %2836 = vrot.lane.b32.xlu0 %v2825_v36, %s3738_s9 }
0x41ff   :  { %v2831_v1 = vpop.permute.xlu1 %2830 }
0x4200   :  { %v2842_v51 = vadd.f32 %v2831_v1, %v2500_v17 }
0x4202   :  { %3584 = vtanh.f32 %v2842_v51 }
0x4203   :  { %v2833_v52 = vpop.permute.xlu0 %2832  ;;  %v2835_v54 = vpop.permute.xlu1 %2834 }
0x4204   :  { %v2843_v55 = vadd.f32 %v2833_v52, %v2503_v23  ;;  %v2844_v35 = vadd.f32 %v2835_v54, %v2508_v32  ;;  %v2874_v23 = vmul.f32 %v3577_v12, %v4460_v47 }
0x4206   :  { %3586 = vtanh.f32 %v2843_v55 }
0x4207   :  { %3588 = vtanh.f32 %v2844_v35  ;;  %v2837_v53 = vpop.permute.xlu0 %2836 }
0x4208   :  { %v2845_v20 = vadd.f32 %v2837_v53, %v2511_v28 }
0x420a   :  { %3590 = vtanh.f32 %v2845_v20 }
0x420f   :  { %v3585_v56 = vpop.eup %3584 }
0x4210   :  { %2858 = vrot.lane.b32.xlu1 %v3585_v56, %s3739_s21 }
0x4213   :  { %v3587_v37 = vpop.eup %3586 }
0x4214   :  { %v3589_v57 = vpop.eup %3588  ;;  %2860 = vrot.lane.b32.xlu0 %v3587_v37, %s3739_s21 }
0x4215   :  { %2862 = vrot.lane.b32.xlu1 %v3589_v57, %s3739_s21 }
0x4217   :  { %v3591_v58 = vpop.eup %3590 }
0x4218   :  { %2864 = vrot.lane.b32.xlu0 %v3591_v58, %s3739_s21 }
0x4219   :  { %2695 = vrot.lane.b32.xlu1 %v4460_v47, %s3739_s21 }
0x421c   :  { %2697 = vrot.lane.b32.xlu0 %v4462_v48, %s3739_s21 }
0x421d   :  { %2699 = vrot.lane.b32.xlu1 %v4466_v3, %s3739_s21 }
0x4220   :  { %2701 = vrot.lane.b32.xlu0 %v4468_v61, %s3739_s21 }
0x4282   :  { %v2859_v59 = vpop.permute.xlu1 %2858 }
0x4283   :  { %v2870_v14 = vmul.f32 %v2859_v59, %v2850_v4 }
0x4285   :  { %v2878_v3 = vadd.f32 %v2874_v23, %v2870_v14 }
0x4286   :  { %v2861_v62 = vpop.permute.xlu0 %2860 }
0x4287   :  { %v2871_v18 = vmul.f32 %v2861_v62, %v2851_v13  ;;  %v2863_v2 = vpop.permute.xlu1 %2862 }
0x4288   :  { %v2872_v6 = vmul.f32 %v2863_v2, %v2852_v10 }
0x4289   :  { %v2879_v41 = vadd.f32 %v2875_v63, %v2871_v18 }
0x428a   :  { %v2880_v25 = vadd.f32 %v2876_v29, %v2872_v6  ;;  %v2865_v17 = vpop.permute.xlu0 %2864 }
0x428b   :  { %v2873_v32 = vmul.f32 %v2865_v17, %v2853_v7  ;;  %v2696_v19 = vpop.permute.xlu1 %2695  ;;  %2888 = vrot.lane.b32.xlu0 %v2879_v41, %s3739_s21 }
0x428c   :  { %2707 = vst.msk [vmem:[%s4573_s13] sm:$0xff] %vm2528_vm8, %v2696_v19  ;;  %2890 = vrot.lane.b32.xlu1 %v2880_v25, %s3739_s21 }
0x428d   :  { %v2881_v48 = vadd.f32 %v2877_v21, %v2873_v32 }
0x428e   :  { %v2698_v24 = vpop.permute.xlu0 %2697 }
0x428f   :  { %2708 = vst.msk [vmem:[%s4573_s13 + $0x8] sm:$0xff] %vm2528_vm8, %v2698_v24  ;;  %v2700_v61 = vpop.permute.xlu1 %2699  ;;  %2892 = vrot.lane.b32.xlu0 %v2881_v48, %s3739_s21 }
0x4290   :  { %2709 = vst.msk [vmem:[%s4573_s13 + $0x10] sm:$0xff] %vm2528_vm8, %v2700_v61  ;;  %2886 = vrot.lane.b32.xlu1 %v2878_v3, %s3739_s21 }
0x4292   :  { %v2702_v47 = vpop.permute.xlu0 %2701 }
0x4293   :  { %2710 = vst.msk [vmem:[%s4573_s13 + $0x18] sm:$0xff] %vm2528_vm8, %v2702_v47 }
0x4294   :  { %2903 = vrot.lane.b32.xlu1 %v4375_v60, %s3734_s19 }
0x42fd   :  { %v2889_v26 = vpop.permute.xlu0 %2888 }
0x42fe   :  { %2899 = vst.msk [vmem:[%s4573_s13 + $0x28] sm:$0xff] %vm2528_vm8, %v2889_v26  ;;  %v2891_v28 = vpop.permute.xlu1 %2890 }
0x42ff   :  { %2900 = vst.msk [vmem:[%s4573_s13 + $0x30] sm:$0xff] %vm2528_vm8, %v2891_v28 }
0x4301   :  { %v2893_v9 = vpop.permute.xlu0 %2892 }
0x4302   :  { %2901 = vst.msk [vmem:[%s4573_s13 + $0x38] sm:$0xff] %vm2528_vm8, %v2893_v9  ;;  %v2887_v60 = vpop.permute.xlu1 %2886 }
0x4303   :  { %2898 = vst.msk [vmem:[%s4573_s13 + $0x20] sm:$0xff] %vm2528_vm8, %v2887_v60 }
0x4304   :  { %2911 = vst.msk [vmem:[%s4576_s16 - $0x6] sm:$0xc0] %vm2910_vm10, %v2887_v60 }
0x4306   :  { %v2904_v46 = vpop.permute.xlu1 %2903 }
0x4307   :  { %2907 = vst.msk [vmem:[%s4574_s14 - $0x6] sm:$0xc0] %vm2906_vm11, %v2904_v46 }
0x4308   :  { %2928 = vsyncpa [#allocation5], 1 }
0x4309   :  { %2929 = vsyncpa [#allocation7], 1 }
0x430a   :  { %2930 = vsyncpa [#allocation10], 1 }
0x430b   :  { %2931 = vsyncpa [#allocation13], 1 }

</bundles_post_ra>
